<compile_context>
chip_gen: v5e
topology: v5e:2x2
jax: 0.10.0
libtpu: 0.0.40
codegen_flags: <defaults>
</compile_context>

<pallas_src>
import jax
import jax.numpy as jnp
from jax import lax
from jax.experimental import pallas as pl
from jax.experimental.pallas import tpu as pltpu


def _round_up(x, m):
    return ((x + m - 1) // m) * m


def double_conv_kernel(x_ref, w1_ref, w2_ref, s1_ref, b1_ref, s2_ref, b2_ref,
                       o_ref, col1_s, mid_s, stk_s):
    """One (batch, row-tile) step of fused (conv3x3 -> BN -> ReLU) x 2.

    Cp = Cout rounded up to a multiple of 128 (lane-dense weights/intermediate).
      x_ref  : (1, H+4, W+2, Cin)  bf16  zero-padded input, full image (resident)
      w1_ref : (9*Cin, Cp)         bf16  conv1 weight, im2col (kh,kw,cin)-major
      w2_ref : (3*Cp, 3*Cp)        bf16  conv2 weight, [kh*Cp + c, kw*Cp + j]
      s*/b*  : (1, Cp)             f32   folded BN scale / bias
      o_ref  : (1, TH, W, Cout)    f32   output row tile (real channels only)
      col1_s : ((TH+2)*W, 9*Cin)   f32   conv1 im2col patches
      mid_s  : (TH+2, W+2, Cp)     f32   conv1 act. rows R-1..R+TH (+ zero halo)
      stk_s  : (TH*(W+2), 3*Cp)    bf16  kh-stacked intermediate (conv2 LHS)
    """
    r = pl.program_id(1)
    nr = pl.num_programs(1)
    _, TH, W, Cout = o_ref.shape
    Cin = x_ref.shape[3]
    Cp = mid_s.shape[2]
    TH2 = TH + 2
    rows1 = TH2 * W

    # ---- conv1: single im2col matmul, K = 9*Cin --------------------------
    # The TH+2 intermediate rows this tile needs (1-row recompute halo for
    # conv2) require padded-input rows [r*TH, r*TH + TH+4) — always in range
    # because the wrapper padded 2 rows top/bottom and 1 col left/right.
    row0 = pl.multiple_of(r * TH, TH)
    xwin = x_ref[0, pl.ds(row0, TH + 4), :, :].astype(jnp.float32)  # (TH+4,W+2,Cin)
    for kh in range(3):
        xrow = xwin[kh:kh + TH2]                                    # (TH+2,W+2,Cin)
        for kw in range(3):
            t = kh * 3 + kw
            col1_s[:, t * Cin:(t + 1) * Cin] = (
                xrow[:, kw:kw + W, :].reshape(rows1, Cin))

    y1 = jnp.dot(col1_s[...].astype(jnp.bfloat16), w1_ref[...],
                 preferred_element_type=jnp.float32)
    y1 = jnp.maximum(y1 * s1_ref[...] + b1_ref[...], 0.0)           # BN + ReLU

    # ---- stage intermediate rows R-1..R+TH with a zero halo (conv2 pad) ---
    mid_s[:, 0:1, :] = jnp.zeros((TH2, 1, Cp), jnp.float32)
    mid_s[:, W + 1:W + 2, :] = jnp.zeros((TH2, 1, Cp), jnp.float32)
    mid_s[:, 1:W + 1, :] = y1.reshape(TH2, W, Cp)

    # Rows that fall outside the image are conv2's zero padding, not conv1
    # output — zero them on the first / last row tile only.
    @pl.when(r == 0)
    def _():
        mid_s[0:1, :, :] = jnp.zeros((1, W + 2, Cp), jnp.float32)

    @pl.when(r == nr - 1)
    def _():
        mid_s[TH + 1:TH + 2, :, :] = jnp.zeros((1, W + 2, Cp), jnp.float32)

    # ---- conv2: kh-stack (3 aligned bf16 copies) + ONE K=3*Cp matmul -------
    for kh in range(3):
        stk_s[:, kh * Cp:(kh + 1) * Cp] = (
            mid_s[kh:kh + TH, :, :].reshape(TH * (W + 2), Cp).astype(jnp.bfloat16))

    p = jnp.dot(stk_s[...], w2_ref[...], preferred_element_type=jnp.float32)
    p = p.reshape(TH, W + 2, 3 * Cp)
    # kw shift applied on the f32 result: out[o,w] = sum_kw P[o, w+kw, kw-chunk]
    acc2 = (p[:, 0:W, 0:Cp]
            + p[:, 1:W + 1, Cp:2 * Cp]
            + p[:, 2:W + 2, 2 * Cp:3 * Cp])                          # (TH, W, Cp)

    y2 = jnp.maximum(acc2 * s2_ref[...].reshape(1, 1, Cp)
                     + b2_ref[...].reshape(1, 1, Cp), 0.0)
    o_ref[...] = y2[:, :, :Cout].reshape(1, TH, W, Cout).astype(o_ref.dtype)


def _fold_pack(params, Cin, Cout, Cp):
    """Weights / folded-BN affine in the kernel's lane-dense layouts."""
    # conv1: HWIO (3,3,Cin,Cout) -> (9*Cin, Cp), rows ordered (kh, kw, cin).
    w1 = params["w1"].astype(jnp.bfloat16).reshape(9 * Cin, Cout)
    w1p = jnp.zeros((9 * Cin, Cp), jnp.bfloat16).at[:, :Cout].set(w1)
    # conv2: HWIO (3,3,Cout,Cout) -> (3*Cp, 3*Cp) with [kh*Cp + c, kw*Cp + j].
    w2 = params["w2"].astype(jnp.bfloat16)
    w2p = jnp.zeros((3, 3, Cp, Cp), jnp.bfloat16).at[:, :, :Cout, :Cout].set(w2)
    w2cat = jnp.transpose(w2p, (0, 2, 1, 3)).reshape(3 * Cp, 3 * Cp)

    def pad_c(v):  # (1, Cout) -> (1, Cp), padded lanes = 0
        return jnp.zeros((1, Cp), jnp.float32).at[:, :Cout].set(
            v.reshape(1, Cout).astype(jnp.float32))

    return (w1p, w2cat, pad_c(params["scale1"]), pad_c(params["bias1"]),
            pad_c(params["scale2"]), pad_c(params["bias2"]))


def double_conv(x_nhwc, params, *, tile_rows=8):
    """Fused Double_conv forward.  NHWC in -> NHWC out (f32, real channels)."""
    B, H, W, Cin = x_nhwc.shape
    Cout = params["w1"].shape[-1]
    Cp = _round_up(Cout, 128)
    TH = tile_rows if (tile_rows < H and H % tile_rows == 0) else H
    NR = H // TH
    TH2 = TH + 2

    # Pad once in the wrapper (2 rows / 1 col of zeros each side) and cast the
    # MXU operand to bf16 — the kernel then needs no full-buffer zero fills.
    xp = jnp.pad(x_nhwc.astype(jnp.bfloat16), ((0, 0), (2, 2), (1, 1), (0, 0)))

    w1p, w2cat, s1, b1, s2, b2 = _fold_pack(params, Cin, Cout, Cp)

    out = pl.pallas_call(
        double_conv_kernel,
        out_shape=jax.ShapeDtypeStruct((B, H, W, Cout), jnp.float32),
        grid=(B, NR),
        in_specs=[
            # Full padded image per batch; block index is constant along the
            # row-tile axis, so it is fetched once per image and stays resident.
            # TODO(synk): for large Cin at production resolutions, replace this
            # with a manually DMA'd (TH+4)-row halo window (memory_space=pl.ANY).
            pl.BlockSpec((1, H + 4, W + 2, Cin), lambda b, r: (b, 0, 0, 0)),
            # Weights / BN vectors: constant index -> resident across the grid.
            pl.BlockSpec((9 * Cin, Cp), lambda b, r: (0, 0)),
            pl.BlockSpec((3 * Cp, 3 * Cp), lambda b, r: (0, 0)),
            pl.BlockSpec((1, Cp), lambda b, r: (0, 0)),
            pl.BlockSpec((1, Cp), lambda b, r: (0, 0)),
            pl.BlockSpec((1, Cp), lambda b, r: (0, 0)),
            pl.BlockSpec((1, Cp), lambda b, r: (0, 0)),
        ],
        out_specs=pl.BlockSpec((1, TH, W, Cout), lambda b, r: (b, r, 0, 0)),
        scratch_shapes=[
            pltpu.VMEM((TH2 * W, 9 * Cin), jnp.float32),       # conv1 im2col
            pltpu.VMEM((TH2, W + 2, Cp), jnp.float32),         # intermediate+halo
            pltpu.VMEM((TH * (W + 2), 3 * Cp), jnp.bfloat16),  # kh-stacked LHS
        ],
        compiler_params=pltpu.CompilerParams(
            dimension_semantics=("parallel", "parallel"),
            vmem_limit_bytes=64 * 1024 * 1024),
    )(xp, w1p, w2cat, s1, b1, s2, b2)
    return out


def init_params(key, in_planes, out_planes, eps=1e-5):
    ks = jax.random.split(key, 10)
    # Conv weights generated in PyTorch layout (Cout, Cin, 3, 3), stored HWIO.
    w1 = 0.1 * jax.random.normal(ks[0], (out_planes, in_planes, 3, 3), jnp.float32)
    w2 = 0.1 * jax.random.normal(ks[1], (out_planes, out_planes, 3, 3), jnp.float32)

    def bn(kg, kb, km, kv, c):
        gamma = 1.0 + 0.1 * jax.random.normal(kg, (c,), jnp.float32)
        beta = 0.1 * jax.random.normal(kb, (c,), jnp.float32)
        mean = 0.05 * jax.random.normal(km, (c,), jnp.float32)
        var = 0.5 + 0.5 * jnp.abs(jax.random.normal(kv, (c,), jnp.float32))
        scale = gamma / jnp.sqrt(var + eps)
        bias = beta - mean * scale
        return scale.reshape(1, c), bias.reshape(1, c)

    s1, b1 = bn(ks[2], ks[3], ks[4], ks[5], out_planes)
    s2, b2 = bn(ks[6], ks[7], ks[8], ks[9], out_planes)
    return dict(
        w1=jnp.transpose(w1, (2, 3, 1, 0)),  # -> (3, 3, Cin, Cout) HWIO
        w2=jnp.transpose(w2, (2, 3, 1, 0)),
        scale1=s1, bias1=b1, scale2=s2, bias2=b2,
    )


def _reference(x_nhwc, params):
    """Pure-JAX NHWC reference with the same numerics (bf16 operands, f32 acc)."""

    def stage(inp, w, s, b):
        dn = lax.conv_dimension_numbers(inp.shape, w.shape,
                                        ("NHWC", "HWIO", "NHWC"))
        y = lax.conv_general_dilated(
            inp.astype(jnp.bfloat16), w.astype(jnp.bfloat16), (1, 1), "SAME",
            dimension_numbers=dn, preferred_element_type=jnp.float32)
        return jnp.maximum(y * s + b, 0.0)

    y = stage(x_nhwc, params["w1"], params["scale1"], params["bias1"])
    y = stage(y, params["w2"], params["scale2"], params["bias2"])
    return y


if __name__ == "__main__":
    key = jax.random.PRNGKey(0)
    k_x, k_p = jax.random.split(key)

    B, Cin, Cout, H, W = 2, 4, 8, 16, 16
    x = jax.random.normal(k_x, (B, H, W, Cin), jnp.float32)   # NHWC
    params = init_params(k_p, Cin, Cout)

    out = jax.block_until_ready(double_conv(x, params))
    ref = jax.block_until_ready(_reference(x, params))

    assert out.shape == (B, H, W, Cout), out.shape
    max_err = float(jnp.max(jnp.abs(out - ref)))
    assert max_err < 2e-3, f"mismatch vs reference: {max_err}"

    print("KERNEL_OK")
</pallas_src>

<mosaic_0001>
module attributes {stable_mosaic.version = 11 : i64} {
  func.func @double_conv_kernel(%arg0: i32, %arg1: i32, %arg2: memref<1x20x18x4xbf16, #tpu.memory_space<vmem>>, %arg3: memref<36x128xbf16, #tpu.memory_space<vmem>>, %arg4: memref<384x384xbf16, #tpu.memory_space<vmem>>, %arg5: memref<1x128xf32, #tpu.memory_space<vmem>>, %arg6: memref<1x128xf32, #tpu.memory_space<vmem>>, %arg7: memref<1x128xf32, #tpu.memory_space<vmem>>, %arg8: memref<1x128xf32, #tpu.memory_space<vmem>>, %arg9: memref<1x8x16x8xf32, #tpu.memory_space<vmem>>, %arg10: memref<160x36xf32, #tpu.memory_space<vmem>>, %arg11: memref<10x18x128xf32, #tpu.memory_space<vmem>>, %arg12: memref<144x384xbf16, #tpu.memory_space<vmem>>) attributes {dimension_semantics = [#tpu.dimension_semantics<parallel>, #tpu.dimension_semantics<parallel>], iteration_bounds = array<i64: 2, 2>, scalar_prefetch = 0 : i64, scratch_operands = 3 : i64, tpu.core_type = #tpu.core_type<tc>, window_params = [{transform_indices = @transform_0, window_bounds = array<i64: 1, 20, 18, 4>}, {pipeline_mode = #tpu.pipeline_mode<synchronous>, transform_indices = @transform_1, window_bounds = array<i64: 36, 128>}, {pipeline_mode = #tpu.pipeline_mode<synchronous>, transform_indices = @transform_2, window_bounds = array<i64: 384, 384>}, {pipeline_mode = #tpu.pipeline_mode<synchronous>, transform_indices = @transform_3, window_bounds = array<i64: 1, 128>}, {pipeline_mode = #tpu.pipeline_mode<synchronous>, transform_indices = @transform_4, window_bounds = array<i64: 1, 128>}, {pipeline_mode = #tpu.pipeline_mode<synchronous>, transform_indices = @transform_5, window_bounds = array<i64: 1, 128>}, {pipeline_mode = #tpu.pipeline_mode<synchronous>, transform_indices = @transform_6, window_bounds = array<i64: 1, 128>}, {transform_indices = @transform_7, window_bounds = array<i64: 1, 8, 16, 8>}]} {
    %c8_i32 = arith.constant 8 : i32
    %0 = arith.muli %arg1, %c8_i32 : i32
    %1 = tpu.assume_multiple %0, 8 : i32
    %c0 = arith.constant 0 : index
    %2 = arith.index_cast %1 : i32 to index
    %c0_0 = arith.constant 0 : index
    %c0_1 = arith.constant 0 : index
    %3 = vector.load %arg2[%c0, %2, %c0_0, %c0_1] : memref<1x20x18x4xbf16, #tpu.memory_space<vmem>>, vector<1x12x18x4xbf16>
    %4 = vector.shape_cast %3 : vector<1x12x18x4xbf16> to vector<12x18x4xbf16>
    %5 = arith.extf %4 : vector<12x18x4xbf16> to vector<12x18x4xf32>
    %6 = vector.extract_strided_slice %5 {offsets = [0, 0, 0], sizes = [10, 18, 4], strides = [1, 1, 1]} : vector<12x18x4xf32> to vector<10x18x4xf32>
    %7 = vector.extract_strided_slice %6 {offsets = [0, 0, 0], sizes = [10, 16, 4], strides = [1, 1, 1]} : vector<10x18x4xf32> to vector<10x16x4xf32>
    %8 = vector.shape_cast %7 : vector<10x16x4xf32> to vector<160x4xf32>
    %c0_2 = arith.constant 0 : index
    %c0_3 = arith.constant 0 : index
    %9 = vector.load %arg10[%c0_2, %c0_3] : memref<160x36xf32, #tpu.memory_space<vmem>>, vector<160x4xf32>
    tpu.vector_store %arg10[%c0_2, %c0_3], %8 {strides = array<i32>} : memref<160x36xf32, #tpu.memory_space<vmem>>, vector<160x4xf32>,
    %10 = vector.extract_strided_slice %6 {offsets = [0, 1, 0], sizes = [10, 16, 4], strides = [1, 1, 1]} : vector<10x18x4xf32> to vector<10x16x4xf32>
    %11 = vector.shape_cast %10 : vector<10x16x4xf32> to vector<160x4xf32>
    %c0_4 = arith.constant 0 : index
    %c4 = arith.constant 4 : index
    %12 = vector.load %arg10[%c0_4, %c4] : memref<160x36xf32, #tpu.memory_space<vmem>>, vector<160x4xf32>
    tpu.vector_store %arg10[%c0_4, %c4], %11 {strides = array<i32>} : memref<160x36xf32, #tpu.memory_space<vmem>>, vector<160x4xf32>,
    %13 = vector.extract_strided_slice %6 {offsets = [0, 2, 0], sizes = [10, 16, 4], strides = [1, 1, 1]} : vector<10x18x4xf32> to vector<10x16x4xf32>
    %14 = vector.shape_cast %13 : vector<10x16x4xf32> to vector<160x4xf32>
    %c0_5 = arith.constant 0 : index
    %c8 = arith.constant 8 : index
    %15 = vector.load %arg10[%c0_5, %c8] : memref<160x36xf32, #tpu.memory_space<vmem>>, vector<160x4xf32>
    tpu.vector_store %arg10[%c0_5, %c8], %14 {strides = array<i32>} : memref<160x36xf32, #tpu.memory_space<vmem>>, vector<160x4xf32>,
    %16 = vector.extract_strided_slice %5 {offsets = [1, 0, 0], sizes = [10, 18, 4], strides = [1, 1, 1]} : vector<12x18x4xf32> to vector<10x18x4xf32>
    %17 = vector.extract_strided_slice %16 {offsets = [0, 0, 0], sizes = [10, 16, 4], strides = [1, 1, 1]} : vector<10x18x4xf32> to vector<10x16x4xf32>
    %18 = vector.shape_cast %17 : vector<10x16x4xf32> to vector<160x4xf32>
    %c0_6 = arith.constant 0 : index
    %c12 = arith.constant 12 : index
    %19 = vector.load %arg10[%c0_6, %c12] : memref<160x36xf32, #tpu.memory_space<vmem>>, vector<160x4xf32>
    tpu.vector_store %arg10[%c0_6, %c12], %18 {strides = array<i32>} : memref<160x36xf32, #tpu.memory_space<vmem>>, vector<160x4xf32>,
    %20 = vector.extract_strided_slice %16 {offsets = [0, 1, 0], sizes = [10, 16, 4], strides = [1, 1, 1]} : vector<10x18x4xf32> to vector<10x16x4xf32>
    %21 = vector.shape_cast %20 : vector<10x16x4xf32> to vector<160x4xf32>
    %c0_7 = arith.constant 0 : index
    %c16 = arith.constant 16 : index
    %22 = vector.load %arg10[%c0_7, %c16] : memref<160x36xf32, #tpu.memory_space<vmem>>, vector<160x4xf32>
    tpu.vector_store %arg10[%c0_7, %c16], %21 {strides = array<i32>} : memref<160x36xf32, #tpu.memory_space<vmem>>, vector<160x4xf32>,
    %23 = vector.extract_strided_slice %16 {offsets = [0, 2, 0], sizes = [10, 16, 4], strides = [1, 1, 1]} : vector<10x18x4xf32> to vector<10x16x4xf32>
    %24 = vector.shape_cast %23 : vector<10x16x4xf32> to vector<160x4xf32>
    %c0_8 = arith.constant 0 : index
    %c20 = arith.constant 20 : index
    %25 = vector.load %arg10[%c0_8, %c20] : memref<160x36xf32, #tpu.memory_space<vmem>>, vector<160x4xf32>
    tpu.vector_store %arg10[%c0_8, %c20], %24 {strides = array<i32>} : memref<160x36xf32, #tpu.memory_space<vmem>>, vector<160x4xf32>,
    %26 = vector.extract_strided_slice %5 {offsets = [2, 0, 0], sizes = [10, 18, 4], strides = [1, 1, 1]} : vector<12x18x4xf32> to vector<10x18x4xf32>
    %27 = vector.extract_strided_slice %26 {offsets = [0, 0, 0], sizes = [10, 16, 4], strides = [1, 1, 1]} : vector<10x18x4xf32> to vector<10x16x4xf32>
    %28 = vector.shape_cast %27 : vector<10x16x4xf32> to vector<160x4xf32>
    %c0_9 = arith.constant 0 : index
    %c24 = arith.constant 24 : index
    %29 = vector.load %arg10[%c0_9, %c24] : memref<160x36xf32, #tpu.memory_space<vmem>>, vector<160x4xf32>
    tpu.vector_store %arg10[%c0_9, %c24], %28 {strides = array<i32>} : memref<160x36xf32, #tpu.memory_space<vmem>>, vector<160x4xf32>,
    %30 = vector.extract_strided_slice %26 {offsets = [0, 1, 0], sizes = [10, 16, 4], strides = [1, 1, 1]} : vector<10x18x4xf32> to vector<10x16x4xf32>
    %31 = vector.shape_cast %30 : vector<10x16x4xf32> to vector<160x4xf32>
    %c0_10 = arith.constant 0 : index
    %c28 = arith.constant 28 : index
    %32 = vector.load %arg10[%c0_10, %c28] : memref<160x36xf32, #tpu.memory_space<vmem>>, vector<160x4xf32>
    tpu.vector_store %arg10[%c0_10, %c28], %31 {strides = array<i32>} : memref<160x36xf32, #tpu.memory_space<vmem>>, vector<160x4xf32>,
    %33 = vector.extract_strided_slice %26 {offsets = [0, 2, 0], sizes = [10, 16, 4], strides = [1, 1, 1]} : vector<10x18x4xf32> to vector<10x16x4xf32>
    %34 = vector.shape_cast %33 : vector<10x16x4xf32> to vector<160x4xf32>
    %c0_11 = arith.constant 0 : index
    %c32 = arith.constant 32 : index
    %35 = vector.load %arg10[%c0_11, %c32] : memref<160x36xf32, #tpu.memory_space<vmem>>, vector<160x4xf32>
    tpu.vector_store %arg10[%c0_11, %c32], %34 {strides = array<i32>} : memref<160x36xf32, #tpu.memory_space<vmem>>, vector<160x4xf32>,
    %c0_12 = arith.constant 0 : index
    %c0_13 = arith.constant 0 : index
    %36 = vector.load %arg10[%c0_12, %c0_13] : memref<160x36xf32, #tpu.memory_space<vmem>>, vector<160x36xf32>
    %37 = arith.truncf %36 : vector<160x36xf32> to vector<160x36xbf16>
    %c0_14 = arith.constant 0 : index
    %c0_15 = arith.constant 0 : index
    %38 = vector.load %arg3[%c0_14, %c0_15] : memref<36x128xbf16, #tpu.memory_space<vmem>>, vector<36x128xbf16>
    %cst = arith.constant dense<0.000000e+00> : vector<160x128xf32>
    %39 = tpu.matmul %37, %38, %cst {dimension_numbers = #tpu.dot_dimension_numbers<[1], [0], [0], [1], [0, 0, 1, 1], [], []>} : vector<160x36xbf16>, vector<36x128xbf16>, vector<160x128xf32> -> vector<160x128xf32>
    %c0_16 = arith.constant 0 : index
    %c0_17 = arith.constant 0 : index
    %40 = vector.load %arg5[%c0_16, %c0_17] : memref<1x128xf32, #tpu.memory_space<vmem>>, vector<1x128xf32>
    %41 = vector.broadcast %40 : vector<1x128xf32> to vector<160x128xf32>
    %42 = arith.mulf %39, %41 : vector<160x128xf32>
    %c0_18 = arith.constant 0 : index
    %c0_19 = arith.constant 0 : index
    %43 = vector.load %arg6[%c0_18, %c0_19] : memref<1x128xf32, #tpu.memory_space<vmem>>, vector<1x128xf32>
    %44 = vector.broadcast %43 : vector<1x128xf32> to vector<160x128xf32>
    %45 = arith.addf %42, %44 : vector<160x128xf32>
    %cst_20 = arith.constant 0.000000e+00 : f32
    %46 = vector.broadcast %cst_20 : f32 to vector<160x128xf32>
    %47 = arith.maximumf %45, %46 : vector<160x128xf32>
    %cst_21 = arith.constant 0.000000e+00 : f32
    %48 = vector.broadcast %cst_21 : f32 to vector<10x1x128xf32>
    %c0_22 = arith.constant 0 : index
    %c0_23 = arith.constant 0 : index
    %c0_24 = arith.constant 0 : index
    %49 = vector.load %arg11[%c0_22, %c0_23, %c0_24] : memref<10x18x128xf32, #tpu.memory_space<vmem>>, vector<10x1x128xf32>
    tpu.vector_store %arg11[%c0_22, %c0_23, %c0_24], %48 {strides = array<i32>} : memref<10x18x128xf32, #tpu.memory_space<vmem>>, vector<10x1x128xf32>,
    %cst_25 = arith.constant 0.000000e+00 : f32
    %50 = vector.broadcast %cst_25 : f32 to vector<10x1x128xf32>
    %c0_26 = arith.constant 0 : index
    %c17 = arith.constant 17 : index
    %c0_27 = arith.constant 0 : index
    %51 = vector.load %arg11[%c0_26, %c17, %c0_27] : memref<10x18x128xf32, #tpu.memory_space<vmem>>, vector<10x1x128xf32>
    tpu.vector_store %arg11[%c0_26, %c17, %c0_27], %50 {strides = array<i32>} : memref<10x18x128xf32, #tpu.memory_space<vmem>>, vector<10x1x128xf32>,
    %52 = vector.shape_cast %47 : vector<160x128xf32> to vector<10x16x128xf32>
    %c0_28 = arith.constant 0 : index
    %c1 = arith.constant 1 : index
    %c0_29 = arith.constant 0 : index
    %53 = vector.load %arg11[%c0_28, %c1, %c0_29] : memref<10x18x128xf32, #tpu.memory_space<vmem>>, vector<10x16x128xf32>
    tpu.vector_store %arg11[%c0_28, %c1, %c0_29], %52 {strides = array<i32>} : memref<10x18x128xf32, #tpu.memory_space<vmem>>, vector<10x16x128xf32>,
    %c0_i32 = arith.constant 0 : i32
    %54 = arith.cmpi eq, %arg1, %c0_i32 : i32
    %55 = arith.extui %54 : i1 to i32
    %c0_i32_30 = arith.constant 0 : i32
    %56 = arith.cmpi ne, %55, %c0_i32_30 : i32
    scf.if %56 {
      %cst_58 = arith.constant 0.000000e+00 : f32
      %94 = vector.broadcast %cst_58 : f32 to vector<1x18x128xf32>
      %c0_59 = arith.constant 0 : index
      %c0_60 = arith.constant 0 : index
      %c0_61 = arith.constant 0 : index
      %95 = vector.load %arg11[%c0_59, %c0_60, %c0_61] : memref<10x18x128xf32, #tpu.memory_space<vmem>>, vector<1x18x128xf32>
      tpu.vector_store %arg11[%c0_59, %c0_60, %c0_61], %94 {strides = array<i32>} : memref<10x18x128xf32, #tpu.memory_space<vmem>>, vector<1x18x128xf32>,
    } else {
    }
    %c1_i32 = arith.constant 1 : i32
    %57 = arith.cmpi eq, %arg1, %c1_i32 : i32
    %58 = arith.extui %57 : i1 to i32
    %c0_i32_31 = arith.constant 0 : i32
    %59 = arith.cmpi ne, %58, %c0_i32_31 : i32
    scf.if %59 {
      %cst_58 = arith.constant 0.000000e+00 : f32
      %94 = vector.broadcast %cst_58 : f32 to vector<1x18x128xf32>
      %c9 = arith.constant 9 : index
      %c0_59 = arith.constant 0 : index
      %c0_60 = arith.constant 0 : index
      %95 = vector.load %arg11[%c9, %c0_59, %c0_60] : memref<10x18x128xf32, #tpu.memory_space<vmem>>, vector<1x18x128xf32>
      tpu.vector_store %arg11[%c9, %c0_59, %c0_60], %94 {strides = array<i32>} : memref<10x18x128xf32, #tpu.memory_space<vmem>>, vector<1x18x128xf32>,
    } else {
    }
    %c0_32 = arith.constant 0 : index
    %c0_33 = arith.constant 0 : index
    %c0_34 = arith.constant 0 : index
    %60 = vector.load %arg11[%c0_32, %c0_33, %c0_34] : memref<10x18x128xf32, #tpu.memory_space<vmem>>, vector<8x18x128xf32>
    %61 = vector.shape_cast %60 : vector<8x18x128xf32> to vector<144x128xf32>
    %62 = arith.truncf %61 : vector<144x128xf32> to vector<144x128xbf16>
    %c0_35 = arith.constant 0 : index
    %c0_36 = arith.constant 0 : index
    %63 = vector.load %arg12[%c0_35, %c0_36] : memref<144x384xbf16, #tpu.memory_space<vmem>>, vector<144x128xbf16>
    tpu.vector_store %arg12[%c0_35, %c0_36], %62 {strides = array<i32>} : memref<144x384xbf16, #tpu.memory_space<vmem>>, vector<144x128xbf16>,
    %c1_37 = arith.constant 1 : index
    %c0_38 = arith.constant 0 : index
    %c0_39 = arith.constant 0 : index
    %64 = vector.load %arg11[%c1_37, %c0_38, %c0_39] : memref<10x18x128xf32, #tpu.memory_space<vmem>>, vector<8x18x128xf32>
    %65 = vector.shape_cast %64 : vector<8x18x128xf32> to vector<144x128xf32>
    %66 = arith.truncf %65 : vector<144x128xf32> to vector<144x128xbf16>
    %c0_40 = arith.constant 0 : index
    %c128 = arith.constant 128 : index
    %67 = vector.load %arg12[%c0_40, %c128] : memref<144x384xbf16, #tpu.memory_space<vmem>>, vector<144x128xbf16>
    tpu.vector_store %arg12[%c0_40, %c128], %66 {strides = array<i32>} : memref<144x384xbf16, #tpu.memory_space<vmem>>, vector<144x128xbf16>,
    %c2 = arith.constant 2 : index
    %c0_41 = arith.constant 0 : index
    %c0_42 = arith.constant 0 : index
    %68 = vector.load %arg11[%c2, %c0_41, %c0_42] : memref<10x18x128xf32, #tpu.memory_space<vmem>>, vector<8x18x128xf32>
    %69 = vector.shape_cast %68 : vector<8x18x128xf32> to vector<144x128xf32>
    %70 = arith.truncf %69 : vector<144x128xf32> to vector<144x128xbf16>
    %c0_43 = arith.constant 0 : index
    %c256 = arith.constant 256 : index
    %71 = vector.load %arg12[%c0_43, %c256] : memref<144x384xbf16, #tpu.memory_space<vmem>>, vector<144x128xbf16>
    tpu.vector_store %arg12[%c0_43, %c256], %70 {strides = array<i32>} : memref<144x384xbf16, #tpu.memory_space<vmem>>, vector<144x128xbf16>,
    %c0_44 = arith.constant 0 : index
    %c0_45 = arith.constant 0 : index
    %72 = vector.load %arg12[%c0_44, %c0_45] : memref<144x384xbf16, #tpu.memory_space<vmem>>, vector<144x384xbf16>
    %c0_46 = arith.constant 0 : index
    %c0_47 = arith.constant 0 : index
    %73 = vector.load %arg4[%c0_46, %c0_47] : memref<384x384xbf16, #tpu.memory_space<vmem>>, vector<384x384xbf16>
    %cst_48 = arith.constant dense<0.000000e+00> : vector<144x384xf32>
    %74 = tpu.matmul %72, %73, %cst_48 {dimension_numbers = #tpu.dot_dimension_numbers<[1], [0], [0], [1], [0, 0, 1, 1], [], []>} : vector<144x384xbf16>, vector<384x384xbf16>, vector<144x384xf32> -> vector<144x384xf32>
    %75 = vector.shape_cast %74 : vector<144x384xf32> to vector<8x18x384xf32>
    %76 = vector.extract_strided_slice %75 {offsets = [0, 0, 0], sizes = [8, 16, 128], strides = [1, 1, 1]} : vector<8x18x384xf32> to vector<8x16x128xf32>
    %77 = vector.extract_strided_slice %75 {offsets = [0, 1, 128], sizes = [8, 16, 128], strides = [1, 1, 1]} : vector<8x18x384xf32> to vector<8x16x128xf32>
    %78 = arith.addf %76, %77 : vector<8x16x128xf32>
    %79 = vector.extract_strided_slice %75 {offsets = [0, 2, 256], sizes = [8, 16, 128], strides = [1, 1, 1]} : vector<8x18x384xf32> to vector<8x16x128xf32>
    %80 = arith.addf %78, %79 : vector<8x16x128xf32>
    %c0_49 = arith.constant 0 : index
    %c0_50 = arith.constant 0 : index
    %81 = vector.load %arg7[%c0_49, %c0_50] : memref<1x128xf32, #tpu.memory_space<vmem>>, vector<1x128xf32>
    %82 = vector.shape_cast %81 : vector<1x128xf32> to vector<1x1x128xf32>
    %83 = vector.broadcast %82 : vector<1x1x128xf32> to vector<8x16x128xf32>
    %84 = arith.mulf %80, %83 : vector<8x16x128xf32>
    %c0_51 = arith.constant 0 : index
    %c0_52 = arith.constant 0 : index
    %85 = vector.load %arg8[%c0_51, %c0_52] : memref<1x128xf32, #tpu.memory_space<vmem>>, vector<1x128xf32>
    %86 = vector.shape_cast %85 : vector<1x128xf32> to vector<1x1x128xf32>
    %87 = vector.broadcast %86 : vector<1x1x128xf32> to vector<8x16x128xf32>
    %88 = arith.addf %84, %87 : vector<8x16x128xf32>
    %cst_53 = arith.constant 0.000000e+00 : f32
    %89 = vector.broadcast %cst_53 : f32 to vector<8x16x128xf32>
    %90 = arith.maximumf %88, %89 : vector<8x16x128xf32>
    %91 = vector.extract_strided_slice %90 {offsets = [0, 0, 0], sizes = [8, 16, 8], strides = [1, 1, 1]} : vector<8x16x128xf32> to vector<8x16x8xf32>
    %92 = vector.shape_cast %91 : vector<8x16x8xf32> to vector<1x8x16x8xf32>
    %c0_54 = arith.constant 0 : index
    %c0_55 = arith.constant 0 : index
    %c0_56 = arith.constant 0 : index
    %c0_57 = arith.constant 0 : index
    %93 = vector.load %arg9[%c0_54, %c0_55, %c0_56, %c0_57] : memref<1x8x16x8xf32, #tpu.memory_space<vmem>>, vector<1x8x16x8xf32>
    tpu.vector_store %arg9[%c0_54, %c0_55, %c0_56, %c0_57], %92 {strides = array<i32>} : memref<1x8x16x8xf32, #tpu.memory_space<vmem>>, vector<1x8x16x8xf32>,
    return
  }
  func.func @transform_0(%arg0: i32, %arg1: i32) -> (i32, i32, i32, i32) {
    %c0_i32 = arith.constant 0 : i32
    %c0_i32_0 = arith.constant 0 : i32
    %c0_i32_1 = arith.constant 0 : i32
    %c0_i32_2 = arith.constant 0 : i32
    return %arg0, %c0_i32, %c0_i32_0, %c0_i32_1 : i32, i32, i32, i32
  }
  func.func @transform_1(%arg0: i32, %arg1: i32) -> (i32, i32) {
    %c0_i32 = arith.constant 0 : i32
    %c0_i32_0 = arith.constant 0 : i32
    %c0_i32_1 = arith.constant 0 : i32
    return %c0_i32, %c0_i32_0 : i32, i32
  }
  func.func @transform_2(%arg0: i32, %arg1: i32) -> (i32, i32) {
    %c0_i32 = arith.constant 0 : i32
    %c0_i32_0 = arith.constant 0 : i32
    %c0_i32_1 = arith.constant 0 : i32
    return %c0_i32, %c0_i32_0 : i32, i32
  }
  func.func @transform_3(%arg0: i32, %arg1: i32) -> (i32, i32) {
    %c0_i32 = arith.constant 0 : i32
    %c0_i32_0 = arith.constant 0 : i32
    %c0_i32_1 = arith.constant 0 : i32
    return %c0_i32, %c0_i32_0 : i32, i32
  }
  func.func @transform_4(%arg0: i32, %arg1: i32) -> (i32, i32) {
    %c0_i32 = arith.constant 0 : i32
    %c0_i32_0 = arith.constant 0 : i32
    %c0_i32_1 = arith.constant 0 : i32
    return %c0_i32, %c0_i32_0 : i32, i32
  }
  func.func @transform_5(%arg0: i32, %arg1: i32) -> (i32, i32) {
    %c0_i32 = arith.constant 0 : i32
    %c0_i32_0 = arith.constant 0 : i32
    %c0_i32_1 = arith.constant 0 : i32
    return %c0_i32, %c0_i32_0 : i32, i32
  }
  func.func @transform_6(%arg0: i32, %arg1: i32) -> (i32, i32) {
    %c0_i32 = arith.constant 0 : i32
    %c0_i32_0 = arith.constant 0 : i32
    %c0_i32_1 = arith.constant 0 : i32
    return %c0_i32, %c0_i32_0 : i32, i32
  }
  func.func @transform_7(%arg0: i32, %arg1: i32) -> (i32, i32, i32, i32) {
    %c0_i32 = arith.constant 0 : i32
    %c0_i32_0 = arith.constant 0 : i32
    %c0_i32_1 = arith.constant 0 : i32
    return %arg0, %arg1, %c0_i32, %c0_i32_0 : i32, i32, i32, i32
  }
}

</mosaic_0001>

<bundles_post_ra>
// kernel: tpu_custom_call.1
= control target key start
LH: loop header
LB: loop body
LE: loop exit
PB: predicated region body
PF: predicated region fallthrough
CT: control target
= control target key end

     0   :  { %12 = vsyncpa [#allocation6], 0  ;;  %s6010_s24 = smov 0   ;;  %s6012_s25 = smov 0   ;;  %s8484_s0 = inlined_call_operand.vmem [shape: bf16[2,20,18,4], index: 0, kind: input, shape index: {}]   ;;  %s8485_s1 = inlined_call_operand.vmem [shape: bf16[36,128], index: 1, kind: input, shape index: {}]   ;;  %s8486_s2 = inlined_call_operand.hbm [shape: bf16[384,384], index: 2, kind: input, shape index: {}]   ;;  %s8487_s3 = inlined_call_operand.vmem [shape: f32[1,128], index: 3, kind: input, shape index: {}]   ;;  %s8488_s4 = inlined_call_operand.vmem [shape: f32[1,128], index: 4, kind: input, shape index: {}]   ;;  %s8489_s5 = inlined_call_operand.vmem [shape: f32[1,128], index: 5, kind: input, shape index: {}]   ;;  %s8490_s6 = inlined_call_operand.vmem [shape: f32[1,128], index: 6, kind: input, shape index: {}]   ;;  %s8491_s7 = inlined_call_operand.vmem [shape: f32[2,16,16,8], index: 7, kind: output, shape index: {}]  }
   0x1   :  { %s6014_s26 = smov 0   ;;  %s6016_s27 = smov 0  }
   0x2   :  { %s6018_s28 = smov 0  }
   0x3 LB: > { %s4828_s29 = sadd.s32 4294967295, %s5954_s28   ;;  %s27_s30 = sadd.s32 1, %s5946_s26  ;;  %s5954_s28 = sphi %s6018_s28, %s18_s28   ;;  %s5950_s27 = sphi %s6016_s27, %s8604_s27   ;;  %s5946_s26 = sphi %s6014_s26, %s8603_s26   ;;  %s5942_s25 = sphi %s6012_s25, %s8602_s25   ;;  %s5938_s24 = sphi %s6010_s24, %s8601_s24  }
   0x4   : > { %p28_p0 = scmp.ge.s32.totalorder %s27_s30, 2  ;;  %s30_s8 = sadd.s32 1, %s5950_s27 }
   0x5   : > { %p4830_p1 = scmp.ge.s32.totalorder %s5954_s28, 1  ;;  %p215_p2 = scmp.lt.s32.totalorder %s5954_s28, 5 }
   0x6   : > { %s8606_s30 = smov (%p28_p0, %s27_s30), 0  ;;  %s8608_s8 = smov (!%p28_p0, %s30_s8), %s5950_s27 }
   0x7   : > { %p6043_p3 = pnand %p4830_p1, %p215_p2  ;;  %p32_p4 = scmp.ge.s32.totalorder %s8608_s8, 2 }
   0x8   : > { %p6047_p5 = scmp.eq.s32.totalorder %s4828_s29, 0  ;;  %s229_s13 = sshll.u32 %s8486_s2, 4  ;;  %s230_s13 = int_to_ptr.hbm [resolvable:$true] %s229_s13 }
   0x9   : > { %p5416_p6 = pneg %p6043_p3  ;;  %s8610_s8 = smov (%p32_p4, %s8608_s8), 0 }
   0xa   : > { %s5956_s14 = smov [#allocation5]   ;;  %s5957_s16 = smov 192  }
   0xb   : > { %s231_s15 = sshll.u32 %s5956_s14, 4  ;;  %p5417_p7 = pnand %p6047_p5, %p5416_p6  ;;  %s232_s15 = int_to_ptr.vmem [resolvable:$true] %s231_s15 }
   0xc   : > { %s5958_s17 = smov 12   ;;  %267 = sbr.rel (%p6043_p3) target bundleno = 1284 (0x504), region = 48 }
   0xd   : > { %5419 = dma.hbm_to_vmem [thread:$0]  (!%p5417_p7), %s230_s13, 9216, %s232_s15, [#allocation6], %s5957_s16, %s5957_s16, %s5958_s17  }
  0x11   : > { %5933 = dma.done.wait (%p6047_p5), [#allocation6], 9216  }
  0x12   : > { %5935 = vsyncadd (%p6047_p5), [#allocation6], 4294958080  ;;  %p305_p8 = scmp.lt.s32.totalorder %s5942_s25, 1  ;;  %s4836_s18 = sshll.u32 %s5938_s24, 3  ;;  %v5959_v0 = vmov 0.0   ;;  %vm449_vm0 = vcmask 1046528  }
  0x13   : > { %1437 = vst [vmem:[#allocation3] sm:$0x1] %v5959_v0  ;;  %p313_p9 = scmp.lt.s32.totalorder %s4836_s18, 15  ;;  %s5269_s19 = smul.u32 96, %s5938_s24  ;;  %vm581_vm1 = vcmask 1045504   ;;  %vm398_vm2 = vcmask 31744  }
  0x14   : > { %1438 = vst [vmem:[#allocation3 + $0x18] sm:$0x1] %v5959_v0  ;;  %s8612_s25 = smov (!%p305_p8, %s5942_s25), 1  ;;  %s5960_s15 = smov 4   ;;  %vm560_vm3 = vcmask 64544   ;;  %vm692_vm4 = vcmask 97344  }
  0x15   : > { %1439 = vst [vmem:[#allocation3 + $0x30] sm:$0x1] %v5959_v0  ;;  %s8614_s18 = smov (!%p313_p9, %s4836_s18), 15  ;;  %s5411_s20 = smul.u32 240, %s8612_s25  ;;  %vm775_vm5 = vcmask 130144   ;;  %vm1306_vm6 = vcmask 1041408  }
  0x16   : > { %1440 = vst [vmem:[#allocation3 + $0x48] sm:$0x1] %v5959_v0  ;;  %s4838_s21 = sshll.u32 %s8612_s25, 5  ;;  %s4837_s22 = sshll.u32 %s8614_s18, 1  ;;  %vm862_vm7 = vcmask 162944   ;;  %vm948_vm8 = vcmask 195744  }
  0x17   : > { %1441 = vst [vmem:[#allocation3 + $0x60] sm:$0x1] %v5959_v0  ;;  %s309_s9 = scalar_lea.vmem %s8484_s0, %s5411_s20  ;;  %s317_s10 = sadd.s32 %s4838_s21, %s4837_s22  ;;  %vm1031_vm9 = vcmask 228544   ;;  %vm1118_vm10 = vcmask 261344   ;;  %vm1204_vm11 = vcmask 294144   ;;  %vm1275_vm12 = vcmask 293888  }
  0x18   : > { %1442 = vst [vmem:[#allocation3 + $0x78] sm:$0x1] %v5959_v0  ;;  %s4839_s11 = sshll.u32 %s317_s10, 3  ;;  %s6080_s12 = scalar_lea.vmem %s309_s9, %s5269_s19 }
  0x19   : > { %1443 = vst [vmem:[#allocation3 + $0x90] sm:$0x1] %v5959_v0  ;;  %s6086_s14 = scalar_lea.vmem %s8491_s7, %s4839_s11  ;;  %v5372_v1 = vld [vmem:[%s6080_s12] sm:$0xff]   ;;  %v6090_v2 = vld [vmem:[%s6080_s12 + $0x8] sm:$0x1]  ;;  %v5395_v3 = vld [vmem:[%s6080_s12 + $0x18] sm:$0xff]  }
  0x1a   : > { %1444 = vst [vmem:[#allocation3 + $0xa8] sm:$0x1] %v5959_v0  ;;  %v6094_v4 = vunpack.c.l.bf16 %v5372_v1  ;;  %v6096_v5 = vunpack.c.h.bf16 %v5372_v1  ;;  %v364_v6 = vunpack.c.l.bf16 %v6090_v2  ;;  %v6099_v7 = vunpack.c.l.bf16 %v5395_v3  ;;  %v6102_v8 = vld [vmem:[%s6080_s12 + $0x20] sm:$0x1]  ;;  %v329_v9 = vld [vmem:[%s6080_s12 + $0xc] sm:$0xff]   ;;  %v335_v10 = vld [vmem:[%s6080_s12 + $0x24] sm:$0xff]  }
  0x1b   : > { %1445 = vst [vmem:[#allocation3 + $0xc0] sm:$0x1] %v5959_v0  ;;  %v6107_v11 = vunpack.c.h.bf16 %v5395_v3  ;;  %v370_v12 = vunpack.c.l.bf16 %v6102_v8  ;;  %v6111_v13 = vld [vmem:[%s6080_s12 + $0x14] sm:$0x1]  ;;  %v6113_v14 = vunpack.c.l.bf16 %v329_v9  ;;  %v6115_v15 = vunpack.c.h.bf16 %v329_v9  ;;  %v6118_v16 = vld [vmem:[%s6080_s12 + $0x2c] sm:$0x1] }
  0x1c   : > { %1446 = vst [vmem:[#allocation3 + $0xd8] sm:$0x1] %v5959_v0  ;;  %v450_v17 = vrot.slane %v6094_v4, 1  ;;  %v451_v18 = vrot.slane %v6096_v5, 1  ;;  %v453_v19 = vrot.slane %v364_v6, 1  ;;  %v460_v20 = vrot.slane %v6099_v7, 1 }
  0x1d   : > { %1447 = vst [vmem:[#allocation3 + $0x11] sm:$0x1] %v5959_v0  ;;  %v461_v21 = vrot.slane %v6107_v11, 1  ;;  %v463_v22 = vrot.slane %v370_v12, 1  ;;  %v367_v23 = vunpack.c.l.bf16 %v6111_v13  ;;  %v455_v24 = vrot.slane %v6113_v14, 1  ;;  %v5397_v29 = vld [vmem:[%s6080_s12 + $0x48] sm:$0xff]  }
  0x1e   : > { %1448 = vst [vmem:[#allocation3 + $0x29] sm:$0x1] %v5959_v0  ;;  %v452_v25 = vsel %vm449_vm0, %v450_v17, %v451_v18  ;;  %v454_v26 = vsel %vm449_vm0, %v451_v18, %v453_v19  ;;  %v456_v27 = vrot.slane %v6115_v15, 1  ;;  %v6136_v28 = vunpack.c.l.bf16 %v335_v10  ;;  %v6145_v34 = vld [vmem:[%s6080_s12 + $0x50] sm:$0x1]  ;;  %v347_v38 = vld [vmem:[%s6080_s12 + $0x54] sm:$0xff]  }
  0x1f   : > { %1449 = vst [vmem:[#allocation3 + $0x41] sm:$0x1] %v5959_v0  ;;  %v5476_v30 = vpack.i.bf16 %v454_v26, %v452_v25  ;;  %v462_v31 = vsel %vm449_vm0, %v460_v20, %v461_v21  ;;  %v464_v32 = vsel %vm449_vm0, %v461_v21, %v463_v22  ;;  %v458_v33 = vrot.slane %v367_v23, 1  ;;  %v6163_v43 = vld [vmem:[%s6080_s12 + $0x5c] sm:$0x1]  ;;  %v353_v53 = vld [vmem:[%s6080_s12 + $0x6c] sm:$0xff]  }
  0x20   : > { %1450 = vst [vmem:[#allocation3 + $0x59] sm:$0x1] %v5959_v0  ;;  %v6148_v35 = vpack.i.bf16 %v464_v32, %v462_v31  ;;  %v6150_v36 = vunpack.c.h.bf16 %v335_v10  ;;  %v373_v37 = vunpack.c.l.bf16 %v6118_v16  ;;  %v457_v39 = vsel %vm449_vm0, %v455_v24, %v456_v27  ;;  %v6184_v54 = vld [vmem:[%s6080_s12 + $0x74] sm:$0x1]  ;;  %v6203_v1 = vld [vmem:[%s6080_s12 + $0x38] sm:$0x1] }
  0x21   : > { %1451 = vst [vmem:[#allocation3 + $0x71] sm:$0x1] %v5959_v0  ;;  %5477 = vrot.lane.b32.xlu0 %v5476_v30, %s5960_s15  ;;  %v465_v40 = vrot.slane %v6136_v28, 1  ;;  %v6158_v41 = vunpack.c.l.bf16 %v5397_v29  ;;  %v6160_v42 = vunpack.c.h.bf16 %v5397_v29  ;;  %v459_v44 = vsel %vm449_vm0, %v456_v27, %v458_v33  ;;  %v5396_v63 = vld [vmem:[%s6080_s12 + $0x30] sm:$0xff]   ;;  %v341_v26 = vld [vmem:[%s6080_s12 + $0x3c] sm:$0xff]   ;;  %s5961_s16 = smov 8  }
  0x22   : > { %1452 = vst [vmem:[#allocation3 + $0x89] sm:$0x1] %v5959_v0  ;;  %5487 = vrot.lane.b32.xlu1 %v6148_v35, %s5960_s15  ;;  %v466_v45 = vrot.slane %v6150_v36, 1  ;;  %v468_v46 = vrot.slane %v373_v37, 1  ;;  %v382_v47 = vunpack.c.l.bf16 %v6145_v34  ;;  %v6174_v48 = vunpack.c.l.bf16 %v347_v38  ;;  %s5962_s17 = smov 12   ;;  %s5963_s18 = smov 16  }
  0x23   : > { %1453 = vst [vmem:[#allocation3 + $0xa1] sm:$0x1] %v5959_v0  ;;  %v6176_v49 = vunpack.c.h.bf16 %v347_v38  ;;  %v385_v52 = vunpack.c.l.bf16 %v6163_v43  ;;  %v6187_v55 = vpack.i.bf16 %v459_v44, %v457_v39  ;;  %v480_v56 = vrot.slane %v6158_v41, 1  ;;  %s5964_s19 = smov 24   ;;  %s5965_s20 = smov 28  }
  0x24   : > { %1454 = vst [vmem:[#allocation3 + $0xb9] sm:$0x1] %v5959_v0  ;;  %v467_v50 = vsel %vm449_vm0, %v465_v40, %v466_v45  ;;  %v469_v51 = vsel %vm449_vm0, %v466_v45, %v468_v46  ;;  %v481_v57 = vrot.slane %v6160_v42, 1  ;;  %v483_v58 = vrot.slane %v382_v47, 1  ;;  %v343_v40 = vld [vmem:[%s6080_s12 + $0x44] sm:$0x1] }
  0x25   : > { %1455 = vst [vmem:[#allocation3 + $0xd1] sm:$0x1] %v5959_v0  ;;  %v6193_v59 = vpack.i.bf16 %v469_v51, %v467_v50  ;;  %v485_v60 = vrot.slane %v6174_v48, 1  ;;  %v486_v61 = vrot.slane %v6176_v49, 1  ;;  %v488_v62 = vrot.slane %v385_v52, 1  ;;  %s5966_s21 = smov 20  }
  0x26   : > { %1456 = vst [vmem:[#allocation3 + $0xe9] sm:$0x1] %v5959_v0  ;;  %v6200_v0 = vunpack.c.l.bf16 %v353_v53  ;;  %v6205_v3 = vunpack.c.h.bf16 %v353_v53  ;;  %v391_v9 = vunpack.c.l.bf16 %v6184_v54  ;;  %v482_v10 = vsel %vm449_vm0, %v480_v56, %v481_v57  ;;  %s5967_s22 = smov 32   ;;  %p4861_p10 = scmp.ne.s32.totalorder %s5938_s24, 0 }
  0x27   : > { %v484_v17 = vsel %vm449_vm0, %v481_v57, %v483_v58  ;;  %v6212_v18 = vunpack.c.l.bf16 %v5396_v63  ;;  %v487_v19 = vsel %vm449_vm0, %v485_v60, %v486_v61  ;;  %v489_v20 = vsel %vm449_vm0, %v486_v61, %v488_v62  ;;  %v5398_v60 = vld [vmem:[%s6080_s12 + $0x60] sm:$0xff]   ;;  %400 = vst.msk [vmem:[#allocation2 + $0x8] sm:$0xff] %vm398_vm2, %v6096_v5 }
  0x28   : > { %v6218_v21 = vunpack.c.h.bf16 %v5396_v63  ;;  %v376_v22 = vunpack.c.l.bf16 %v6203_v1  ;;  %v495_v24 = vrot.slane %v6200_v0, 1  ;;  %v496_v27 = vrot.slane %v6205_v3, 1  ;;  %399 = vst.msk [vmem:[#allocation2] sm:$0xff] %vm398_vm2, %v6094_v4 }
  0x29   : > { %5482 = vrot.lane.b32.xlu0 %v6187_v55, %s5960_s15  ;;  %v470_v25 = vrot.slane %v6212_v18, 1  ;;  %v498_v29 = vrot.slane %v391_v9, 1  ;;  %v6230_v32 = vpack.i.bf16 %v484_v17, %v482_v10  ;;  %v6232_v33 = vpack.i.bf16 %v489_v20, %v487_v19  ;;  %401 = vst.msk [vmem:[#allocation2 + $0x10] sm:$0xff] %vm398_vm2, %v6113_v14 }
  0x2a   : > { %5492 = vrot.lane.b32.xlu1 %v6193_v59, %s5960_s15  ;;  %v471_v30 = vrot.slane %v6218_v21, 1  ;;  %v473_v31 = vrot.slane %v376_v22, 1  ;;  %v582_v38 = vrot.slane %v6094_v4, 2  ;;  %v583_v39 = vrot.slane %v6096_v5, 2  ;;  %402 = vst.msk [vmem:[#allocation2 + $0x18] sm:$0xff] %vm398_vm2, %v6115_v15 }
  0x2b   : > { %v585_v44 = vrot.slane %v364_v6, 2  ;;  %v6241_v50 = vunpack.c.l.bf16 %v341_v26  ;;  %v497_v53 = vsel %vm449_vm0, %v495_v24, %v496_v27  ;;  %v499_v56 = vsel %vm449_vm0, %v496_v27, %v498_v29  ;;  %v352_v24 = vld [vmem:[%s6080_s12 + $0x68] sm:$0x1]  ;;  %403 = vst.msk [vmem:[#allocation2 + $0x20] sm:$0xff] %vm398_vm2, %v6099_v7 }
  0x2c   : > { %v472_v45 = vsel %vm449_vm0, %v470_v25, %v471_v30  ;;  %v474_v46 = vsel %vm449_vm0, %v471_v30, %v473_v31  ;;  %v6247_v57 = vunpack.c.h.bf16 %v341_v26  ;;  %v379_v58 = vunpack.c.l.bf16 %v343_v40  ;;  %404 = vst.msk [vmem:[#allocation2 + $0x28] sm:$0xff] %vm398_vm2, %v6107_v11 }
  0x2d   : > { %v6243_v51 = vpack.i.bf16 %v474_v46, %v472_v45  ;;  %v475_v2 = vrot.slane %v6241_v50, 1  ;;  %v584_v6 = vsel %vm581_vm1, %v582_v38, %v583_v39  ;;  %v586_v61 = vsel %vm581_vm1, %v583_v39, %v585_v44  ;;  %405 = vst.msk [vmem:[#allocation2 + $0x30] sm:$0xff] %vm398_vm2, %v6136_v28 }
  0x2e   : > { %v476_v62 = vrot.slane %v6247_v57, 1  ;;  %v478_v63 = vrot.slane %v379_v58, 1  ;;  %v6260_v10 = vpack.i.bf16 %v499_v56, %v497_v53  ;;  %v592_v17 = vrot.slane %v6099_v7, 2  ;;  %406 = vst.msk [vmem:[#allocation2 + $0x38] sm:$0xff] %vm398_vm2, %v6150_v36 }
  0x2f   : > { %5497 = vrot.lane.b32.xlu2 %v6243_v51, %s5960_s15  ;;  %v6263_v19 = vunpack.c.l.bf16 %v5398_v60  ;;  %v6265_v20 = vunpack.c.h.bf16 %v5398_v60  ;;  %v593_v25 = vrot.slane %v6107_v11, 2  ;;  %v595_v26 = vrot.slane %v370_v12, 2  ;;  %407 = vst.msk [vmem:[#allocation2 + $0x40] sm:$0xff] %vm398_vm2, %v6212_v18 }
  0x30   : > { %v477_v27 = vsel %vm449_vm0, %v475_v2, %v476_v62  ;;  %v479_v29 = vsel %vm449_vm0, %v476_v62, %v478_v63  ;;  %v597_v30 = vrot.slane %v6136_v28, 2  ;;  %v598_v31 = vrot.slane %v6150_v36, 2  ;;  %408 = vst.msk [vmem:[#allocation2 + $0x48] sm:$0xff] %vm398_vm2, %v6218_v21 }
  0x31   : > { %5507 = vrot.lane.b32.xlu0 %v6230_v32, %s5960_s15  ;;  %v600_v38 = vrot.slane %v373_v37, 2  ;;  %v6277_v39 = vpack.i.bf16 %v479_v29, %v477_v27  ;;  %v5526_v40 = vpack.i.bf16 %v586_v61, %v584_v6  ;;  %v388_v44 = vunpack.c.l.bf16 %v352_v24  ;;  %409 = vst.msk [vmem:[#allocation2 + $0x50] sm:$0xff] %vm398_vm2, %v6241_v50 }
  0x32   : > { %5512 = vrot.lane.b32.xlu1 %v6232_v33, %s5960_s15  ;;  %v490_v45 = vrot.slane %v6263_v19, 1  ;;  %v491_v8 = vrot.slane %v6265_v20, 1  ;;  %v594_v12 = vsel %vm581_vm1, %v592_v17, %v593_v25  ;;  %v596_v53 = vsel %vm581_vm1, %v593_v25, %v595_v26  ;;  %410 = vst.msk [vmem:[#allocation2 + $0x58] sm:$0xff] %vm398_vm2, %v6247_v57 }
  0x33   : > { %v493_v46 = vrot.slane %v388_v44, 1  ;;  %v599_v56 = vsel %vm581_vm1, %v597_v30, %v598_v31  ;;  %v601_v16 = vsel %vm581_vm1, %v598_v31, %v600_v38  ;;  %v6292_v2 = vpack.i.bf16 %v596_v53, %v594_v12  ;;  %411 = vst.msk [vmem:[#allocation2 + $0x60] sm:$0xff] %vm398_vm2, %v6158_v41 }
  0x34   : > { %v492_v37 = vsel %vm449_vm0, %v490_v45, %v491_v8  ;;  %v6294_v6 = vpack.i.bf16 %v601_v16, %v599_v56  ;;  %v607_v61 = vrot.slane %v6241_v50, 2  ;;  %v612_v62 = vrot.slane %v6158_v41, 2  ;;  %412 = vst.msk [vmem:[#allocation2 + $0x68] sm:$0xff] %vm398_vm2, %v6160_v42 }
  0x35   : > { %v494_v60 = vsel %vm449_vm0, %v491_v8, %v493_v46  ;;  %v608_v63 = vrot.slane %v6247_v57, 2  ;;  %v610_v17 = vrot.slane %v379_v58, 2  ;;  %v613_v24 = vrot.slane %v6160_v42, 2  ;;  %413 = vst.msk [vmem:[#allocation2 + $0x70] sm:$0xff] %vm398_vm2, %v6174_v48 }
  0x36   : > { %v6300_v25 = vpack.i.bf16 %v494_v60, %v492_v37  ;;  %v615_v26 = vrot.slane %v382_v47, 2  ;;  %v587_v27 = vrot.slane %v6113_v14, 2  ;;  %v588_v29 = vrot.slane %v6115_v15, 2  ;;  %414 = vst.msk [vmem:[#allocation2 + $0x78] sm:$0xff] %vm398_vm2, %v6176_v49 }
  0x37   : > { %5502 = vrot.lane.b32.xlu2 %v6277_v39, %s5960_s15  ;;  %v590_v30 = vrot.slane %v367_v23, 2  ;;  %v609_v31 = vsel %vm581_vm1, %v607_v61, %v608_v63  ;;  %v611_v58 = vsel %vm581_vm1, %v608_v63, %v610_v17  ;;  %v614_v34 = vsel %vm581_vm1, %v612_v62, %v613_v24  ;;  %415 = vst.msk [vmem:[#allocation2 + $0x80] sm:$0xff] %vm398_vm2, %v6263_v19 }
  0x38   : > { %v616_v47 = vsel %vm581_vm1, %v613_v24, %v615_v26  ;;  %v589_v13 = vsel %vm581_vm1, %v587_v27, %v588_v29  ;;  %v6320_v38 = vpack.i.bf16 %v611_v58, %v609_v31  ;;  %v622_v45 = vrot.slane %v6263_v19, 2  ;;  %416 = vst.msk [vmem:[#allocation2 + $0x88] sm:$0xff] %vm398_vm2, %v6265_v20 }
  0x39   : > { %5522 = vrot.lane.b32.xlu0 %v6260_v10, %s5960_s15  ;;  %v591_v23 = vsel %vm581_vm1, %v588_v29, %v590_v30  ;;  %v623_v8 = vrot.slane %v6265_v20, 2  ;;  %v625_v46 = vrot.slane %v388_v44, 2  ;;  %v602_v53 = vrot.slane %v6212_v18, 2  ;;  %417 = vst.msk [vmem:[#allocation2 + $0x90] sm:$0xff] %vm398_vm2, %v6200_v0 }
  0x3a   : > { %5527 = vrot.lane.b32.xlu1 %v5526_v40, %s5961_s16  ;;  %v6322_v40 = vpack.i.bf16 %v616_v47, %v614_v34  ;;  %v6326_v12 = vpack.i.bf16 %v591_v23, %v589_v13  ;;  %v603_v56 = vrot.slane %v6218_v21, 2  ;;  %v605_v16 = vrot.slane %v376_v22, 2  ;;  %418 = vst.msk [vmem:[#allocation2 + $0x98] sm:$0xff] %vm398_vm2, %v6205_v3 }
  0x3b   : > { %v627_v37 = vrot.slane %v6200_v0, 2  ;;  %v628_v60 = vrot.slane %v6205_v3, 2  ;;  %v630_v61 = vrot.slane %v391_v9, 2  ;;  %v624_v62 = vsel %vm581_vm1, %v622_v45, %v623_v8 }
  0x3c   : > { %v626_v1 = vsel %vm581_vm1, %v623_v8, %v625_v46  ;;  %v604_v22 = vsel %vm581_vm1, %v602_v53, %v603_v56  ;;  %v606_v44 = vsel %vm581_vm1, %v603_v56, %v605_v16  ;;  %v617_v26 = vrot.slane %v6174_v48, 2  ;;  %v5399_v53 = vld [vmem:[%s6080_s12 + $0x78] sm:$0xff]  }
  0x3d   : > { %v629_v54 = vsel %vm581_vm1, %v627_v37, %v628_v60  ;;  %v631_v9 = vsel %vm581_vm1, %v628_v60, %v630_v61  ;;  %v6348_v63 = vpack.i.bf16 %v626_v1, %v624_v62  ;;  %v6350_v17 = vpack.i.bf16 %v606_v44, %v604_v22 }
  0x3e   : > { %v6352_v24 = vpack.i.bf16 %v631_v9, %v629_v54  ;;  %v618_v27 = vrot.slane %v6176_v49, 2  ;;  %v620_v29 = vrot.slane %v385_v52, 2  ;;  %v5581_v58 = vpack.i.bf16 %v6107_v11, %v6099_v7 }
  0x3f   : > { %5517 = vrot.lane.b32.xlu2 %v6300_v25, %s5960_s15  ;;  %v5586_v43 = vpack.i.bf16 %v6150_v36, %v6136_v28  ;;  %v6378_v52 = vpack.i.bf16 %v6247_v57, %v6241_v50  ;;  %v5576_v47 = vpack.i.bf16 %v6115_v15, %v6113_v14  ;;  %v6384_v13 = vpack.i.bf16 %v6160_v42, %v6158_v41 }
  0x40   : > { %v619_v30 = vsel %vm581_vm1, %v617_v26, %v618_v27  ;;  %v621_v31 = vsel %vm581_vm1, %v618_v27, %v620_v29  ;;  %v6393_v23 = vpack.i.bf16 %v6265_v20, %v6263_v19  ;;  %v6397_v45 = vpack.i.bf16 %v6218_v21, %v6212_v18 }
  0x41   : > { %5537 = vrot.lane.b32.xlu0 %v6292_v2, %s5961_s16  ;;  %v6368_v34 = vpack.i.bf16 %v621_v31, %v619_v30  ;;  %v6401_v8 = vpack.i.bf16 %v6205_v3, %v6200_v0  ;;  %v6411_v46 = vpack.i.bf16 %v6176_v49, %v6174_v48  ;;  %v6418_v56 = vunpack.c.l.bf16 %v5399_v53 }
  0x42   : > { %5542 = vrot.lane.b32.xlu1 %v6294_v6, %s5961_s16  ;;  %v6420_v16 = vunpack.c.h.bf16 %v5399_v53 }
  0x47   : > { %5532 = vrot.lane.b32.xlu2 %v6326_v12, %s5961_s16 }
  0x49   : > { %5552 = vrot.lane.b32.xlu0 %v6320_v38, %s5961_s16 }
  0x4a   : > { %5557 = vrot.lane.b32.xlu1 %v6322_v40, %s5961_s16 }
  0x4f   : > { %5547 = vrot.lane.b32.xlu2 %v6350_v17, %s5961_s16 }
  0x51   : > { %5567 = vrot.lane.b32.xlu0 %v6348_v63, %s5961_s16 }
  0x52   : > { %5572 = vrot.lane.b32.xlu1 %v6352_v24, %s5961_s16 }
  0x57   : > { %5562 = vrot.lane.b32.xlu2 %v6368_v34, %s5961_s16 }
  0x59   : > { %5582 = vrot.lane.b32.xlu0 %v5581_v58, %s5962_s17 }
  0x5a   : > { %5587 = vrot.lane.b32.xlu1 %v5586_v43, %s5962_s17 }
  0x5f   : > { %5577 = vrot.lane.b32.xlu2 %v5576_v47, %s5962_s17 }
  0x61   : > { %5597 = vrot.lane.b32.xlu0 %v6378_v52, %s5962_s17 }
  0x62   : > { %5602 = vrot.lane.b32.xlu1 %v6384_v13, %s5962_s17 }
  0x67   : > { %5592 = vrot.lane.b32.xlu2 %v6397_v45, %s5962_s17 }
  0x69   : > { %5612 = vrot.lane.b32.xlu0 %v6393_v23, %s5962_s17 }
  0x6a   : > { %5617 = vrot.lane.b32.xlu1 %v6401_v8, %s5962_s17 }
  0x6f   : > { %5607 = vrot.lane.b32.xlu2 %v6411_v46, %s5962_s17 }
  0x71   : > { %5627 = vrot.lane.b32.xlu0 %v6187_v55, %s5963_s18  ;;  %v6430_v55 = vpack.i.bf16 %v6420_v16, %v6418_v56 }
  0x72   : > { %5632 = vrot.lane.b32.xlu1 %v6148_v35, %s5963_s18 }
  0x77   : > { %5622 = vrot.lane.b32.xlu2 %v6430_v55, %s5962_s17 }
  0x79   : > { %5642 = vrot.lane.b32.xlu0 %v6243_v51, %s5963_s18 }
  0x7a   : > { %5647 = vrot.lane.b32.xlu1 %v6277_v39, %s5963_s18 }
  0x7f   : > { %5637 = vrot.lane.b32.xlu2 %v6193_v59, %s5963_s18 }
  0x81   : > { %5657 = vrot.lane.b32.xlu0 %v5581_v58, %s5964_s19 }
  0x82   : > { %5662 = vrot.lane.b32.xlu1 %v6148_v35, %s5965_s20 }
  0x87   : > { %5652 = vrot.lane.b32.xlu2 %v6326_v12, %s5966_s21 }
  0x89   : > { %5672 = vrot.lane.b32.xlu0 %v6292_v2, %s5966_s21  ;;  %v5498_v4 = vpop.permute.xlu2 %5497 }
  0x8a   : > { %5677 = vrot.lane.b32.xlu1 %v5586_v43, %s5964_s19  ;;  %v5500_v5 = vunpack.i.h.bf16 %v5498_v4  ;;  %v5499_v7 = vunpack.i.l.bf16 %v5498_v4  ;;  %v358_v4 = vld [vmem:[%s6080_s12 + $0x80] sm:$0x1] }
  0x8c   : > { %570 = vst.msk [vmem:[#allocation2 + $0x48] sm:$0xff] %vm560_vm3, %v5500_v5 }
  0x8d   : > { %569 = vst.msk [vmem:[#allocation2 + $0x40] sm:$0xff] %vm560_vm3, %v5499_v7 }
  0x8f   : > { %5667 = vrot.lane.b32.xlu2 %v6292_v2, %s5967_s22 }
  0x91   : > { %5687 = vrot.lane.b32.xlu0 %v6294_v6, %s5967_s22  ;;  %v5503_v14 = vpop.permute.xlu2 %5502 }
  0x92   : > { %5692 = vrot.lane.b32.xlu1 %v6232_v33, %s5963_s18  ;;  %v5505_v42 = vunpack.i.h.bf16 %v5503_v14  ;;  %v5504_v48 = vunpack.i.l.bf16 %v5503_v14 }
  0x93   : > { %v5478_v11 = vpop.permute.xlu0 %5477 }
  0x94   : > { %v5480_v15 = vunpack.i.h.bf16 %v5478_v11  ;;  %v5479_v28 = vunpack.i.l.bf16 %v5478_v11  ;;  %v5488_v35 = vpop.permute.xlu1 %5487  ;;  %572 = vst.msk [vmem:[#allocation2 + $0x58] sm:$0xff] %vm560_vm3, %v5505_v42  ;;  %v394_v11 = vunpack.c.l.bf16 %v358_v4 }
  0x95   : > { %v5490_v36 = vunpack.i.h.bf16 %v5488_v35  ;;  %v5489_v41 = vunpack.i.l.bf16 %v5488_v35  ;;  %571 = vst.msk [vmem:[#allocation2 + $0x50] sm:$0xff] %vm560_vm3, %v5504_v48 }
  0x96   : > { %562 = vst.msk [vmem:[#allocation2 + $0x8] sm:$0xff] %vm560_vm3, %v5480_v15  ;;  %v800_v42 = vrot.slane %v394_v11, 1 }
  0x97   : > { %561 = vst.msk [vmem:[#allocation2] sm:$0xff] %vm560_vm3, %v5479_v28  ;;  %5682 = vrot.lane.b32.xlu2 %v6193_v59, %s5965_s20 }
  0x98   : > { %566 = vst.msk [vmem:[#allocation2 + $0x28] sm:$0xff] %vm560_vm3, %v5490_v36 }
  0x99   : > { %565 = vst.msk [vmem:[#allocation2 + $0x20] sm:$0xff] %vm560_vm3, %v5489_v41  ;;  %5702 = vrot.lane.b32.xlu0 %v6393_v23, %s5964_s19  ;;  %v5518_v0 = vpop.permute.xlu2 %5517  ;;  %v798_v41 = vrot.slane %v6420_v16, 1 }
  0x9a   : > { %5707 = vrot.lane.b32.xlu1 %v6300_v25, %s5965_s20  ;;  %v5520_v19 = vunpack.i.h.bf16 %v5518_v0  ;;  %v5519_v59 = vunpack.i.l.bf16 %v5518_v0 }
  0x9b   : > { %v5483_v49 = vpop.permute.xlu0 %5482  ;;  %v801_v0 = vsel %vm449_vm0, %v798_v41, %v800_v42 }
  0x9c   : > { %v5485_v3 = vunpack.i.h.bf16 %v5483_v49  ;;  %v5484_v18 = vunpack.i.l.bf16 %v5483_v49  ;;  %v5493_v21 = vpop.permute.xlu1 %5492  ;;  %578 = vst.msk [vmem:[#allocation2 + $0x88] sm:$0xff] %vm560_vm3, %v5520_v19 }
  0x9d   : > { %v5495_v50 = vunpack.i.h.bf16 %v5493_v21  ;;  %v5494_v57 = vunpack.i.l.bf16 %v5493_v21  ;;  %577 = vst.msk [vmem:[#allocation2 + $0x80] sm:$0xff] %vm560_vm3, %v5519_v59 }
  0x9e   : > { %564 = vst.msk [vmem:[#allocation2 + $0x18] sm:$0xff] %vm560_vm3, %v5485_v3 }
  0x9f   : > { %563 = vst.msk [vmem:[#allocation2 + $0x10] sm:$0xff] %vm560_vm3, %v5484_v18  ;;  %5697 = vrot.lane.b32.xlu2 %v6368_v34, %s5966_s21 }
  0xa0   : > { %568 = vst.msk [vmem:[#allocation2 + $0x38] sm:$0xff] %vm560_vm3, %v5495_v50 }
  0xa1   : > { %567 = vst.msk [vmem:[#allocation2 + $0x30] sm:$0xff] %vm560_vm3, %v5494_v57  ;;  %5717 = vrot.lane.b32.xlu0 %v6294_v6, %s5966_s21  ;;  %v5533_v2 = vpop.permute.xlu2 %5532 }
  0xa2   : > { %5722 = vrot.lane.b32.xlu1 %v6397_v45, %s5964_s19  ;;  %v5534_v6 = vunpack.i.l.bf16 %v5533_v2  ;;  %v5535_v1 = vunpack.i.h.bf16 %v5533_v2 }
  0xa3   : > { %v5508_v20 = vpop.permute.xlu0 %5507 }
  0xa4   : > { %v5510_v12 = vunpack.i.h.bf16 %v5508_v20  ;;  %v5509_v37 = vunpack.i.l.bf16 %v5508_v20  ;;  %v5513_v60 = vpop.permute.xlu1 %5512  ;;  %695 = vst.msk [vmem:[#allocation2 + $0x10] sm:$0xff] %vm692_vm4, %v5534_v6 }
  0xa5   : > { %v5515_v61 = vunpack.i.h.bf16 %v5513_v60  ;;  %v5514_v62 = vunpack.i.l.bf16 %v5513_v60  ;;  %696 = vst.msk [vmem:[#allocation2 + $0x18] sm:$0xff] %vm692_vm4, %v5535_v1  ;;  %v884_v1 = vrot.slane %v6420_v16, 2 }
  0xa6   : > { %574 = vst.msk [vmem:[#allocation2 + $0x68] sm:$0xff] %vm560_vm3, %v5510_v12 }
  0xa7   : > { %573 = vst.msk [vmem:[#allocation2 + $0x60] sm:$0xff] %vm560_vm3, %v5509_v37  ;;  %5712 = vrot.lane.b32.xlu2 %v6348_v63, %s5967_s22 }
  0xa8   : > { %576 = vst.msk [vmem:[#allocation2 + $0x78] sm:$0xff] %vm560_vm3, %v5515_v61 }
  0xa9   : > { %575 = vst.msk [vmem:[#allocation2 + $0x70] sm:$0xff] %vm560_vm3, %v5514_v62  ;;  %5732 = vrot.lane.b32.xlu0 %v6350_v17, %s5967_s22  ;;  %v5548_v44 = vpop.permute.xlu2 %5547 }
  0xaa   : > { %5737 = vrot.lane.b32.xlu1 %v6300_v25, %s5963_s18  ;;  %v5550_v30 = vunpack.i.h.bf16 %v5548_v44  ;;  %v5549_v31 = vunpack.i.l.bf16 %v5548_v44 }
  0xab   : > { %v5523_v22 = vpop.permute.xlu0 %5522 }
  0xac   : > { %v5525_v54 = vunpack.i.h.bf16 %v5523_v22  ;;  %v5524_v9 = vunpack.i.l.bf16 %v5523_v22  ;;  %v5528_v26 = vpop.permute.xlu1 %5527  ;;  %702 = vst.msk [vmem:[#allocation2 + $0x48] sm:$0xff] %vm692_vm4, %v5550_v30  ;;  %v886_v22 = vrot.slane %v394_v11, 2 }
  0xad   : > { %v5530_v27 = vunpack.i.h.bf16 %v5528_v26  ;;  %v5529_v29 = vunpack.i.l.bf16 %v5528_v26  ;;  %701 = vst.msk [vmem:[#allocation2 + $0x40] sm:$0xff] %vm692_vm4, %v5549_v31 }
  0xae   : > { %580 = vst.msk [vmem:[#allocation2 + $0x98] sm:$0xff] %vm560_vm3, %v5525_v54  ;;  %v359_v54 = vld [vmem:[%s6080_s12 + $0x84] sm:$0xff]   ;;  %v887_v26 = vsel %vm581_vm1, %v884_v1, %v886_v22 }
  0xaf   : > { %579 = vst.msk [vmem:[#allocation2 + $0x90] sm:$0xff] %vm560_vm3, %v5524_v9  ;;  %5727 = vrot.lane.b32.xlu2 %v6243_v51, %s5965_s20  ;;  %v6590_v9 = vld [vmem:[%s6080_s12 + $0x8c] sm:$0x1]  ;;  %v6605_v30 = vunpack.c.h.bf16 %v359_v54 }
  0xb0   : > { %693 = vst.msk [vmem:[#allocation2] sm:$0xff] %vm692_vm4, %v5529_v29 }
  0xb1   : > { %694 = vst.msk [vmem:[#allocation2 + $0x8] sm:$0xff] %vm692_vm4, %v5530_v27  ;;  %5747 = vrot.lane.b32.xlu0 %v6401_v8, %s5964_s19  ;;  %v5563_v58 = vpop.permute.xlu2 %5562 }
  0xb2   : > { %5752 = vrot.lane.b32.xlu1 %v6260_v10, %s5965_s20  ;;  %v5565_v8 = vunpack.i.h.bf16 %v5563_v58  ;;  %v5564_v51 = vunpack.i.l.bf16 %v5563_v58 }
  0xb3   : > { %v5538_v25 = vpop.permute.xlu0 %5537 }
  0xb4   : > { %v5540_v43 = vunpack.i.h.bf16 %v5538_v25  ;;  %v5539_v47 = vunpack.i.l.bf16 %v5538_v25  ;;  %v5543_v23 = vpop.permute.xlu1 %5542  ;;  %708 = vst.msk [vmem:[#allocation2 + $0x78] sm:$0xff] %vm692_vm4, %v5565_v8 }
  0xb5   : > { %v5545_v45 = vunpack.i.h.bf16 %v5543_v23  ;;  %v5544_v53 = vunpack.i.l.bf16 %v5543_v23  ;;  %707 = vst.msk [vmem:[#allocation2 + $0x70] sm:$0xff] %vm692_vm4, %v5564_v51  ;;  %v1054_v51 = vrot.slane %v6605_v30, 1 }
  0xb6   : > { %698 = vst.msk [vmem:[#allocation2 + $0x28] sm:$0xff] %vm692_vm4, %v5540_v43 }
  0xb7   : > { %697 = vst.msk [vmem:[#allocation2 + $0x20] sm:$0xff] %vm692_vm4, %v5539_v47  ;;  %5742 = vrot.lane.b32.xlu2 %v6348_v63, %s5966_s21  ;;  %v797_v63 = vrot.slane %v6418_v56, 1 }
  0xb8   : > { %700 = vst.msk [vmem:[#allocation2 + $0x38] sm:$0xff] %vm692_vm4, %v5545_v45 }
  0xb9   : > { %699 = vst.msk [vmem:[#allocation2 + $0x30] sm:$0xff] %vm692_vm4, %v5544_v53  ;;  %5762 = vrot.lane.b32.xlu0 %v6350_v17, %s5966_s21  ;;  %v5578_v7 = vpop.permute.xlu2 %5577  ;;  %v799_v49 = vsel %vm449_vm0, %v797_v63, %v798_v41 }
  0xba   : > { %5767 = vrot.lane.b32.xlu1 %v6378_v52, %s5964_s19  ;;  %v5579_v17 = vunpack.i.l.bf16 %v5578_v7  ;;  %v5580_v52 = vunpack.i.h.bf16 %v5578_v7  ;;  %v6570_v59 = vpack.i.bf16 %v801_v0, %v799_v49 }
  0xbb   : > { %v5553_v5 = vpop.permute.xlu0 %5552 }
  0xbc   : > { %v5555_v14 = vunpack.i.h.bf16 %v5553_v5  ;;  %v5554_v15 = vunpack.i.l.bf16 %v5553_v5  ;;  %v5558_v28 = vpop.permute.xlu1 %5557  ;;  %776 = vst.msk [vmem:[#allocation2] sm:$0xff] %vm775_vm5, %v5579_v17 }
  0xbd   : > { %v5560_v35 = vunpack.i.h.bf16 %v5558_v28  ;;  %v5559_v36 = vunpack.i.l.bf16 %v5558_v28  ;;  %777 = vst.msk [vmem:[#allocation2 + $0x8] sm:$0xff] %vm775_vm5, %v5580_v52 }
  0xbe   : > { %704 = vst.msk [vmem:[#allocation2 + $0x58] sm:$0xff] %vm692_vm4, %v5555_v14 }
  0xbf   : > { %703 = vst.msk [vmem:[#allocation2 + $0x50] sm:$0xff] %vm692_vm4, %v5554_v15  ;;  %5757 = vrot.lane.b32.xlu2 %v6352_v24, %s5967_s22 }
  0xc0   : > { %705 = vst.msk [vmem:[#allocation2 + $0x60] sm:$0xff] %vm692_vm4, %v5559_v36 }
  0xc1   : > { %706 = vst.msk [vmem:[#allocation2 + $0x68] sm:$0xff] %vm692_vm4, %v5560_v35  ;;  %5777 = vrot.lane.b32.xlu0 %v6320_v38, %s5967_s22  ;;  %v5593_v3 = vpop.permute.xlu2 %5592  ;;  %v5271_v35 = vld [vmem:[%s8485_s1 + $0x8] sm:$0xff] }
  0xc2   : > { %5782 = vrot.lane.b32.xlu1 %v6260_v10, %s5963_s18  ;;  %v5594_v10 = vunpack.i.l.bf16 %v5593_v3  ;;  %v5595_v20 = vunpack.i.h.bf16 %v5593_v3  ;;  %v5270_v3 = vld [vmem:[%s8485_s1] sm:$0xff] }
  0xc3   : > { %v5568_v48 = vpop.permute.xlu0 %5567 }
  0xc4   : > { %v5570_v18 = vunpack.i.h.bf16 %v5568_v48  ;;  %v5569_v21 = vunpack.i.l.bf16 %v5568_v48  ;;  %v5573_v50 = vpop.permute.xlu1 %5572  ;;  %782 = vst.msk [vmem:[#allocation2 + $0x30] sm:$0xff] %vm775_vm5, %v5594_v10 }
  0xc5   : > { %v5575_v57 = vunpack.i.h.bf16 %v5573_v50  ;;  %v5574_v19 = vunpack.i.l.bf16 %v5573_v50  ;;  %783 = vst.msk [vmem:[#allocation2 + $0x38] sm:$0xff] %vm775_vm5, %v5595_v20 }
  0xc6   : > { %710 = vst.msk [vmem:[#allocation2 + $0x88] sm:$0xff] %vm692_vm4, %v5570_v18 }
  0xc7   : > { %709 = vst.msk [vmem:[#allocation2 + $0x80] sm:$0xff] %vm692_vm4, %v5569_v21  ;;  %5772 = vrot.lane.b32.xlu2 %v6277_v39, %s5965_s20  ;;  %v883_v39 = vrot.slane %v6418_v56, 2  ;;  %v6600_v56 = vunpack.c.l.bf16 %v359_v54 }
  0xc8   : > { %711 = vst.msk [vmem:[#allocation2 + $0x90] sm:$0xff] %vm692_vm4, %v5574_v19 }
  0xc9   : > { %712 = vst.msk [vmem:[#allocation2 + $0x98] sm:$0xff] %vm692_vm4, %v5575_v57  ;;  %5792 = vrot.lane.b32.xlu0 %v6430_v55, %s5964_s19  ;;  %v5608_v12 = vpop.permute.xlu2 %5607  ;;  %v885_v16 = vsel %vm581_vm1, %v883_v39, %v884_v1  ;;  %v1053_v53 = vrot.slane %v6600_v56, 1  ;;  %v5836_v42 = vpack.i.bf16 %v6605_v30, %v6600_v56 }
  0xca   : > { %5797 = vrot.lane.b32.xlu1 %v6570_v59, %s5965_s20  ;;  %v5609_v55 = vunpack.i.l.bf16 %v5608_v12  ;;  %v5610_v44 = vunpack.i.h.bf16 %v5608_v12  ;;  %v6611_v47 = vpack.i.bf16 %v887_v26, %v885_v16  ;;  %v1140_v12 = vrot.slane %v6605_v30, 2 }
  0xcb   : > { %v5583_v2 = vpop.permute.xlu0 %5582  ;;  %v1055_v14 = vsel %vm449_vm0, %v1053_v53, %v1054_v51 }
  0xcc   : > { %v5585_v37 = vunpack.i.h.bf16 %v5583_v2  ;;  %v5584_v60 = vunpack.i.l.bf16 %v5583_v2  ;;  %v5588_v61 = vpop.permute.xlu1 %5587  ;;  %788 = vst.msk [vmem:[#allocation2 + $0x60] sm:$0xff] %vm775_vm5, %v5609_v55  ;;  %v1139_v2 = vrot.slane %v6600_v56, 2 }
  0xcd   : > { %v5590_v62 = vunpack.i.h.bf16 %v5588_v61  ;;  %v5589_v6 = vunpack.i.l.bf16 %v5588_v61  ;;  %789 = vst.msk [vmem:[#allocation2 + $0x68] sm:$0xff] %vm775_vm5, %v5610_v44 }
  0xce   : > { %778 = vst.msk [vmem:[#allocation2 + $0x10] sm:$0xff] %vm775_vm5, %v5584_v60  ;;  %v1141_v61 = vsel %vm581_vm1, %v1139_v2, %v1140_v12 }
  0xcf   : > { %779 = vst.msk [vmem:[#allocation2 + $0x18] sm:$0xff] %vm775_vm5, %v5585_v37  ;;  %5787 = vrot.lane.b32.xlu2 %v6352_v24, %s5966_s21 }
  0xd0   : > { %780 = vst.msk [vmem:[#allocation2 + $0x20] sm:$0xff] %vm775_vm5, %v5589_v6 }
  0xd1   : > { %781 = vst.msk [vmem:[#allocation2 + $0x28] sm:$0xff] %vm775_vm5, %v5590_v62  ;;  %5807 = vrot.lane.b32.xlu0 %v6320_v38, %s5966_s21  ;;  %v5623_v29 = vpop.permute.xlu2 %5622  ;;  %v397_v38 = vunpack.c.l.bf16 %v6590_v9 }
  0xd2   : > { %5812 = vrot.lane.b32.xlu1 %v6384_v13, %s5964_s19  ;;  %v1259_v13 = vld [vmem:[%s8485_s1 + $0x10] sm:$0x3]  ;;  %v5624_v45 = vunpack.i.l.bf16 %v5623_v29  ;;  %v5625_v8 = vunpack.i.h.bf16 %v5623_v29 }
  0xd3   : > { %v5598_v27 = vpop.permute.xlu0 %5597  ;;  %v1269_v23 = vunpack.c.l.b16 %v1259_v13  ;;  %v1056_v4 = vrot.slane %v397_v38, 1  ;;  %v1142_v37 = vrot.slane %v397_v38, 2 }
  0xd4   : > { %v5600_v24 = vunpack.i.h.bf16 %v5598_v27  ;;  %v5599_v31 = vunpack.i.l.bf16 %v5598_v27  ;;  %v5603_v25 = vpop.permute.xlu1 %5602  ;;  %794 = vst.msk [vmem:[#allocation2 + $0x90] sm:$0xff] %vm775_vm5, %v5624_v45 }
  0xd5   : > { %v5605_v58 = vunpack.i.h.bf16 %v5603_v25  ;;  %v5604_v43 = vunpack.i.l.bf16 %v5603_v25  ;;  %v1272_v5 = vpack.c.b16 %v1269_v23, %v1269_v23  ;;  %795 = vst.msk [vmem:[#allocation2 + $0x98] sm:$0xff] %vm775_vm5, %v5625_v8  ;;  %v1057_v15 = vsel %vm449_vm0, %v1054_v51, %v1056_v4 }
  0xd6   : > { %785 = vst.msk [vmem:[#allocation2 + $0x48] sm:$0xff] %vm775_vm5, %v5600_v24  ;;  %v5841_v48 = vpack.i.bf16 %v1057_v15, %v1055_v14  ;;  %v1143_v62 = vsel %vm581_vm1, %v1140_v12, %v1142_v37 }
  0xd7   : > { %784 = vst.msk [vmem:[#allocation2 + $0x40] sm:$0xff] %vm775_vm5, %v5599_v31  ;;  %5802 = vrot.lane.b32.xlu2 %v6611_v47, %s5967_s22  ;;  %v1308_v7 = vsel %vm1306_vm6, %v1272_v5, 0  ;;  %v5846_v54 = vpack.i.bf16 %v1143_v62, %v1141_v61 }
  0xd8   : > { %786 = vst.msk [vmem:[#allocation2 + $0x50] sm:$0xff] %vm775_vm5, %v5604_v43  ;;  %1315 = vmatpush.bf16.msra.mxu0 %v1308_v7  ;;  %5400 = vmatpush.bf16.msra.mxu3 %v1308_v7 }
  0xd9   : > { %787 = vst.msk [vmem:[#allocation2 + $0x58] sm:$0xff] %vm775_vm5, %v5605_v58  ;;  %5822 = vrot.lane.b32.xlu0 %v6322_v40, %s5967_s22  ;;  %v5638_v28 = vpop.permute.xlu2 %5637 }
  0xda   : > { %5827 = vrot.lane.b32.xlu1 %v6570_v59, %s5963_s18  ;;  %v5639_v49 = vunpack.i.l.bf16 %v5638_v28  ;;  %v5640_v0 = vunpack.i.h.bf16 %v5638_v28 }
  0xdb   : > { %v5613_v11 = vpop.permute.xlu0 %5612 }
  0xdc   : > { %v5615_v36 = vunpack.i.h.bf16 %v5613_v11  ;;  %v5614_v17 = vunpack.i.l.bf16 %v5613_v11  ;;  %v5618_v63 = vpop.permute.xlu1 %5617  ;;  %1316 = vmatpush.bf16.msra.mxu0 %v5271_v35  ;;  %5401 = vmatpush.bf16.msra.mxu3 %v5271_v35  ;;  %867 = vst.msk [vmem:[#allocation2 + $0x20] sm:$0xff] %vm862_vm7, %v5639_v49 }
  0xdd   : > { %v5620_v52 = vunpack.i.h.bf16 %v5618_v63  ;;  %v5619_v41 = vunpack.i.l.bf16 %v5618_v63  ;;  %868 = vst.msk [vmem:[#allocation2 + $0x28] sm:$0xff] %vm862_vm7, %v5640_v0 }
  0xde   : > { %791 = vst.msk [vmem:[#allocation2 + $0x78] sm:$0xff] %vm775_vm5, %v5615_v36 }
  0xdf   : > { %790 = vst.msk [vmem:[#allocation2 + $0x70] sm:$0xff] %vm775_vm5, %v5614_v17  ;;  %5817 = vrot.lane.b32.xlu2 %v6230_v32, %s5965_s20 }
  0xe0   : > { %792 = vst.msk [vmem:[#allocation2 + $0x80] sm:$0xff] %vm775_vm5, %v5619_v41  ;;  %1317 = vmatpush.bf16.msra.mxu0 %v5270_v3  ;;  %5402 = vmatpush.bf16.msra.mxu3 %v5270_v3 }
  0xe1   : > { %793 = vst.msk [vmem:[#allocation2 + $0x88] sm:$0xff] %vm775_vm5, %v5620_v52  ;;  %5837 = vrot.lane.b32.xlu0 %v5836_v42, %s5964_s19  ;;  %v5653_v21 = vpop.permute.xlu2 %5652 }
  0xe2   : > { %5842 = vrot.lane.b32.xlu1 %v5841_v48, %s5965_s20  ;;  %v5654_v20 = vunpack.i.l.bf16 %v5653_v21  ;;  %v5655_v60 = vunpack.i.h.bf16 %v5653_v21 }
  0xe3   : > { %v5628_v18 = vpop.permute.xlu0 %5627 }
  0xe4   : > { %v5630_v50 = vunpack.i.h.bf16 %v5628_v18  ;;  %v5629_v57 = vunpack.i.l.bf16 %v5628_v18  ;;  %v5633_v19 = vpop.permute.xlu1 %5632 }
  0xe5   : > { %v5635_v59 = vunpack.i.h.bf16 %v5633_v19  ;;  %v5634_v10 = vunpack.i.l.bf16 %v5633_v19 }
  0xe6   : > { %863 = vst.msk [vmem:[#allocation2] sm:$0xff] %vm862_vm7, %v5629_v57 }
  0xe7   : > { %864 = vst.msk [vmem:[#allocation2 + $0x8] sm:$0xff] %vm862_vm7, %v5630_v50  ;;  %5832 = vrot.lane.b32.xlu2 %v6611_v47, %s5966_s21 }
  0xe8   : > { %865 = vst.msk [vmem:[#allocation2 + $0x10] sm:$0xff] %vm862_vm7, %v5634_v10 }
  0xe9   : > { %866 = vst.msk [vmem:[#allocation2 + $0x18] sm:$0xff] %vm862_vm7, %v5635_v59  ;;  %5852 = vrot.lane.b32.xlu0 %v6230_v32, %s5963_s18  ;;  %v5668_v55 = vpop.permute.xlu2 %5667 }
  0xea   : > { %5857 = vrot.lane.b32.xlu1 %v6322_v40, %s5966_s21  ;;  %949 = vst.msk [vmem:[#allocation2] sm:$0xff] %vm948_vm8, %v5654_v20  ;;  %v5669_v30 = vunpack.i.l.bf16 %v5668_v55 }
  0xeb   : > { %v5643_v6 = vpop.permute.xlu0 %5642  ;;  %950 = vst.msk [vmem:[#allocation2 + $0x8] sm:$0xff] %vm948_vm8, %v5655_v60 }
  0xec   : > { %v5645_v39 = vunpack.i.h.bf16 %v5643_v6  ;;  %v5644_v1 = vunpack.i.l.bf16 %v5643_v6  ;;  %v5648_v22 = vpop.permute.xlu1 %5647 }
  0xed   : > { %v5650_v32 = vunpack.i.h.bf16 %v5648_v22  ;;  %v5649_v44 = vunpack.i.l.bf16 %v5648_v22 }
  0xee   : > { %870 = vst.msk [vmem:[#allocation2 + $0x38] sm:$0xff] %vm862_vm7, %v5645_v39 }
  0xef   : > { %869 = vst.msk [vmem:[#allocation2 + $0x30] sm:$0xff] %vm862_vm7, %v5644_v1  ;;  %5847 = vrot.lane.b32.xlu2 %v5846_v54, %s5967_s22 }
  0xf0   : > { %871 = vst.msk [vmem:[#allocation2 + $0x40] sm:$0xff] %vm862_vm7, %v5649_v44 }
  0xf1   : > { %872 = vst.msk [vmem:[#allocation2 + $0x48] sm:$0xff] %vm862_vm7, %v5650_v32  ;;  %5867 = vrot.lane.b32.xlu0 %v6232_v33, %s5965_s20  ;;  %v5683_v9 = vpop.permute.xlu2 %5682  ;;  %v5670_v33 = vunpack.i.h.bf16 %v5668_v55 }
  0xf2   : > { %5872 = vrot.lane.b32.xlu1 %v6368_v34, %s5967_s22  ;;  %v5684_v43 = vunpack.i.l.bf16 %v5683_v9  ;;  %v5685_v47 = vunpack.i.h.bf16 %v5683_v9 }
  0xf3   : > { %v5658_v40 = vpop.permute.xlu0 %5657 }
  0xf4   : > { %v5660_v56 = vunpack.i.h.bf16 %v5658_v40  ;;  %v5659_v16 = vunpack.i.l.bf16 %v5658_v40  ;;  %v5663_v26 = vpop.permute.xlu1 %5662 }
  0xf5   : > { %v5665_v27 = vunpack.i.h.bf16 %v5663_v26  ;;  %v5664_v29 = vunpack.i.l.bf16 %v5663_v26 }
  0xf6   : > { %1032 = vst.msk [vmem:[#allocation2] sm:$0xff] %vm1031_vm9, %v5659_v16 }
  0xf7   : > { %1033 = vst.msk [vmem:[#allocation2 + $0x8] sm:$0xff] %vm1031_vm9, %v5660_v56  ;;  %5862 = vrot.lane.b32.xlu2 %v6411_v46, %s5964_s19 }
  0xf8   : > { %1119 = vst.msk [vmem:[#allocation2] sm:$0xff] %vm1118_vm10, %v5664_v29 }
  0xf9   : > { %1120 = vst.msk [vmem:[#allocation2 + $0x8] sm:$0xff] %vm1118_vm10, %v5665_v27  ;;  %v5698_v38 = vpop.permute.xlu2 %5697 }
  0xfa   : > { %1205 = vst.msk [vmem:[#allocation2] sm:$0xff] %vm1204_vm11, %v5669_v30  ;;  %v5699_v14 = vunpack.i.l.bf16 %v5698_v38  ;;  %v5700_v15 = vunpack.i.h.bf16 %v5698_v38 }
  0xfb   : > { %1206 = vst.msk [vmem:[#allocation2 + $0x8] sm:$0xff] %vm1204_vm11, %v5670_v33  ;;  %v5673_v34 = vpop.permute.xlu0 %5672 }
  0xfc   : > { %v5675_v24 = vunpack.i.h.bf16 %v5673_v34  ;;  %v5674_v31 = vunpack.i.l.bf16 %v5673_v34  ;;  %v5678_v25 = vpop.permute.xlu1 %5677 }
  0xfd   : > { %v5680_v13 = vunpack.i.h.bf16 %v5678_v25  ;;  %v5679_v58 = vunpack.i.l.bf16 %v5678_v25 }
  0xfe   : > { %951 = vst.msk [vmem:[#allocation2 + $0x10] sm:$0xff] %vm948_vm8, %v5674_v31 }
  0xff   : > { %952 = vst.msk [vmem:[#allocation2 + $0x18] sm:$0xff] %vm948_vm8, %v5675_v24 }
 0x100   : > { %1034 = vst.msk [vmem:[#allocation2 + $0x10] sm:$0xff] %vm1031_vm9, %v5679_v58 }
 0x101   : > { %1035 = vst.msk [vmem:[#allocation2 + $0x18] sm:$0xff] %vm1031_vm9, %v5680_v13  ;;  %v1225_v46 = vld [vmem:[#allocation2] sm:$0xff]  ;;  %v5713_v8 = vpop.permute.xlu2 %5712 }
 0x102   : > { %1121 = vst.msk [vmem:[#allocation2 + $0x10] sm:$0xff] %vm1118_vm10, %v5684_v43  ;;  %v1226_v23 = vld [vmem:[#allocation2 + $0x8] sm:$0xff]  ;;  %v5714_v42 = vunpack.i.l.bf16 %v5713_v8  ;;  %v5715_v48 = vunpack.i.h.bf16 %v5713_v8 }
 0x103   : > { %1122 = vst.msk [vmem:[#allocation2 + $0x18] sm:$0xff] %vm1118_vm10, %v5685_v47  ;;  %v1245_v45 = vpack.c.bf16 %v1226_v23, %v1225_v46  ;;  %v5688_v53 = vpop.permute.xlu0 %5687 }
 0x104   : > { %v5690_v51 = vunpack.i.h.bf16 %v5688_v53  ;;  %v5689_v4 = vunpack.i.l.bf16 %v5688_v53  ;;  %v5693_v5 = vpop.permute.xlu1 %5692 }
 0x105   : > { %4851 = vmatmul.msk.bf16.vlgmr.msra.gmra.mxu0 %vm1275_vm12, %v1245_v45  ;;  %v5695_v7 = vunpack.i.h.bf16 %v5693_v5  ;;  %v5694_v11 = vunpack.i.l.bf16 %v5693_v5 }
 0x106   : > { %1207 = vst.msk [vmem:[#allocation2 + $0x10] sm:$0xff] %vm1204_vm11, %v5689_v4 }
 0x107   : > { %1208 = vst.msk [vmem:[#allocation2 + $0x18] sm:$0xff] %vm1204_vm11, %v5690_v51 }
 0x108   : > { %875 = vst.msk [vmem:[#allocation2 + $0x60] sm:$0xff] %vm862_vm7, %v5694_v11 }
 0x109   : > { %876 = vst.msk [vmem:[#allocation2 + $0x68] sm:$0xff] %vm862_vm7, %v5695_v7  ;;  %v5728_v35 = vpop.permute.xlu2 %5727 }
 0x10a   : > { %961 = vst.msk [vmem:[#allocation2 + $0x60] sm:$0xff] %vm948_vm8, %v5699_v14  ;;  %v5729_v20 = vunpack.i.l.bf16 %v5728_v35  ;;  %v5730_v2 = vunpack.i.h.bf16 %v5728_v35 }
 0x10b   : > { %962 = vst.msk [vmem:[#allocation2 + $0x68] sm:$0xff] %vm948_vm8, %v5700_v15  ;;  %v5703_v28 = vpop.permute.xlu0 %5702 }
 0x10c   : > { %v5705_v36 = vunpack.i.h.bf16 %v5703_v28  ;;  %v5704_v17 = vunpack.i.l.bf16 %v5703_v28  ;;  %v5708_v63 = vpop.permute.xlu1 %5707 }
 0x10d   : > { %v5710_v52 = vunpack.i.h.bf16 %v5708_v63  ;;  %v5709_v41 = vunpack.i.l.bf16 %v5708_v63  ;;  %v1227_v49 = vld [vmem:[#allocation2 + $0x10] sm:$0xff] }
 0x10e   : > { %1044 = vst.msk [vmem:[#allocation2 + $0x60] sm:$0xff] %vm1031_vm9, %v5704_v17  ;;  %v1228_v0 = vld [vmem:[#allocation2 + $0x18] sm:$0xff] }
 0x10f   : > { %1045 = vst.msk [vmem:[#allocation2 + $0x68] sm:$0xff] %vm1031_vm9, %v5705_v36  ;;  %v1246_v3 = vpack.c.bf16 %v1228_v0, %v1227_v49 }
 0x110   : > { %1131 = vst.msk [vmem:[#allocation2 + $0x60] sm:$0xff] %vm1118_vm10, %v5709_v41 }
 0x111   : > { %1132 = vst.msk [vmem:[#allocation2 + $0x68] sm:$0xff] %vm1118_vm10, %v5710_v52  ;;  %v5743_v21 = vpop.permute.xlu2 %5742 }
 0x112   : > { %1217 = vst.msk [vmem:[#allocation2 + $0x60] sm:$0xff] %vm1204_vm11, %v5714_v42  ;;  %v5744_v32 = vunpack.i.l.bf16 %v5743_v21  ;;  %v5745_v44 = vunpack.i.h.bf16 %v5743_v21 }
 0x113   : > { %1218 = vst.msk [vmem:[#allocation2 + $0x68] sm:$0xff] %vm1204_vm11, %v5715_v48  ;;  %v5718_v18 = vpop.permute.xlu0 %5717 }
 0x114   : > { %v5720_v50 = vunpack.i.h.bf16 %v5718_v18  ;;  %v5719_v57 = vunpack.i.l.bf16 %v5718_v18  ;;  %v5723_v19 = vpop.permute.xlu1 %5722 }
 0x115   : > { %4852 = vmatmul.msk.bf16.gmra.mxu0 %vm1275_vm12, %v1246_v3  ;;  %v5725_v59 = vunpack.i.h.bf16 %v5723_v19  ;;  %v5724_v10 = vunpack.i.l.bf16 %v5723_v19 }
 0x116   : > { %953 = vst.msk [vmem:[#allocation2 + $0x20] sm:$0xff] %vm948_vm8, %v5719_v57 }
 0x117   : > { %954 = vst.msk [vmem:[#allocation2 + $0x28] sm:$0xff] %vm948_vm8, %v5720_v50 }
 0x118   : > { %1036 = vst.msk [vmem:[#allocation2 + $0x20] sm:$0xff] %vm1031_vm9, %v5724_v10 }
 0x119   : > { %1037 = vst.msk [vmem:[#allocation2 + $0x28] sm:$0xff] %vm1031_vm9, %v5725_v59  ;;  %v1237_v12 = vld [vmem:[#allocation2 + $0x60] sm:$0xff]  ;;  %v5758_v62 = vpop.permute.xlu2 %5757 }
 0x11a   : > { %1123 = vst.msk [vmem:[#allocation2 + $0x20] sm:$0xff] %vm1118_vm10, %v5729_v20  ;;  %v1238_v37 = vld [vmem:[#allocation2 + $0x68] sm:$0xff]  ;;  %v5759_v30 = vunpack.i.l.bf16 %v5758_v62  ;;  %v5760_v34 = vunpack.i.h.bf16 %v5758_v62 }
 0x11b   : > { %1124 = vst.msk [vmem:[#allocation2 + $0x28] sm:$0xff] %vm1118_vm10, %v5730_v2  ;;  %v1251_v60 = vpack.c.bf16 %v1238_v37, %v1237_v12  ;;  %v5733_v61 = vpop.permute.xlu0 %5732 }
 0x11c   : > { %v5735_v6 = vunpack.i.h.bf16 %v5733_v61  ;;  %v5734_v55 = vunpack.i.l.bf16 %v5733_v61  ;;  %v5738_v39 = vpop.permute.xlu1 %5737 }
 0x11d   : > { %4857 = vmatmul.msk.bf16.vlgmr.msra.gmra.mxu3 %vm1275_vm12, %v1251_v60  ;;  %v5740_v1 = vunpack.i.h.bf16 %v5738_v39  ;;  %v5739_v22 = vunpack.i.l.bf16 %v5738_v39 }
 0x11e   : > { %1209 = vst.msk [vmem:[#allocation2 + $0x20] sm:$0xff] %vm1204_vm11, %v5734_v55 }
 0x11f   : > { %1210 = vst.msk [vmem:[#allocation2 + $0x28] sm:$0xff] %vm1204_vm11, %v5735_v6 }
 0x120   : > { %877 = vst.msk [vmem:[#allocation2 + $0x70] sm:$0xff] %vm862_vm7, %v5739_v22 }
 0x121   : > { %878 = vst.msk [vmem:[#allocation2 + $0x78] sm:$0xff] %vm862_vm7, %v5740_v1  ;;  %v5773_v40 = vpop.permute.xlu2 %5772 }
 0x122   : > { %963 = vst.msk [vmem:[#allocation2 + $0x70] sm:$0xff] %vm948_vm8, %v5744_v32  ;;  %v5774_v46 = vunpack.i.l.bf16 %v5773_v40  ;;  %v5775_v23 = vunpack.i.h.bf16 %v5773_v40 }
 0x123   : > { %964 = vst.msk [vmem:[#allocation2 + $0x78] sm:$0xff] %vm948_vm8, %v5745_v44  ;;  %v5748_v54 = vpop.permute.xlu0 %5747 }
 0x124   : > { %v5750_v9 = vunpack.i.h.bf16 %v5748_v54  ;;  %v5749_v56 = vunpack.i.l.bf16 %v5748_v54  ;;  %v5753_v16 = vpop.permute.xlu1 %5752 }
 0x125   : > { %v5755_v26 = vunpack.i.h.bf16 %v5753_v16  ;;  %v5754_v27 = vunpack.i.l.bf16 %v5753_v16  ;;  %v1229_v29 = vld [vmem:[#allocation2 + $0x20] sm:$0xff] }
 0x126   : > { %1046 = vst.msk [vmem:[#allocation2 + $0x70] sm:$0xff] %vm1031_vm9, %v5749_v56  ;;  %v1230_v33 = vld [vmem:[#allocation2 + $0x28] sm:$0xff] }
 0x127   : > { %1047 = vst.msk [vmem:[#allocation2 + $0x78] sm:$0xff] %vm1031_vm9, %v5750_v9  ;;  %v1247_v38 = vpack.c.bf16 %v1230_v33, %v1229_v29 }
 0x128   : > { %1133 = vst.msk [vmem:[#allocation2 + $0x70] sm:$0xff] %vm1118_vm10, %v5754_v27 }
 0x129   : > { %1134 = vst.msk [vmem:[#allocation2 + $0x78] sm:$0xff] %vm1118_vm10, %v5755_v26  ;;  %4853 = vmatmul.msk.bf16.gmra.mxu0 %vm1275_vm12, %v1247_v38  ;;  %v5788_v31 = vpop.permute.xlu2 %5787 }
 0x12a   : > { %1219 = vst.msk [vmem:[#allocation2 + $0x70] sm:$0xff] %vm1204_vm11, %v5759_v30  ;;  %v5789_v28 = vunpack.i.l.bf16 %v5788_v31  ;;  %v5790_v35 = vunpack.i.h.bf16 %v5788_v31 }
 0x12b   : > { %1220 = vst.msk [vmem:[#allocation2 + $0x78] sm:$0xff] %vm1204_vm11, %v5760_v34  ;;  %v5763_v24 = vpop.permute.xlu0 %5762 }
 0x12c   : > { %v5765_v25 = vunpack.i.h.bf16 %v5763_v24  ;;  %v5764_v13 = vunpack.i.l.bf16 %v5763_v24  ;;  %v5768_v58 = vpop.permute.xlu1 %5767 }
 0x12d   : > { %v5770_v43 = vunpack.i.h.bf16 %v5768_v58  ;;  %v5769_v47 = vunpack.i.l.bf16 %v5768_v58 }
 0x12e   : > { %955 = vst.msk [vmem:[#allocation2 + $0x30] sm:$0xff] %vm948_vm8, %v5764_v13 }
 0x12f   : > { %956 = vst.msk [vmem:[#allocation2 + $0x38] sm:$0xff] %vm948_vm8, %v5765_v25 }
 0x130   : > { %1038 = vst.msk [vmem:[#allocation2 + $0x30] sm:$0xff] %vm1031_vm9, %v5769_v47 }
 0x131   : > { %1039 = vst.msk [vmem:[#allocation2 + $0x38] sm:$0xff] %vm1031_vm9, %v5770_v43  ;;  %v1239_v45 = vld [vmem:[#allocation2 + $0x70] sm:$0xff]  ;;  %v5803_v15 = vpop.permute.xlu2 %5802 }
 0x132   : > { %1125 = vst.msk [vmem:[#allocation2 + $0x30] sm:$0xff] %vm1118_vm10, %v5774_v46  ;;  %v1240_v53 = vld [vmem:[#allocation2 + $0x78] sm:$0xff]  ;;  %v5804_v49 = vunpack.i.l.bf16 %v5803_v15  ;;  %v5805_v3 = vunpack.i.h.bf16 %v5803_v15 }
 0x133   : > { %1126 = vst.msk [vmem:[#allocation2 + $0x38] sm:$0xff] %vm1118_vm10, %v5775_v23  ;;  %v1252_v8 = vpack.c.bf16 %v1240_v53, %v1239_v45  ;;  %v5778_v51 = vpop.permute.xlu0 %5777 }
 0x134   : > { %v5780_v4 = vunpack.i.h.bf16 %v5778_v51  ;;  %v5779_v5 = vunpack.i.l.bf16 %v5778_v51  ;;  %v5783_v7 = vpop.permute.xlu1 %5782 }
 0x135   : > { %4858 = vmatmul.msk.bf16.gmra.mxu3 %vm1275_vm12, %v1252_v8  ;;  %v5785_v11 = vunpack.i.h.bf16 %v5783_v7  ;;  %v5784_v14 = vunpack.i.l.bf16 %v5783_v7 }
 0x136   : > { %1211 = vst.msk [vmem:[#allocation2 + $0x30] sm:$0xff] %vm1204_vm11, %v5779_v5 }
 0x137   : > { %1212 = vst.msk [vmem:[#allocation2 + $0x38] sm:$0xff] %vm1204_vm11, %v5780_v4 }
 0x138   : > { %879 = vst.msk [vmem:[#allocation2 + $0x80] sm:$0xff] %vm862_vm7, %v5784_v14 }
 0x139   : > { %880 = vst.msk [vmem:[#allocation2 + $0x88] sm:$0xff] %vm862_vm7, %v5785_v11  ;;  %v5818_v21 = vpop.permute.xlu2 %5817 }
 0x13a   : > { %965 = vst.msk [vmem:[#allocation2 + $0x80] sm:$0xff] %vm948_vm8, %v5789_v28  ;;  %v5819_v2 = vunpack.i.l.bf16 %v5818_v21  ;;  %v5820_v12 = vunpack.i.h.bf16 %v5818_v21 }
 0x13b   : > { %966 = vst.msk [vmem:[#allocation2 + $0x88] sm:$0xff] %vm948_vm8, %v5790_v35  ;;  %v5793_v36 = vpop.permute.xlu0 %5792 }
 0x13c   : > { %v5795_v17 = vunpack.i.h.bf16 %v5793_v36  ;;  %v5794_v63 = vunpack.i.l.bf16 %v5793_v36  ;;  %v5798_v52 = vpop.permute.xlu1 %5797 }
 0x13d   : > { %v5800_v41 = vunpack.i.h.bf16 %v5798_v52  ;;  %v5799_v42 = vunpack.i.l.bf16 %v5798_v52  ;;  %v1231_v48 = vld [vmem:[#allocation2 + $0x30] sm:$0xff] }
 0x13e   : > { %1048 = vst.msk [vmem:[#allocation2 + $0x80] sm:$0xff] %vm1031_vm9, %v5794_v63  ;;  %v1232_v0 = vld [vmem:[#allocation2 + $0x38] sm:$0xff] }
 0x13f   : > { %1049 = vst.msk [vmem:[#allocation2 + $0x88] sm:$0xff] %vm1031_vm9, %v5795_v17  ;;  %v1248_v18 = vpack.c.bf16 %v1232_v0, %v1231_v48  ;;  %v6780_v17 = vld [vmem:[%s8487_s3] ss:$0 sm:$0xff] }
 0x140   : > { %1135 = vst.msk [vmem:[#allocation2 + $0x80] sm:$0xff] %vm1118_vm10, %v5799_v42  ;;  %v6785_v63 = vld [vmem:[%s8488_s4] ss:$0 sm:$0xff] }
 0x141   : > { %1136 = vst.msk [vmem:[#allocation2 + $0x88] sm:$0xff] %vm1118_vm10, %v5800_v41  ;;  %4854 = vmatmul.msk.bf16.gmra.mxu0 %vm1275_vm12, %v1248_v18  ;;  %v5833_v60 = vpop.permute.xlu2 %5832 }
 0x142   : > { %1221 = vst.msk [vmem:[#allocation2 + $0x80] sm:$0xff] %vm1204_vm11, %v5804_v49  ;;  %v5834_v44 = vunpack.i.l.bf16 %v5833_v60  ;;  %v5835_v54 = vunpack.i.h.bf16 %v5833_v60 }
 0x143   : > { %1222 = vst.msk [vmem:[#allocation2 + $0x88] sm:$0xff] %vm1204_vm11, %v5805_v3  ;;  %v5808_v50 = vpop.permute.xlu0 %5807 }
 0x144   : > { %v5810_v57 = vunpack.i.h.bf16 %v5808_v50  ;;  %v5809_v19 = vunpack.i.l.bf16 %v5808_v50  ;;  %v5813_v59 = vpop.permute.xlu1 %5812 }
 0x145   : > { %v5815_v10 = vunpack.i.h.bf16 %v5813_v59  ;;  %v5814_v20 = vunpack.i.l.bf16 %v5813_v59 }
 0x146   : > { %957 = vst.msk [vmem:[#allocation2 + $0x40] sm:$0xff] %vm948_vm8, %v5809_v19 }
 0x147   : > { %958 = vst.msk [vmem:[#allocation2 + $0x48] sm:$0xff] %vm948_vm8, %v5810_v57 }
 0x148   : > { %1040 = vst.msk [vmem:[#allocation2 + $0x40] sm:$0xff] %vm1031_vm9, %v5814_v20 }
 0x149   : > { %1041 = vst.msk [vmem:[#allocation2 + $0x48] sm:$0xff] %vm1031_vm9, %v5815_v10  ;;  %v1241_v37 = vld [vmem:[#allocation2 + $0x80] sm:$0xff]  ;;  %v5848_v9 = vpop.permute.xlu2 %5847 }
 0x14a   : > { %1127 = vst.msk [vmem:[#allocation2 + $0x40] sm:$0xff] %vm1118_vm10, %v5819_v2  ;;  %v1242_v61 = vld [vmem:[#allocation2 + $0x88] sm:$0xff]  ;;  %v5849_v33 = vunpack.i.l.bf16 %v5848_v9  ;;  %v5850_v38 = vunpack.i.h.bf16 %v5848_v9 }
 0x14b   : > { %1128 = vst.msk [vmem:[#allocation2 + $0x48] sm:$0xff] %vm1118_vm10, %v5820_v12  ;;  %v1253_v62 = vpack.c.bf16 %v1242_v61, %v1241_v37  ;;  %v5823_v6 = vpop.permute.xlu0 %5822 }
 0x14c   : > { %v5825_v55 = vunpack.i.h.bf16 %v5823_v6  ;;  %v5824_v39 = vunpack.i.l.bf16 %v5823_v6  ;;  %v5828_v1 = vpop.permute.xlu1 %5827 }
 0x14d   : > { %4859 = vmatmul.msk.bf16.gmra.mxu3 %vm1275_vm12, %v1253_v62  ;;  %v5830_v22 = vunpack.i.h.bf16 %v5828_v1  ;;  %v5829_v32 = vunpack.i.l.bf16 %v5828_v1 }
 0x14e   : > { %1213 = vst.msk [vmem:[#allocation2 + $0x40] sm:$0xff] %vm1204_vm11, %v5824_v39 }
 0x14f   : > { %1214 = vst.msk [vmem:[#allocation2 + $0x48] sm:$0xff] %vm1204_vm11, %v5825_v55 }
 0x150   : > { %881 = vst.msk [vmem:[#allocation2 + $0x90] sm:$0xff] %vm862_vm7, %v5829_v32 }
 0x151   : > { %882 = vst.msk [vmem:[#allocation2 + $0x98] sm:$0xff] %vm862_vm7, %v5830_v22  ;;  %v5863_v25 = vpop.permute.xlu2 %5862 }
 0x152   : > { %967 = vst.msk [vmem:[#allocation2 + $0x90] sm:$0xff] %vm948_vm8, %v5834_v44  ;;  %v5864_v23 = vunpack.i.l.bf16 %v5863_v25  ;;  %v5865_v45 = vunpack.i.h.bf16 %v5863_v25 }
 0x153   : > { %968 = vst.msk [vmem:[#allocation2 + $0x98] sm:$0xff] %vm948_vm8, %v5835_v54  ;;  %v5838_v40 = vpop.permute.xlu0 %5837 }
 0x154   : > { %v5840_v56 = vunpack.i.h.bf16 %v5838_v40  ;;  %v5839_v16 = vunpack.i.l.bf16 %v5838_v40  ;;  %v5843_v26 = vpop.permute.xlu1 %5842 }
 0x155   : > { %v5845_v27 = vunpack.i.h.bf16 %v5843_v26  ;;  %v5844_v29 = vunpack.i.l.bf16 %v5843_v26  ;;  %v1233_v30 = vld [vmem:[#allocation2 + $0x40] sm:$0xff] }
 0x156   : > { %1050 = vst.msk [vmem:[#allocation2 + $0x90] sm:$0xff] %vm1031_vm9, %v5839_v16  ;;  %v1234_v34 = vld [vmem:[#allocation2 + $0x48] sm:$0xff] }
 0x157   : > { %1051 = vst.msk [vmem:[#allocation2 + $0x98] sm:$0xff] %vm1031_vm9, %v5840_v56  ;;  %v1249_v24 = vpack.c.bf16 %v1234_v34, %v1233_v30 }
 0x158   : > { %1137 = vst.msk [vmem:[#allocation2 + $0x90] sm:$0xff] %vm1118_vm10, %v5844_v29 }
 0x159   : > { %1138 = vst.msk [vmem:[#allocation2 + $0x98] sm:$0xff] %vm1118_vm10, %v5845_v27  ;;  %4855 = vmatmul.msk.bf16.gmra.mxu0 %vm1275_vm12, %v1249_v24 }
 0x15a   : > { %1223 = vst.msk [vmem:[#allocation2 + $0x90] sm:$0xff] %vm1204_vm11, %v5849_v33 }
 0x15b   : > { %1224 = vst.msk [vmem:[#allocation2 + $0x98] sm:$0xff] %vm1204_vm11, %v5850_v38  ;;  %v5853_v31 = vpop.permute.xlu0 %5852 }
 0x15c   : > { %v5855_v13 = vunpack.i.h.bf16 %v5853_v31  ;;  %v5854_v58 = vunpack.i.l.bf16 %v5853_v31  ;;  %v5858_v43 = vpop.permute.xlu1 %5857 }
 0x15d   : > { %v5860_v47 = vunpack.i.h.bf16 %v5858_v43  ;;  %v5859_v46 = vunpack.i.l.bf16 %v5858_v43 }
 0x15e   : > { %873 = vst.msk [vmem:[#allocation2 + $0x50] sm:$0xff] %vm862_vm7, %v5854_v58 }
 0x15f   : > { %874 = vst.msk [vmem:[#allocation2 + $0x58] sm:$0xff] %vm862_vm7, %v5855_v13 }
 0x160   : > { %959 = vst.msk [vmem:[#allocation2 + $0x50] sm:$0xff] %vm948_vm8, %v5859_v46 }
 0x161   : > { %960 = vst.msk [vmem:[#allocation2 + $0x58] sm:$0xff] %vm948_vm8, %v5860_v47  ;;  %v1243_v53 = vld [vmem:[#allocation2 + $0x90] sm:$0xff] }
 0x162   : > { %1042 = vst.msk [vmem:[#allocation2 + $0x50] sm:$0xff] %vm1031_vm9, %v5864_v23  ;;  %v1244_v8 = vld [vmem:[#allocation2 + $0x98] sm:$0xff] }
 0x163   : > { %1043 = vst.msk [vmem:[#allocation2 + $0x58] sm:$0xff] %vm1031_vm9, %v5865_v45  ;;  %v1254_v51 = vpack.c.bf16 %v1244_v8, %v1243_v53  ;;  %v5868_v4 = vpop.permute.xlu0 %5867 }
 0x164   : > { %v5870_v5 = vunpack.i.h.bf16 %v5868_v4  ;;  %v5869_v7 = vunpack.i.l.bf16 %v5868_v4  ;;  %v5873_v11 = vpop.permute.xlu1 %5872 }
 0x165   : > { %4860 = vmatmul.msk.bf16.gmra.mxu3 %vm1275_vm12, %v1254_v51  ;;  %v5875_v14 = vunpack.i.h.bf16 %v5873_v11  ;;  %v5874_v15 = vunpack.i.l.bf16 %v5873_v11 }
 0x166   : > { %1129 = vst.msk [vmem:[#allocation2 + $0x50] sm:$0xff] %vm1118_vm10, %v5869_v7 }
 0x167   : > { %1130 = vst.msk [vmem:[#allocation2 + $0x58] sm:$0xff] %vm1118_vm10, %v5870_v5 }
 0x168   : > { %1215 = vst.msk [vmem:[#allocation2 + $0x50] sm:$0xff] %vm1204_vm11, %v5874_v15 }
 0x169   : > { %1216 = vst.msk [vmem:[#allocation2 + $0x58] sm:$0xff] %vm1204_vm11, %v5875_v14 }
 0x16f   : > { %v1235_v28 = vld [vmem:[#allocation2 + $0x50] sm:$0xff] }
 0x170   : > { %v1236_v35 = vld [vmem:[#allocation2 + $0x58] sm:$0xff] }
 0x171   : > { %v1250_v36 = vpack.c.bf16 %v1236_v35, %v1235_v28 }
 0x173   : > { %4856 = vmatmul.msk.bf16.gmra.mxu0 %vm1275_vm12, %v1250_v36 }
 0x182   : > { %v1319_v52 = vpop.f32.mrf.mxu0 }
 0x183   : > { %v1373_v41 = vmul.f32 %v6780_v17, %v1319_v52 }
 0x185   : > { %v1397_v42 = vadd.f32 %v6785_v63, %v1373_v41 }
 0x187   : > { %v1417_v48 = vmax.f32 %v1397_v42, 0.0 }
 0x189   : > { %1457 = vst [vmem:[#allocation3 + $0x1] sm:$0xff] %v1417_v48 }
 0x18a   : > { %v1321_v49 = vpop.f32.mrf.mxu0 }
 0x18b   : > { %v1374_v0 = vmul.f32 %v6780_v17, %v1321_v49 }
 0x18d   : > { %v1398_v3 = vadd.f32 %v6785_v63, %v1374_v0 }
 0x18f   : > { %v1418_v18 = vmax.f32 %v1398_v3, 0.0 }
 0x191   : > { %1458 = vst [vmem:[#allocation3 + $0x9] sm:$0xff] %v1418_v18 }
 0x192   : > { %v1324_v21 = vpop.f32.mrf.mxu0 }
 0x193   : > { %v1375_v50 = vmul.f32 %v6780_v17, %v1324_v21 }
 0x195   : > { %v1399_v57 = vadd.f32 %v6785_v63, %v1375_v50 }
 0x197   : > { %v1419_v19 = vmax.f32 %v1399_v57, 0.0 }
 0x199   : > { %1459 = vst [vmem:[#allocation3 + $0x19] sm:$0xff] %v1419_v19 }
 0x19a   : > { %v1326_v59 = vpop.f32.mrf.mxu0 }
 0x19b   : > { %v1376_v10 = vmul.f32 %v6780_v17, %v1326_v59 }
 0x19d   : > { %v1400_v20 = vadd.f32 %v6785_v63, %v1376_v10 }
 0x19f   : > { %v1420_v2 = vmax.f32 %v1400_v20, 0.0 }
 0x1a0   : > { %v1349_v12 = vpop.f32.mrf.mxu3 }
 0x1a1   : > { %1460 = vst [vmem:[#allocation3 + $0x21] sm:$0xff] %v1420_v2  ;;  %v1385_v37 = vmul.f32 %v6780_v17, %v1349_v12 }
 0x1a3   : > { %v1409_v60 = vadd.f32 %v6785_v63, %v1385_v37 }
 0x1a5   : > { %v1429_v61 = vmax.f32 %v1409_v60, 0.0 }
 0x1a6   : > { %v1329_v62 = vpop.f32.mrf.mxu0 }
 0x1a7   : > { %1469 = vst [vmem:[#allocation3 + $0x91] sm:$0xff] %v1429_v61  ;;  %v1377_v6 = vmul.f32 %v6780_v17, %v1329_v62 }
 0x1a8   : > { %v1351_v55 = vpop.f32.mrf.mxu3 }
 0x1a9   : > { %v1401_v39 = vadd.f32 %v6785_v63, %v1377_v6  ;;  %v1386_v1 = vmul.f32 %v6780_v17, %v1351_v55 }
 0x1ab   : > { %v1421_v22 = vmax.f32 %v1401_v39, 0.0  ;;  %v1410_v32 = vadd.f32 %v6785_v63, %v1386_v1 }
 0x1ad   : > { %1461 = vst [vmem:[#allocation3 + $0x31] sm:$0xff] %v1421_v22  ;;  %v1430_v44 = vmax.f32 %v1410_v32, 0.0 }
 0x1ae   : > { %v1331_v54 = vpop.f32.mrf.mxu0 }
 0x1af   : > { %1470 = vst [vmem:[#allocation3 + $0x99] sm:$0xff] %v1430_v44  ;;  %v1378_v40 = vmul.f32 %v6780_v17, %v1331_v54 }
 0x1b1   : > { %v1402_v9 = vadd.f32 %v6785_v63, %v1378_v40 }
 0x1b3   : > { %v1422_v56 = vmax.f32 %v1402_v9, 0.0 }
 0x1b5   : > { %1462 = vst [vmem:[#allocation3 + $0x39] sm:$0xff] %v1422_v56 }
 0x1b8   : > { %v1354_v16 = vpop.f32.mrf.mxu3 }
 0x1b9   : > { %v1387_v26 = vmul.f32 %v6780_v17, %v1354_v16 }
 0x1bb   : > { %v1411_v27 = vadd.f32 %v6785_v63, %v1387_v26 }
 0x1bd   : > { %v1431_v29 = vmax.f32 %v1411_v27, 0.0 }
 0x1be   : > { %v1334_v30 = vpop.f32.mrf.mxu0 }
 0x1bf   : > { %1471 = vst [vmem:[#allocation3 + $0xa9] sm:$0xff] %v1431_v29  ;;  %v1379_v33 = vmul.f32 %v6780_v17, %v1334_v30 }
 0x1c0   : > { %v1356_v34 = vpop.f32.mrf.mxu3 }
 0x1c1   : > { %v1403_v38 = vadd.f32 %v6785_v63, %v1379_v33  ;;  %v1388_v24 = vmul.f32 %v6780_v17, %v1356_v34 }
 0x1c3   : > { %v1423_v31 = vmax.f32 %v1403_v38, 0.0  ;;  %v1412_v25 = vadd.f32 %v6785_v63, %v1388_v24 }
 0x1c5   : > { %1463 = vst [vmem:[#allocation3 + $0x49] sm:$0xff] %v1423_v31  ;;  %v1432_v13 = vmax.f32 %v1412_v25, 0.0 }
 0x1c6   : > { %v1336_v58 = vpop.f32.mrf.mxu0 }
 0x1c7   : > { %1472 = vst [vmem:[#allocation3 + $0xb1] sm:$0xff] %v1432_v13  ;;  %v1380_v43 = vmul.f32 %v6780_v17, %v1336_v58 }
 0x1c9   : > { %v1404_v47 = vadd.f32 %v6785_v63, %v1380_v43 }
 0x1cb   : > { %v1424_v46 = vmax.f32 %v1404_v47, 0.0 }
 0x1cd   : > { %1464 = vst [vmem:[#allocation3 + $0x51] sm:$0xff] %v1424_v46 }
 0x1d0   : > { %v1359_v23 = vpop.f32.mrf.mxu3 }
 0x1d1   : > { %v1389_v45 = vmul.f32 %v6780_v17, %v1359_v23 }
 0x1d3   : > { %v1413_v53 = vadd.f32 %v6785_v63, %v1389_v45 }
 0x1d5   : > { %v1433_v8 = vmax.f32 %v1413_v53, 0.0 }
 0x1d6   : > { %v1339_v51 = vpop.f32.mrf.mxu0 }
 0x1d7   : > { %1473 = vst [vmem:[#allocation3 + $0xc1] sm:$0xff] %v1433_v8  ;;  %v1381_v4 = vmul.f32 %v6780_v17, %v1339_v51 }
 0x1d8   : > { %v1361_v5 = vpop.f32.mrf.mxu3 }
 0x1d9   : > { %v1405_v7 = vadd.f32 %v6785_v63, %v1381_v4  ;;  %v1390_v11 = vmul.f32 %v6780_v17, %v1361_v5 }
 0x1db   : > { %v1425_v14 = vmax.f32 %v1405_v7, 0.0  ;;  %v1414_v15 = vadd.f32 %v6785_v63, %v1390_v11 }
 0x1dd   : > { %1465 = vst [vmem:[#allocation3 + $0x61] sm:$0xff] %v1425_v14  ;;  %v1434_v28 = vmax.f32 %v1414_v15, 0.0 }
 0x1de   : > { %v1341_v35 = vpop.f32.mrf.mxu0 }
 0x1df   : > { %1474 = vst [vmem:[#allocation3 + $0xc9] sm:$0xff] %v1434_v28  ;;  %v1382_v36 = vmul.f32 %v6780_v17, %v1341_v35 }
 0x1e1   : > { %v1406_v52 = vadd.f32 %v6785_v63, %v1382_v36 }
 0x1e3   : > { %v1426_v41 = vmax.f32 %v1406_v52, 0.0 }
 0x1e5   : > { %1466 = vst [vmem:[#allocation3 + $0x69] sm:$0xff] %v1426_v41 }
 0x1e8   : > { %v1364_v42 = vpop.f32.mrf.mxu3 }
 0x1e9   : > { %v1391_v48 = vmul.f32 %v6780_v17, %v1364_v42 }
 0x1eb   : > { %v1415_v49 = vadd.f32 %v6785_v63, %v1391_v48 }
 0x1ed   : > { %v1435_v0 = vmax.f32 %v1415_v49, 0.0 }
 0x1ef   : > { %1475 = vst [vmem:[#allocation3 + $0xd9] sm:$0xff] %v1435_v0 }
 0x1f0   : > { %v1366_v3 = vpop.f32.mrf.mxu3  ;;  %v1344_v18 = vpop.f32.mrf.mxu0 }
 0x1f1   : > { %v1392_v21 = vmul.f32 %v6780_v17, %v1366_v3  ;;  %v1383_v50 = vmul.f32 %v6780_v17, %v1344_v18 }
 0x1f3   : > { %v1416_v57 = vadd.f32 %v6785_v63, %v1392_v21  ;;  %v1407_v19 = vadd.f32 %v6785_v63, %v1383_v50 }
 0x1f5   : > { %v1436_v59 = vmax.f32 %v1416_v57, 0.0  ;;  %v1427_v10 = vmax.f32 %v1407_v19, 0.0 }
 0x1f7   : > { %1476 = vst [vmem:[#allocation3 + $0xe1] sm:$0xff] %v1436_v59 }
 0x1f8   : > { %1467 = vst [vmem:[#allocation3 + $0x79] sm:$0xff] %v1427_v10  ;;  %v1346_v20 = vpop.f32.mrf.mxu0 }
 0x1f9   : > { %v1384_v2 = vmul.f32 %v6780_v17, %v1346_v20 }
 0x1fb   : > { %v1408_v12 = vadd.f32 %v6785_v63, %v1384_v2  ;;  %1480 = sbr.rel (%p4861_p10) target bundleno = 516 (0x204), region = 56 }
 0x1fd   : > { %v1428_v37 = vmax.f32 %v1408_v12, 0.0 }
 0x1ff   : > { %1468 = vst [vmem:[#allocation3 + $0x81] sm:$0xff] %v1428_v37 }
 0x200   : > { %v5968_v60 = vmov 0.0  }
 0x201   : > { %1481 = vst [vmem:[#allocation3] sm:$0xff] %v5968_v60 }
 0x202   : > { %1482 = vst [vmem:[#allocation3 + $0x8] sm:$0xff] %v5968_v60 }
 0x203   : > { %1483 = vst [vmem:[#allocation3 + $0x10] sm:$0x3] %v5968_v60 }
 0x204 PF: > { %p4862_p11 = scmp.ne.s32.totalorder %s5938_s24, 1 }
 0x206   : > { %1487 = sbr.rel (%p4862_p11) target bundleno = 527 (0x20f), region = 60 }
 0x20b   : > { %v5969_v61 = vmov 0.0  }
 0x20c   : > { %1489 = vst [vmem:[#allocation3 + $0xd8] sm:$0xff] %v5969_v61 }
 0x20d   : > { %1490 = vst [vmem:[#allocation3 + $0xe0] sm:$0xff] %v5969_v61 }
 0x20e   : > { %1491 = vst [vmem:[#allocation3 + $0xe8] sm:$0x3] %v5969_v61 }
 0x20f PF: > { %v5057_v17 = vld [vmem:[#allocation5 + $0xa8] sm:$0xf]  ;;  %v5321_v63 = vld [vmem:[#allocation5 + $0xb0] sm:$0xf0]  ;;  %v5045_v62 = vld [vmem:[#allocation5 + $0x90] sm:$0xf] }
 0x210   : > { %v5058_v6 = vor.u32 %v5321_v63, %v5057_v17  ;;  %v5318_v55 = vld [vmem:[#allocation5 + $0x98] sm:$0xf0]  ;;  %v5033_v1 = vld [vmem:[#allocation5 + $0x78] sm:$0xf]  ;;  %v5315_v22 = vld [vmem:[#allocation5 + $0x80] sm:$0xf0] }
 0x211   : > { %v5046_v39 = vor.u32 %v5318_v55, %v5045_v62  ;;  %v1492_v32 = vld [vmem:[#allocation3] sm:$0xff]  ;;  %v5034_v44 = vor.u32 %v5315_v22, %v5033_v1  ;;  %v5021_v54 = vld [vmem:[#allocation5 + $0x60] sm:$0xf]  ;;  %v5312_v40 = vld [vmem:[#allocation5 + $0x68] sm:$0xf0]  ;;  %vm3474_vm13 = vcmask 1043458  }
 0x212   : > { %5403 = vmatpush.bf16.msra.mxu2 %v5058_v6  ;;  %2895 = vmatpush.bf16.msra.mxu1 %v5058_v6  ;;  %v1540_v9 = vrot.slane %v1492_v32, 2  ;;  %v1493_v56 = vld [vmem:[#allocation3 + $0x8] sm:$0xff]  ;;  %v1541_v16 = vrot.slane %v1492_v32, 4  ;;  %v1542_v26 = vrot.slane %v1492_v32, 6  ;;  %v5022_v27 = vor.u32 %v5312_v40, %v5021_v54  ;;  %v5009_v29 = vld [vmem:[#allocation5 + $0x48] sm:$0xf] }
 0x213   : > { %1588 = vst [vmem:[#allocation1] ss:$4 sm:$0xff] %v1492_v32  ;;  %v5309_v30 = vld [vmem:[#allocation5 + $0x50] sm:$0xf0]  ;;  %v1543_v33 = vrot.slane %v1493_v56, 2  ;;  %v1544_v34 = vrot.slane %v1493_v56, 4 }
 0x214   : > { %1590 = vst [vmem:[#allocation1 + $0x1] ss:$4 sm:$0xff] %v1540_v9  ;;  %v1545_v38 = vrot.slane %v1493_v56, 6  ;;  %v5010_v24 = vor.u32 %v5309_v30, %v5009_v29  ;;  %v4997_v31 = vld [vmem:[#allocation5 + $0x30] sm:$0xf]  ;;  %v6832_v45 = vld [vmem:[#allocation3 + $0x20] sm:$0xff] }
 0x215   : > { %1592 = vst [vmem:[#allocation1 + $0x2] ss:$4 sm:$0xff] %v1541_v16  ;;  %v5306_v25 = vld [vmem:[#allocation5 + $0x38] sm:$0xf0]  ;;  %v6829_v13 = vld [vmem:[#allocation3 + $0x18] sm:$0xff]  ;;  %v1549_v11 = vrot.slane %v6832_v45, 2 }
 0x216   : > { %5404 = vmatpush.bf16.msra.mxu2 %v5046_v39  ;;  %2896 = vmatpush.bf16.msra.mxu1 %v5046_v39  ;;  %1594 = vst [vmem:[#allocation1 + $0x3] ss:$4 sm:$0xff] %v1542_v26  ;;  %v4998_v58 = vor.u32 %v5306_v25, %v4997_v31  ;;  %v1494_v43 = vld [vmem:[#allocation3 + $0x10] sm:$0x3]  ;;  %v4985_v47 = vld [vmem:[#allocation5 + $0x18] sm:$0xf] }
 0x217   : > { %1596 = vst [vmem:[#allocation1 + $0x20] ss:$4 sm:$0xff] %v1493_v56  ;;  %v5303_v46 = vld [vmem:[#allocation5 + $0x20] sm:$0xf0]  ;;  %v1546_v23 = vrot.slane %v6829_v13, 2  ;;  %v1547_v53 = vrot.slane %v6829_v13, 4 }
 0x218   : > { %1598 = vst [vmem:[#allocation1 + $0x21] ss:$4 sm:$0xff] %v1543_v33  ;;  %v1548_v51 = vrot.slane %v6829_v13, 6  ;;  %v4986_v4 = vor.u32 %v5303_v46, %v4985_v47  ;;  %v4973_v5 = vld [vmem:[#allocation5] sm:$0xf]  ;;  %v1550_v14 = vrot.slane %v6832_v45, 4 }
 0x219   : > { %1600 = vst [vmem:[#allocation1 + $0x22] ss:$4 sm:$0xff] %v1544_v34  ;;  %v5300_v7 = vld [vmem:[#allocation5 + $0x8] sm:$0xf0]  ;;  %v1551_v36 = vrot.slane %v6832_v45, 6  ;;  %v6860_v48 = vld [vmem:[#allocation3 + $0x38] sm:$0xff] }
 0x21a   : > { %5405 = vmatpush.bf16.msra.mxu2 %v5034_v44  ;;  %2897 = vmatpush.bf16.msra.mxu1 %v5034_v44  ;;  %1602 = vst [vmem:[#allocation1 + $0x23] ss:$4 sm:$0xff] %v1545_v38  ;;  %v4974_v28 = vor.u32 %v5300_v7, %v4973_v5  ;;  %v6852_v35 = vld [vmem:[#allocation3 + $0x30] sm:$0xff]  ;;  %v1497_v52 = vld [vmem:[#allocation3 + $0x28] sm:$0x3]  ;;  %v1555_v3 = vrot.slane %v6860_v48, 2 }
 0x21b   : > { %v1552_v41 = vrot.slane %v6852_v35, 2  ;;  %v1553_v49 = vrot.slane %v6852_v35, 4  ;;  %v1554_v0 = vrot.slane %v6852_v35, 6  ;;  %v1556_v21 = vrot.slane %v6860_v48, 4  ;;  %v6880_v50 = vld [vmem:[#allocation3 + $0x48] sm:$0xff]  ;;  %v6895_v37 = vld [vmem:[#allocation3 + $0x50] sm:$0xff] }
 0x21c   : > { %v1557_v57 = vrot.slane %v6860_v48, 6  ;;  %v1500_v19 = vld [vmem:[#allocation3 + $0x40] sm:$0x3]  ;;  %v1558_v10 = vrot.slane %v6880_v50, 2  ;;  %v1559_v20 = vrot.slane %v6880_v50, 4  ;;  %v1560_v2 = vrot.slane %v6880_v50, 6 }
 0x21d   : > { %v6835_v8 = vld.sshfl [vmem:[#allocation1] sm:$0xff pattern:$0x73625140]  ;;  %v1561_v60 = vrot.slane %v6895_v37, 2  ;;  %v1562_v61 = vrot.slane %v6895_v37, 4  ;;  %v6906_v17 = vld [vmem:[#allocation3 + $0x60] sm:$0xff] }
 0x21e   : > { %5406 = vmatpush.bf16.msra.mxu2 %v5022_v27  ;;  %2898 = vmatpush.bf16.msra.mxu1 %v5022_v27  ;;  %1605 = vst [vmem:[#allocation1] ss:$4 sm:$0xff] %v1494_v43  ;;  %v1563_v63 = vrot.slane %v6895_v37, 6  ;;  %v1503_v6 = vld [vmem:[#allocation3 + $0x58] sm:$0x3]  ;;  %v1564_v55 = vrot.slane %v6906_v17, 2  ;;  %v1703_v5 = vpack.c.bf16 %v6835_v8, %v6835_v8 }
 0x21f   : > { %1606 = vst [vmem:[#allocation1 + $0x1] ss:$4 sm:$0xff] %v6829_v13  ;;  %v1565_v39 = vrot.slane %v6906_v17, 4  ;;  %v1566_v1 = vrot.slane %v6906_v17, 6  ;;  %v6923_v32 = vld [vmem:[#allocation3 + $0x68] sm:$0xff]  ;;  %v6933_v40 = vld [vmem:[#allocation3 + $0x78] sm:$0xff] }
 0x220   : > { %1607 = vst [vmem:[#allocation1 + $0x2] ss:$4 sm:$0xff] %v1546_v23  ;;  %v1567_v44 = vrot.slane %v6923_v32, 2  ;;  %v1568_v54 = vrot.slane %v6923_v32, 4  ;;  %v8504_v9 = vrot.slane %v6923_v32, 6  ;;  %v8503_v26 = vrot.slane %v6933_v40, 2 }
 0x221   : > { %v6843_v15 = vld.sshfl [vmem:[#allocation1 + $0x20] sm:$0xff pattern:$0x73625140]  ;;  %1608 = vst [vmem:[#allocation1 + $0x3] ss:$4 sm:$0xff] %v1547_v53  ;;  %v8502_v27 = vrot.slane %v6933_v40, 4 }
 0x222   : > { %5407 = vmatpush.bf16.msra.mxu2 %v5010_v24  ;;  %2899 = vmatpush.bf16.msra.mxu1 %v5010_v24  ;;  %1609 = vst [vmem:[#allocation1 + $0x20] ss:$4 sm:$0xff] %v1548_v51  ;;  %v1506_v16 = vld [vmem:[#allocation3 + $0x70] sm:$0x3]  ;;  %v6954_v30 = vld [vmem:[#allocation3 + $0x80] sm:$0xff]  ;;  %v8500_v33 = vrot.slane %v6933_v40, 6  ;;  %v1704_v7 = vpack.c.bf16 %v6843_v15, %v6843_v15 }
 0x223   : > { %1610 = vst [vmem:[#allocation1 + $0x21] ss:$4 sm:$0xff] %v6832_v45  ;;  %v8499_v38 = vrot.slane %v6954_v30, 2  ;;  %v8496_v31 = vrot.slane %v6954_v30, 4  ;;  %v8495_v25 = vrot.slane %v6954_v30, 6  ;;  %vm3479_vm14 = vcmask 1045508  }
 0x224   : > { %1611 = vst [vmem:[#allocation1 + $0x22] ss:$4 sm:$0xff] %v1549_v11  ;;  %v1509_v46 = vld [vmem:[#allocation3 + $0x88] sm:$0x3]  ;;  %vm3737_vm15 = vcmask 1040384   ;;  %vm3738_vm0 = vcmask 1042434  }
 0x225   : > { %1612 = vst [vmem:[#allocation1 + $0x23] ss:$4 sm:$0xff] %v1550_v14  ;;  %vm3739_vm2 = vmor %vm3737_vm15, %vm3738_vm0  ;;  %vm3740_vm3 = vcmask 1044484   ;;  %vm3472_vm4 = vcmask 1043456   ;;  %vm3476_vm5 = vcmask 1045506   ;;  %vm3742_vm8 = vcmask 1046534  }
 0x226   : > { %5408 = vmatpush.bf16.msra.mxu2 %v4998_v58  ;;  %2900 = vmatpush.bf16.msra.mxu1 %v4998_v58  ;;  %v6963_v58 = vld [vmem:[#allocation3 + $0x90] sm:$0xff]  ;;  %1721 = vst [vmem:[#allocation4] sm:$0xf] %v1703_v5  ;;  %vm7680_vm7 = vmor %vm3739_vm2, %vm3740_vm3  ;;  %vm4707_vm10 = vcmask 64512  }
 0x227   : > { %1722 = vst [vmem:[#allocation4 + $0xc] sm:$0xf] %v1704_v7  ;;  %v6994_v7 = vld [vmem:[#allocation3 + $0xa8] sm:$0xff]  ;;  %vm7705_vm9 = vmor %vm7680_vm7, %vm3742_vm8 }
 0x228   : > { %v6858_v42 = vld.sshfl [vmem:[#allocation1] sm:$0xff pattern:$0x73625140] }
 0x229   : > { %1615 = vst [vmem:[#allocation1] ss:$4 sm:$0xff] %v1551_v36 }
 0x22a   : > { %5409 = vmatpush.bf16.msra.mxu2 %v4986_v4  ;;  %2901 = vmatpush.bf16.msra.mxu1 %v4986_v4  ;;  %1616 = vst [vmem:[#allocation1 + $0x1] ss:$4 sm:$0xff] %v1497_v52  ;;  %v8494_v4 = vrot.slane %v6963_v58, 2  ;;  %v6980_v52 = vld [vmem:[#allocation3 + $0x98] sm:$0xff] }
 0x22b   : > { %1617 = vst [vmem:[#allocation1 + $0x2] ss:$4 sm:$0xff] %v6852_v35 }
 0x22c   : > { %v6868_v18 = vld.sshfl [vmem:[#allocation1 + $0x20] sm:$0xff pattern:$0x73625140]  ;;  %1618 = vst [vmem:[#allocation1 + $0x3] ss:$4 sm:$0xff] %v1552_v41 }
 0x22d   : > { %1619 = vst [vmem:[#allocation1 + $0x20] ss:$4 sm:$0xff] %v1553_v49 }
 0x22e   : > { %5410 = vmatpush.bf16.msra.mxu2 %v4974_v28  ;;  %2902 = vmatpush.bf16.msra.mxu1 %v4974_v28  ;;  %1620 = vst [vmem:[#allocation1 + $0x21] ss:$4 sm:$0xff] %v1554_v0  ;;  %v8492_v28 = vrot.slane %v6963_v58, 4 }
 0x22f   : > { %1621 = vst [vmem:[#allocation1 + $0x22] ss:$4 sm:$0xff] %v6860_v48 }
 0x230   : > { %1622 = vst [vmem:[#allocation1 + $0x23] ss:$4 sm:$0xff] %v1555_v3 }
 0x233   : > { %v6883_v59 = vld.sshfl [vmem:[#allocation1] sm:$0xff pattern:$0x73625140] }
 0x234   : > { %1625 = vst [vmem:[#allocation1] ss:$4 sm:$0xff] %v1556_v21 }
 0x235   : > { %1626 = vst [vmem:[#allocation1 + $0x1] ss:$4 sm:$0xff] %v1557_v57 }
 0x236   : > { %1627 = vst [vmem:[#allocation1 + $0x2] ss:$4 sm:$0xff] %v1500_v19  ;;  %v8493_v19 = vrot.slane %v6963_v58, 6 }
 0x237   : > { %v6892_v12 = vld.sshfl [vmem:[#allocation1 + $0x20] sm:$0xff pattern:$0x73625140]  ;;  %1628 = vst [vmem:[#allocation1 + $0x3] ss:$4 sm:$0xff] %v6880_v50 }
 0x238   : > { %1629 = vst [vmem:[#allocation1 + $0x20] ss:$4 sm:$0xff] %v1558_v10 }
 0x239   : > { %1630 = vst [vmem:[#allocation1 + $0x21] ss:$4 sm:$0xff] %v1559_v20 }
 0x23a   : > { %1631 = vst [vmem:[#allocation1 + $0x22] ss:$4 sm:$0xff] %v1560_v2 }
 0x23b   : > { %1632 = vst [vmem:[#allocation1 + $0x23] ss:$4 sm:$0xff] %v6895_v37 }
 0x23e   : > { %v6909_v62 = vld.sshfl [vmem:[#allocation1] sm:$0xff pattern:$0x73625140] }
 0x23f   : > { %1635 = vst [vmem:[#allocation1] ss:$4 sm:$0xff] %v1561_v60 }
 0x240   : > { %1636 = vst [vmem:[#allocation1 + $0x1] ss:$4 sm:$0xff] %v1562_v61 }
 0x241   : > { %1637 = vst [vmem:[#allocation1 + $0x2] ss:$4 sm:$0xff] %v1563_v63 }
 0x242   : > { %v6920_v22 = vld.sshfl [vmem:[#allocation1 + $0x20] sm:$0xff pattern:$0x73625140]  ;;  %1638 = vst [vmem:[#allocation1 + $0x3] ss:$4 sm:$0xff] %v1503_v6 }
 0x243   : > { %1639 = vst [vmem:[#allocation1 + $0x20] ss:$4 sm:$0xff] %v6906_v17 }
 0x244   : > { %1640 = vst [vmem:[#allocation1 + $0x21] ss:$4 sm:$0xff] %v1564_v55 }
 0x245   : > { %1641 = vst [vmem:[#allocation1 + $0x22] ss:$4 sm:$0xff] %v1565_v39 }
 0x246   : > { %1642 = vst [vmem:[#allocation1 + $0x23] ss:$4 sm:$0xff] %v1566_v1 }
 0x249   : > { %v6936_v56 = vld.sshfl [vmem:[#allocation1] sm:$0xff pattern:$0x73625140] }
 0x24a   : > { %1645 = vst [vmem:[#allocation1] ss:$4 sm:$0xff] %v6923_v32 }
 0x24b   : > { %1646 = vst [vmem:[#allocation1 + $0x1] ss:$4 sm:$0xff] %v1567_v44 }
 0x24c   : > { %1647 = vst [vmem:[#allocation1 + $0x2] ss:$4 sm:$0xff] %v1568_v54 }
 0x24d   : > { %v6945_v29 = vld.sshfl [vmem:[#allocation1 + $0x20] sm:$0xff pattern:$0x73625140]  ;;  %1648 = vst [vmem:[#allocation1 + $0x3] ss:$4 sm:$0xff] %v8504_v9 }
 0x24e   : > { %1649 = vst [vmem:[#allocation1 + $0x20] ss:$4 sm:$0xff] %v1506_v16 }
 0x24f   : > { %1650 = vst [vmem:[#allocation1 + $0x21] ss:$4 sm:$0xff] %v6933_v40 }
 0x250   : > { %1651 = vst [vmem:[#allocation1 + $0x22] ss:$4 sm:$0xff] %v8503_v26 }
 0x251   : > { %1652 = vst [vmem:[#allocation1 + $0x23] ss:$4 sm:$0xff] %v8502_v27  ;;  %v7010_v27 = vld [vmem:[#allocation3 + $0xb0] sm:$0xff] }
 0x254   : > { %v1653_v34 = vld.sshfl [vmem:[#allocation1] sm:$0xff pattern:$0x73625140] }
 0x255   : > { %v1713_v24 = vpack.c.bf16 %v1653_v34, %v1653_v34  ;;  %1655 = vst [vmem:[#allocation1] ss:$4 sm:$0xff] %v8500_v33  ;;  %v8497_v34 = vrot.slane %v6980_v52, 2  ;;  %v5342_v33 = vld [vmem:[#allocation5 + $0x158] sm:$0xf0] }
 0x256   : > { %1656 = vst [vmem:[#allocation1 + $0x1] ss:$4 sm:$0xff] %v6954_v30 }
 0x257   : > { %1731 = vst [vmem:[#allocation4 + $0x78] sm:$0xf] %v1713_v24  ;;  %v8498_v24 = vrot.slane %v6980_v52, 4 }
 0x258   : > { %v1654_v43 = vld.sshfl [vmem:[#allocation1 + $0x20] sm:$0xff pattern:$0x73625140]  ;;  %1657 = vst [vmem:[#allocation1 + $0x2] ss:$4 sm:$0xff] %v8499_v38 }
 0x259   : > { %v1714_v47 = vpack.c.bf16 %v1654_v43, %v1654_v43  ;;  %1658 = vst [vmem:[#allocation1 + $0x3] ss:$4 sm:$0xff] %v8496_v31  ;;  %v5153_v31 = vld [vmem:[#allocation5 + $0x168] sm:$0xf]  ;;  %v5141_v38 = vld [vmem:[#allocation5 + $0x150] sm:$0xf] }
 0x25a   : > { %1659 = vst [vmem:[#allocation1 + $0x20] ss:$4 sm:$0xff] %v8495_v25 }
 0x25b   : > { %1732 = vst [vmem:[#allocation4 + $0x84] sm:$0xf] %v1714_v47  ;;  %v8501_v47 = vrot.slane %v6980_v52, 6 }
 0x25c   : > { %1660 = vst [vmem:[#allocation1 + $0x21] ss:$4 sm:$0xff] %v1509_v46  ;;  %v1512_v46 = vld [vmem:[#allocation3 + $0xa0] sm:$0x3] }
 0x25d   : > { %1661 = vst [vmem:[#allocation1 + $0x22] ss:$4 sm:$0xff] %v6963_v58 }
 0x25e   : > { %1662 = vst [vmem:[#allocation1 + $0x23] ss:$4 sm:$0xff] %v8494_v4  ;;  %v4925_v6 = vld [vmem:[#allocation4 + $0x78] sm:$0xf] }
 0x260   : > { %v1663_v16 = vld.sshfl [vmem:[#allocation1] sm:$0xff pattern:$0x73625140] }
 0x261   : > { %v1715_v8 = vpack.c.bf16 %v1663_v16, %v1663_v16  ;;  %1665 = vst [vmem:[#allocation1] ss:$4 sm:$0xff] %v8492_v28  ;;  %v4865_v28 = vld [vmem:[#allocation4] sm:$0xf] }
 0x262   : > { %v5288_v15 = vld [vmem:[#allocation4 + $0x80] sm:$0xf0]  ;;  %1666 = vst [vmem:[#allocation1 + $0x1] ss:$4 sm:$0xff] %v8493_v19  ;;  %v1705_v19 = vpack.c.bf16 %v6858_v42, %v6858_v42  ;;  %v1582_v42 = vrot.slane %v6994_v7, 2 }
 0x263   : > { %v6989_v43 = vor.u32 %v5288_v15, %v4925_v6  ;;  %1733 = vst [vmem:[#allocation4 + $0x90] sm:$0xf] %v1715_v8  ;;  %v5344_v6 = vld [vmem:[#allocation5 + $0x16c] sm:$0xf]  ;;  %v5273_v8 = vld [vmem:[#allocation4 + $0x8] sm:$0xf0] }
 0x264   : > { %1667 = vst [vmem:[#allocation1 + $0x2] ss:$4 sm:$0xff] %v6980_v52  ;;  %v5155_v15 = vld [vmem:[#allocation5 + $0x174] sm:$0xf0]  ;;  %v7004_v4 = vor.u32 %v5273_v8, %v4865_v28  ;;  %v5142_v28 = vor.u32 %v5342_v33, %v5141_v38  ;;  %v8507_v8 = vrot.slane %v6994_v7, 6  ;;  %v8505_v38 = vrot.slane %v7010_v27, 2 }
 0x265   : > { %2928 = vmatmul.bf16.vlgmr.msra.gmra.mxu2 %v6989_v43  ;;  %v1664_v5 = vld.sshfl [vmem:[#allocation1 + $0x20] sm:$0xff pattern:$0x73625140]  ;;  %1668 = vst [vmem:[#allocation1 + $0x3] ss:$4 sm:$0xff] %v8497_v34  ;;  %v5158_v25 = vor.u32 %v5344_v6, %v5155_v15 }
 0x266   : > { %v1716_v16 = vpack.c.bf16 %v1664_v5, %v1664_v5  ;;  %1669 = vst [vmem:[#allocation1 + $0x20] ss:$4 sm:$0xff] %v8498_v24  ;;  %v5345_v34 = vld [vmem:[#allocation5 + $0x170] sm:$0xf0]  ;;  %v1706_v5 = vpack.c.bf16 %v6868_v18, %v6868_v18  ;;  %2903 = vmatmul.bf16.vlgmr.msra.gmra.mxu1 %v7004_v4 }
 0x267   : > { %1670 = vst [vmem:[#allocation1 + $0x21] ss:$4 sm:$0xff] %v8501_v47  ;;  %v5154_v24 = vor.u32 %v5345_v34, %v5153_v31  ;;  %v5129_v47 = vld [vmem:[#allocation5 + $0x138] sm:$0xf]  ;;  %3111 = vmatpush.bf16.msrb.mxu1 %v5158_v25  ;;  %v5341_v6 = vld [vmem:[#allocation5 + $0x154] sm:$0xf] }
 0x268   : > { %1734 = vst [vmem:[#allocation4 + $0x9c] sm:$0xf] %v1716_v16  ;;  %v5339_v16 = vld [vmem:[#allocation5 + $0x140] sm:$0xf0]  ;;  %v8508_v31 = vrot.slane %v6994_v7, 4 }
 0x269   : > { %1671 = vst [vmem:[#allocation1 + $0x22] ss:$4 sm:$0xff] %v1512_v46  ;;  %2949 = vmatpush.bf16.msrb.mxu2 %v5154_v24  ;;  %v5143_v46 = vld [vmem:[#allocation5 + $0x15c] sm:$0xf0]  ;;  %v5130_v33 = vor.u32 %v5339_v16, %v5129_v47 }
 0x26a   : > { %1672 = vst [vmem:[#allocation1 + $0x23] ss:$4 sm:$0xff] %v6994_v7  ;;  %v4937_v15 = vld [vmem:[#allocation4 + $0x90] sm:$0xf]  ;;  %v5146_v26 = vor.u32 %v5341_v6, %v5143_v46  ;;  %v5117_v25 = vld [vmem:[#allocation5 + $0x120] sm:$0xf] }
 0x26b   : > { %1723 = vst [vmem:[#allocation4 + $0x18] sm:$0xf] %v1705_v19  ;;  %v5336_v19 = vld [vmem:[#allocation5 + $0x128] sm:$0xf0]  ;;  %v8506_v6 = vrot.slane %v7010_v27, 4 }
 0x26c   : > { %v1673_v18 = vld.sshfl [vmem:[#allocation1] sm:$0xff pattern:$0x73625140]  ;;  %1724 = vst [vmem:[#allocation4 + $0x24] sm:$0xf] %v1706_v5  ;;  %3112 = vmatpush.bf16.msrb.mxu1 %v5146_v26  ;;  %v5118_v16 = vor.u32 %v5336_v19, %v5117_v25 }
 0x26d   : > { %v1717_v34 = vpack.c.bf16 %v1673_v18, %v1673_v18  ;;  %1675 = vst [vmem:[#allocation1] ss:$4 sm:$0xff] %v1582_v42  ;;  %2950 = vmatpush.bf16.msrb.mxu2 %v5142_v28  ;;  %v8509_v28 = vrot.slane %v7010_v27, 6  ;;  %v5333_v46 = vld [vmem:[#allocation5 + $0x110] sm:$0xf0] }
 0x26e   : > { %1676 = vst [vmem:[#allocation1 + $0x1] ss:$4 sm:$0xff] %v8508_v31  ;;  %v5338_v25 = vld [vmem:[#allocation5 + $0x13c] sm:$0xf] }
 0x26f   : > { %v5291_v9 = vld [vmem:[#allocation4 + $0x98] sm:$0xf0]  ;;  %1735 = vst [vmem:[#allocation4 + $0xa8] sm:$0xf] %v1717_v34  ;;  %v5105_v34 = vld [vmem:[#allocation5 + $0x108] sm:$0xf] }
 0x270   : > { %v7020_v24 = vor.u32 %v5291_v9, %v4937_v15  ;;  %1677 = vst [vmem:[#allocation1 + $0x2] ss:$4 sm:$0xff] %v8507_v8  ;;  %v1515_v9 = vld [vmem:[#allocation3 + $0xb8] sm:$0x3]  ;;  %v1707_v15 = vpack.c.bf16 %v6883_v59, %v6883_v59  ;;  %v5106_v19 = vor.u32 %v5333_v46, %v5105_v34  ;;  %v5330_v8 = vld [vmem:[#allocation5 + $0xf8] sm:$0xf0] }
 0x271   : > { %v1674_v5 = vld.sshfl [vmem:[#allocation1 + $0x20] sm:$0xff pattern:$0x73625140]  ;;  %1678 = vst [vmem:[#allocation1 + $0x3] ss:$4 sm:$0xff] %v7010_v27  ;;  %2951 = vmatpush.bf16.msrb.mxu2 %v5130_v33 }
 0x272   : > { %v1718_v18 = vpack.c.bf16 %v1674_v5, %v1674_v5  ;;  %v4877_v47 = vld [vmem:[#allocation4 + $0x18] sm:$0xf]  ;;  %1679 = vst [vmem:[#allocation1 + $0x20] ss:$4 sm:$0xff] %v8505_v38  ;;  %v1708_v5 = vpack.c.bf16 %v6892_v12, %v6892_v12 }
 0x273   : > { %v5276_v26 = vld [vmem:[#allocation4 + $0x20] sm:$0xf0]  ;;  %1680 = vst [vmem:[#allocation1 + $0x21] ss:$4 sm:$0xff] %v8506_v6  ;;  %v5093_v6 = vld [vmem:[#allocation5 + $0xf0] sm:$0xf] }
 0x274   : > { %1736 = vst [vmem:[#allocation4 + $0xb4] sm:$0xf] %v1718_v18  ;;  %v7036_v33 = vor.u32 %v5276_v26, %v4877_v47  ;;  %v5131_v18 = vld [vmem:[#allocation5 + $0x144] sm:$0xf0]  ;;  %v5094_v12 = vor.u32 %v5330_v8, %v5093_v6  ;;  %v5335_v47 = vld [vmem:[#allocation5 + $0x124] sm:$0xf] }
 0x275   : > { %2933 = vmatmul.bf16.gmra.mxu2 %v7020_v24  ;;  %1681 = vst [vmem:[#allocation1 + $0x22] ss:$4 sm:$0xff] %v8509_v28  ;;  %v5134_v38 = vor.u32 %v5338_v25, %v5131_v18  ;;  %v5119_v26 = vld [vmem:[#allocation5 + $0x12c] sm:$0xf0]  ;;  %v5081_v28 = vld [vmem:[#allocation5 + $0xd8] sm:$0xf] }
 0x276   : > { %2952 = vmatpush.bf16.msrb.mxu2 %v5118_v16  ;;  %1682 = vst [vmem:[#allocation1 + $0x23] ss:$4 sm:$0xff] %v1515_v9  ;;  %2908 = vmatmul.bf16.gmra.mxu1 %v7036_v33  ;;  %v5327_v16 = vld [vmem:[#allocation5 + $0xe0] sm:$0xf0]  ;;  %v5122_v9 = vor.u32 %v5335_v47, %v5119_v26  ;;  %v4949_v34 = vld [vmem:[#allocation4 + $0xa8] sm:$0xf] }
 0x277   : > { %1725 = vst [vmem:[#allocation4 + $0x30] sm:$0xf] %v1707_v15  ;;  %3113 = vmatpush.bf16.msrb.mxu1 %v5134_v38  ;;  %v5069_v8 = vld [vmem:[#allocation5 + $0xc0] sm:$0xf]  ;;  %v5324_v38 = vld [vmem:[#allocation5 + $0xc8] sm:$0xf0] }
 0x278   : > { %v1683_v31 = vld.sshfl [vmem:[#allocation1] sm:$0xff pattern:$0x73625140]  ;;  %1726 = vst [vmem:[#allocation4 + $0x3c] sm:$0xf] %v1708_v5 }
 0x279   : > { %v1719_v59 = vpack.c.bf16 %v1683_v31, %v1683_v31  ;;  %1836 = vst [vmem:[#allocation1] ss:$4 sm:$0xff] %v6829_v13  ;;  %v5082_v31 = vor.u32 %v5327_v16, %v5081_v28  ;;  %v1709_v13 = vpack.c.bf16 %v6909_v62, %v6909_v62  ;;  %v5059_v28 = vld [vmem:[#allocation5 + $0xb4] sm:$0xf0]  ;;  %v5249_v47 = vld [vmem:[#allocation5 + $0x228] sm:$0xf] }
 0x27a   : > { %2953 = vmatpush.bf16.msrb.mxu2 %v5106_v19  ;;  %1838 = vst [vmem:[#allocation1 + $0x1] ss:$4 sm:$0xff] %v1546_v23  ;;  %v5070_v23 = vor.u32 %v5324_v38, %v5069_v8  ;;  %v1742_v62 = vld [vmem:[#allocation3 + $0x28] sm:$0x3]  ;;  %v5035_v8 = vld [vmem:[#allocation5 + $0x84] sm:$0xf0] }
 0x27b   : > { %1737 = vst [vmem:[#allocation4 + $0xc0] sm:$0xf] %v1719_v59  ;;  %v5294_v46 = vld [vmem:[#allocation4 + $0xb0] sm:$0xf0]  ;;  %3114 = vmatpush.bf16.msrb.mxu1 %v5122_v9  ;;  %v5047_v9 = vld [vmem:[#allocation5 + $0x9c] sm:$0xf0] }
 0x27c   : > { %1840 = vst [vmem:[#allocation1 + $0x2] ss:$4 sm:$0xff] %v1547_v53  ;;  %v7048_v6 = vor.u32 %v5294_v46, %v4949_v34  ;;  %v1710_v53 = vpack.c.bf16 %v6920_v22, %v6920_v22  ;;  %v5317_v22 = vld [vmem:[#allocation5 + $0x94] sm:$0xf]  ;;  %v5237_v34 = vld [vmem:[#allocation5 + $0x210] sm:$0xf] }
 0x27d   : > { %v1684_v25 = vld.sshfl [vmem:[#allocation1 + $0x20] sm:$0xff pattern:$0x73625140]  ;;  %1842 = vst [vmem:[#allocation1 + $0x3] ss:$4 sm:$0xff] %v1548_v51  ;;  %v5050_v46 = vor.u32 %v5317_v22, %v5047_v9 }
 0x27e   : > { %v1720_v15 = vpack.c.bf16 %v1684_v25, %v1684_v25  ;;  %2954 = vmatpush.bf16.msrb.mxu2 %v5094_v12  ;;  %1844 = vst [vmem:[#allocation1 + $0x20] ss:$4 sm:$0xff] %v6832_v45  ;;  %v4889_v5 = vld [vmem:[#allocation4 + $0x30] sm:$0xf]  ;;  %v5320_v51 = vld [vmem:[#allocation5 + $0xac] sm:$0xf] }
 0x27f   : > { %v5279_v19 = vld [vmem:[#allocation4 + $0x38] sm:$0xf0]  ;;  %1846 = vst [vmem:[#allocation1 + $0x21] ss:$4 sm:$0xff] %v1549_v11  ;;  %v5062_v59 = vor.u32 %v5320_v51, %v5059_v28  ;;  %v5332_v11 = vld [vmem:[#allocation5 + $0x10c] sm:$0xf] }
 0x280   : > { %1738 = vst [vmem:[#allocation4 + $0xcc] sm:$0xf] %v1720_v15  ;;  %v7062_v18 = vor.u32 %v5279_v19, %v4889_v5  ;;  %v5107_v12 = vld [vmem:[#allocation5 + $0x114] sm:$0xf0]  ;;  %v5366_v25 = vld [vmem:[#allocation5 + $0x218] sm:$0xf0] }
 0x281   : > { %1848 = vst [vmem:[#allocation1 + $0x22] ss:$4 sm:$0xff] %v1550_v14  ;;  %v5110_v26 = vor.u32 %v5332_v11, %v5107_v12  ;;  %3057 = vmatpush.bf16.msrb.mxu0 %v5062_v59  ;;  %v5314_v15 = vld [vmem:[#allocation5 + $0x7c] sm:$0xf]  ;;  %v5225_v28 = vld [vmem:[#allocation5 + $0x1f8] sm:$0xf] }
 0x282   : > { %2955 = vmatpush.bf16.msrb.mxu2 %v5082_v31  ;;  %1850 = vst [vmem:[#allocation1 + $0x23] ss:$4 sm:$0xff] %v1551_v36  ;;  %v5369_v36 = vld [vmem:[#allocation5 + $0x230] sm:$0xf0]  ;;  %v5238_v31 = vor.u32 %v5366_v25, %v5237_v34  ;;  %v5038_v5 = vor.u32 %v5314_v15, %v5035_v8  ;;  %v5363_v11 = vld [vmem:[#allocation5 + $0x200] sm:$0xf0] }
 0x283   : > { %1727 = vst [vmem:[#allocation4 + $0x48] sm:$0xf] %v1709_v13  ;;  %3115 = vmatpush.bf16.msrb.mxu1 %v5110_v26  ;;  %v5250_v16 = vor.u32 %v5369_v36, %v5249_v47  ;;  %v5329_v12 = vld [vmem:[#allocation5 + $0xf4] sm:$0xf]  ;;  %v5226_v47 = vor.u32 %v5363_v11, %v5225_v28  ;;  %v5311_v26 = vld [vmem:[#allocation5 + $0x64] sm:$0xf] }
 0x284   : > { %v1851_v14 = vld.sshfl [vmem:[#allocation1] sm:$0xff pattern:$0x73625140]  ;;  %1728 = vst [vmem:[#allocation4 + $0x54] sm:$0xf] %v1710_v53 }
 0x285   : > { %2938 = vmatmul.bf16.gmra.mxu2 %v7048_v6  ;;  %v1951_v45 = vpack.c.bf16 %v1851_v14, %v1851_v14  ;;  %3003 = vmatpush.bf16.msrb.mxu3 %v5250_v16  ;;  %1853 = vst [vmem:[#allocation1] ss:$4 sm:$0xff] %v1742_v62  ;;  %v5095_v14 = vld [vmem:[#allocation5 + $0xfc] sm:$0xf0]  ;;  %v5360_v16 = vld [vmem:[#allocation5 + $0x1e8] sm:$0xf0] }
 0x286   : > { %2956 = vmatpush.bf16.msrb.mxu2 %v5070_v23  ;;  %2913 = vmatmul.bf16.gmra.mxu1 %v7062_v18  ;;  %1854 = vst [vmem:[#allocation1 + $0x1] ss:$4 sm:$0xff] %v6852_v35  ;;  %v4961_v23 = vld [vmem:[#allocation4 + $0xc0] sm:$0xf]  ;;  %v1711_v35 = vpack.c.bf16 %v6936_v56, %v6936_v56  ;;  %v5213_v62 = vld [vmem:[#allocation5 + $0x1e0] sm:$0xf] }
 0x287   : > { %1969 = vst [vmem:[#allocation4 + $0x4] sm:$0xf] %v1951_v45  ;;  %3058 = vmatpush.bf16.msrb.mxu0 %v5050_v46  ;;  %v5297_v13 = vld [vmem:[#allocation4 + $0xc8] sm:$0xf0]  ;;  %v5023_v45 = vld [vmem:[#allocation5 + $0x6c] sm:$0xf0]  ;;  %v5214_v22 = vor.u32 %v5360_v16, %v5213_v62 }
 0x288   : > { %1855 = vst [vmem:[#allocation1 + $0x2] ss:$4 sm:$0xff] %v1552_v41  ;;  %v7072_v53 = vor.u32 %v5297_v13, %v4961_v23  ;;  %v5026_v36 = vor.u32 %v5311_v26, %v5023_v45  ;;  %v5308_v56 = vld [vmem:[#allocation5 + $0x4c] sm:$0xf]  ;;  %v5011_v9 = vld [vmem:[#allocation5 + $0x54] sm:$0xf0] }
 0x289   : > { %v1852_v38 = vld.sshfl [vmem:[#allocation1 + $0x20] sm:$0xff pattern:$0x73625140]  ;;  %1856 = vst [vmem:[#allocation1 + $0x3] ss:$4 sm:$0xff] %v1553_v49  ;;  %3004 = vmatpush.bf16.msrb.mxu3 %v5238_v31 }
 0x28a   : > { %v1952_v19 = vpack.c.bf16 %v1852_v38, %v1852_v38  ;;  %1857 = vst [vmem:[#allocation1 + $0x20] ss:$4 sm:$0xff] %v1554_v0  ;;  %v4901_v51 = vld [vmem:[#allocation4 + $0x48] sm:$0xf]  ;;  %v1745_v46 = vld [vmem:[#allocation3 + $0x40] sm:$0x3] }
 0x28b   : > { %3059 = vmatpush.bf16.msrb.mxu0 %v5038_v5  ;;  %1858 = vst [vmem:[#allocation1 + $0x21] ss:$4 sm:$0xff] %v6860_v48  ;;  %v5282_v41 = vld [vmem:[#allocation4 + $0x50] sm:$0xf0]  ;;  %v5201_v15 = vld [vmem:[#allocation5 + $0x1c8] sm:$0xf] }
 0x28c   : > { %1970 = vst [vmem:[#allocation4 + $0x10] sm:$0xf] %v1952_v19  ;;  %v7082_v0 = vor.u32 %v5282_v41, %v4901_v51  ;;  %v5357_v31 = vld [vmem:[#allocation5 + $0x1d0] sm:$0xf0]  ;;  %v4999_v38 = vld [vmem:[#allocation5 + $0x3c] sm:$0xf0] }
 0x28d   : > { %1859 = vst [vmem:[#allocation1 + $0x22] ss:$4 sm:$0xff] %v1555_v3  ;;  %v1712_v3 = vpack.c.bf16 %v6945_v29, %v6945_v29  ;;  %3005 = vmatpush.bf16.msrb.mxu3 %v5226_v47  ;;  %v5014_v29 = vor.u32 %v5308_v56, %v5011_v9  ;;  %v5305_v8 = vld [vmem:[#allocation5 + $0x34] sm:$0xf]  ;;  %v5326_v5 = vld [vmem:[#allocation5 + $0xdc] sm:$0xf]  ;;  %v5202_v51 = vor.u32 %v5357_v31, %v5201_v15 }
 0x28e   : > { %1860 = vst [vmem:[#allocation1 + $0x23] ss:$4 sm:$0xff] %v1556_v21  ;;  %v5098_v21 = vor.u32 %v5329_v12, %v5095_v14  ;;  %v5083_v19 = vld [vmem:[#allocation5 + $0xe4] sm:$0xf0]  ;;  %v5272_v23 = vld [vmem:[#allocation4 + $0x4] sm:$0xf] }
 0x28f   : > { %1729 = vst [vmem:[#allocation4 + $0x60] sm:$0xf] %v1711_v35  ;;  %3060 = vmatpush.bf16.msrb.mxu0 %v5026_v36  ;;  %v5086_v41 = vor.u32 %v5326_v5, %v5083_v19  ;;  %v5189_v28 = vld [vmem:[#allocation5 + $0x1b0] sm:$0xf]  ;;  %v5354_v35 = vld [vmem:[#allocation5 + $0x1b8] sm:$0xf0] }
 0x290   : > { %v1861_v49 = vld.sshfl [vmem:[#allocation1] sm:$0xff pattern:$0x73625140]  ;;  %1730 = vst [vmem:[#allocation4 + $0x6c] sm:$0xf] %v1712_v3  ;;  %3116 = vmatpush.bf16.msrb.mxu1 %v5098_v21  ;;  %v5190_v3 = vor.u32 %v5354_v35, %v5189_v28  ;;  %v8524_v19 = vrot.slane %v6954_v30, 4 }
 0x291   : > { %v1953_v59 = vpack.c.bf16 %v1861_v49, %v1861_v49  ;;  %3006 = vmatpush.bf16.msrb.mxu3 %v5214_v22  ;;  %v5002_v49 = vor.u32 %v5305_v8, %v4999_v38  ;;  %1863 = vst [vmem:[#allocation1] ss:$4 sm:$0xff] %v1557_v57  ;;  %v4987_v11 = vld [vmem:[#allocation5 + $0x24] sm:$0xf0]  ;;  %v5177_v14 = vld [vmem:[#allocation5 + $0x198] sm:$0xf] }
 0x292   : > { %1864 = vst [vmem:[#allocation1 + $0x1] ss:$4 sm:$0xff] %v1745_v46  ;;  %v4975_v21 = vld [vmem:[#allocation5 + $0xc] sm:$0xf0]  ;;  %v5323_v36 = vld [vmem:[#allocation5 + $0xc4] sm:$0xf] }
 0x293   : > { %1971 = vst [vmem:[#allocation4 + $0x1c] sm:$0xf] %v1953_v59  ;;  %v4867_v13 = vld [vmem:[#allocation4 + $0xc] sm:$0xf0]  ;;  %3061 = vmatpush.bf16.msrb.mxu0 %v5014_v29  ;;  %v5302_v59 = vld [vmem:[#allocation5 + $0x1c] sm:$0xf] }
 0x294   : > { %3117 = vmatpush.bf16.msrb.mxu1 %v5086_v41  ;;  %1865 = vst [vmem:[#allocation1 + $0x2] ss:$4 sm:$0xff] %v6880_v50  ;;  %v7090_v12 = vor.u32 %v5272_v23, %v4867_v13  ;;  %v4990_v47 = vor.u32 %v5302_v59, %v4987_v11  ;;  %v5071_v50 = vld [vmem:[#allocation5 + $0xcc] sm:$0xf0]  ;;  %v5348_v16 = vld [vmem:[#allocation5 + $0x188] sm:$0xf0] }
 0x295   : > { %2943 = vmatmul.bf16.gmra.mxu2 %v7072_v53  ;;  %v1862_v34 = vld.sshfl [vmem:[#allocation1 + $0x20] sm:$0xff pattern:$0x73625140]  ;;  %3007 = vmatpush.bf16.msrb.mxu3 %v5202_v51  ;;  %1866 = vst [vmem:[#allocation1 + $0x3] ss:$4 sm:$0xff] %v1558_v10  ;;  %v5074_v56 = vor.u32 %v5323_v36, %v5071_v50  ;;  %v8523_v38 = vrot.slane %v6954_v30, 2 }
 0x296   : > { %2918 = vmatmul.bf16.gmra.mxu1 %v7082_v0  ;;  %v1954_v25 = vpack.c.bf16 %v1862_v34, %v1862_v34  ;;  %1867 = vst [vmem:[#allocation1 + $0x20] ss:$4 sm:$0xff] %v1559_v20  ;;  %v4913_v48 = vld [vmem:[#allocation4 + $0x60] sm:$0xf]  ;;  %v5351_v10 = vld [vmem:[#allocation5 + $0x1a0] sm:$0xf0] }
 0x297   : > { %3062 = vmatpush.bf16.msrb.mxu0 %v5002_v49  ;;  %v5285_v57 = vld [vmem:[#allocation4 + $0x68] sm:$0xf0]  ;;  %1868 = vst [vmem:[#allocation1 + $0x21] ss:$4 sm:$0xff] %v1560_v2  ;;  %v5178_v45 = vor.u32 %v5351_v10, %v5177_v14  ;;  %v5299_v20 = vld [vmem:[#allocation5 + $0x4] sm:$0xf] }
 0x298   : > { %1972 = vst [vmem:[#allocation4 + $0x28] sm:$0xf] %v1954_v25  ;;  %v7102_v26 = vor.u32 %v5285_v57, %v4913_v48  ;;  %v4978_v62 = vor.u32 %v5299_v20, %v4975_v21  ;;  %v5165_v2 = vld [vmem:[#allocation5 + $0x180] sm:$0xf]  ;;  %3118 = vmatpush.bf16.msrb.mxu1 %v5074_v56  ;;  %v8525_v23 = vrot.slane %v6954_v30, 6  ;;  %v8526_v13 = vrot.slane %v6963_v58, 2 }
 0x299   : > { %1869 = vst [vmem:[#allocation1 + $0x22] ss:$4 sm:$0xff] %v6895_v37  ;;  %3008 = vmatpush.bf16.msrb.mxu3 %v5190_v3  ;;  %v5166_v34 = vor.u32 %v5348_v16, %v5165_v2  ;;  %v1754_v5 = vld [vmem:[#allocation3 + $0x88] sm:$0x3]  ;;  %v8527_v51 = vrot.slane %v6963_v58, 4  ;;  %v8529_v49 = vrot.slane %v6980_v52, 2 }
 0x29a   : > { %1870 = vst [vmem:[#allocation1 + $0x23] ss:$4 sm:$0xff] %v1561_v60  ;;  %v1748_v60 = vld [vmem:[#allocation3 + $0x58] sm:$0x3]  ;;  %v5275_v25 = vld [vmem:[#allocation4 + $0x1c] sm:$0xf] }
 0x29b   : > { %3063 = vmatpush.bf16.msrb.mxu0 %v4990_v47  ;;  %v1757_v28 = vld [vmem:[#allocation3 + $0xa0] sm:$0x3]  ;;  %v8530_v35 = vrot.slane %v6980_v52, 4  ;;  %v8531_v11 = vrot.slane %v6980_v52, 6  ;;  %v8532_v3 = vrot.slane %v6994_v7, 4  ;;  %v8533_v47 = vrot.slane %v6994_v7, 6 }
 0x29c   : > { %v1871_v22 = vld.sshfl [vmem:[#allocation1] sm:$0xff pattern:$0x73625140]  ;;  %v8534_v48 = vrot.slane %v7010_v27, 2  ;;  %v7189_v14 = vld [vmem:[#allocation3 + $0xc0] sm:$0xff]  ;;  %v8536_v10 = vrot.slane %v7010_v27, 6 }
 0x29d   : > { %v1955_v9 = vpack.c.bf16 %v1871_v22, %v1871_v22  ;;  %3009 = vmatpush.bf16.msrb.mxu3 %v5178_v45  ;;  %1873 = vst [vmem:[#allocation1] ss:$4 sm:$0xff] %v1562_v61  ;;  %v1831_v45 = vrot.slane %v7189_v14, 4  ;;  %v7199_v20 = vld [vmem:[#allocation3 + $0xc8] sm:$0xff]  ;;  %v1832_v21 = vrot.slane %v7189_v14, 6  ;;  %v1988_v2 = vld [vmem:[#allocation3 + $0x30] sm:$0xff] }
 0x29e   : > { %1874 = vst [vmem:[#allocation1 + $0x1] ss:$4 sm:$0xff] %v1563_v63  ;;  %v1751_v63 = vld [vmem:[#allocation3 + $0x70] sm:$0x3]  ;;  %v1835_v50 = vrot.slane %v7199_v20, 6 }
 0x29f   : > { %3064 = vmatpush.bf16.msrb.mxu0 %v4978_v62  ;;  %1973 = vst [vmem:[#allocation4 + $0x34] sm:$0xf] %v1955_v9  ;;  %v4879_v15 = vld [vmem:[#allocation4 + $0x24] sm:$0xf0]  ;;  %v1834_v62 = vrot.slane %v7199_v20, 4  ;;  %v2036_v9 = vrot.slane %v1988_v2, 2 }
 0x2a0   : > { %1875 = vst [vmem:[#allocation1 + $0x2] ss:$4 sm:$0xff] %v1748_v60  ;;  %v7113_v61 = vor.u32 %v5275_v25, %v4879_v15  ;;  %v1763_v22 = vld [vmem:[#allocation3 + $0xd0] sm:$0x3]  ;;  %v1989_v25 = vld [vmem:[#allocation3 + $0x38] sm:$0xff] }
 0x2a1   : > { %v1872_v29 = vld.sshfl [vmem:[#allocation1 + $0x20] sm:$0xff pattern:$0x73625140]  ;;  %3010 = vmatpush.bf16.msrb.mxu3 %v5166_v34  ;;  %1876 = vst [vmem:[#allocation1 + $0x3] ss:$4 sm:$0xff] %v6906_v17  ;;  %v2037_v34 = vrot.slane %v1988_v2, 4 }
 0x2a2   : > { %v1956_v46 = vpack.c.bf16 %v1872_v29, %v1872_v29  ;;  %3065 = vmatmul.bf16.vlgmr.msrb.gmra.mxu0 %v7004_v4  ;;  %1877 = vst [vmem:[#allocation1 + $0x20] ss:$4 sm:$0xff] %v1564_v55  ;;  %v8519_v55 = vrot.slane %v6923_v32, 6  ;;  %v5065_v29 = vld [vmem:[#allocation5 + $0xb0] sm:$0xf] }
 0x2a3   : > { %1878 = vst [vmem:[#allocation1 + $0x21] ss:$4 sm:$0xff] %v1565_v39  ;;  %v8520_v39 = vrot.slane %v6933_v40, 2 }
 0x2a4   : > { %1974 = vst [vmem:[#allocation4 + $0x40] sm:$0xf] %v1956_v46  ;;  %v5322_v46 = vld [vmem:[#allocation5 + $0xb8] sm:$0xf0] }
 0x2a5   : > { %2957 = vmatmul.bf16.vlgmr.msrb.gmra.mxu2 %v7090_v12  ;;  %1879 = vst [vmem:[#allocation1 + $0x22] ss:$4 sm:$0xff] %v1566_v1  ;;  %v8521_v1 = vrot.slane %v6933_v40, 4  ;;  %v5066_v15 = vor.u32 %v5322_v46, %v5065_v29  ;;  %v5239_v29 = vld [vmem:[#allocation5 + $0x21c] sm:$0xf0] }
 0x2a6   : > { %2923 = vmatmul.bf16.gmra.mxu1 %v7102_v26  ;;  %1880 = vst [vmem:[#allocation1 + $0x23] ss:$4 sm:$0xff] %v6923_v32  ;;  %v8522_v32 = vrot.slane %v6933_v40, 6  ;;  %v5149_v46 = vld [vmem:[#allocation5 + $0x158] sm:$0xf] }
 0x2a7   : > { %3219 = vmatpush.bf16.msra.mxu3 %v5066_v15 }
 0x2a8   : > { %v7121_v37 = vld.sshfl [vmem:[#allocation1] sm:$0xff pattern:$0x73625140] }
 0x2a9   : > { %1883 = vst [vmem:[#allocation1] ss:$4 sm:$0xff] %v1567_v44  ;;  %v5278_v44 = vld [vmem:[#allocation4 + $0x34] sm:$0xf]  ;;  %v1957_v56 = vpack.c.bf16 %v7121_v37, %v7121_v37  ;;  %v5161_v37 = vld [vmem:[#allocation5 + $0x170] sm:$0xf] }
 0x2aa   : > { %1884 = vst [vmem:[#allocation1 + $0x1] ss:$4 sm:$0xff] %v1568_v54 }
 0x2ab   : > { %1885 = vst [vmem:[#allocation1 + $0x2] ss:$4 sm:$0xff] %v8519_v55  ;;  %v4891_v54 = vld [vmem:[#allocation4 + $0x3c] sm:$0xf0]  ;;  %v5251_v55 = vld [vmem:[#allocation5 + $0x234] sm:$0xf0] }
 0x2ac   : > { %1886 = vst [vmem:[#allocation1 + $0x3] ss:$4 sm:$0xff] %v1751_v63  ;;  %v7142_v8 = vor.u32 %v5278_v44, %v4891_v54  ;;  %v5368_v63 = vld [vmem:[#allocation5 + $0x22c] sm:$0xf]  ;;  %v2038_v54 = vrot.slane %v1988_v2, 6 }
 0x2ad   : > { %v7130_v17 = vld.sshfl [vmem:[#allocation1 + $0x20] sm:$0xff pattern:$0x73625140]  ;;  %1975 = vst [vmem:[#allocation4 + $0x4c] sm:$0xf] %v1957_v56 }
 0x2ae   : > { %1887 = vst [vmem:[#allocation1 + $0x20] ss:$4 sm:$0xff] %v6933_v40  ;;  %v1958_v60 = vpack.c.bf16 %v7130_v17, %v7130_v17  ;;  %v5257_v17 = vld [vmem:[#allocation5 + $0x230] sm:$0xf]  ;;  %v5053_v56 = vld [vmem:[#allocation5 + $0x98] sm:$0xf] }
 0x2af   : > { %1888 = vst [vmem:[#allocation1 + $0x21] ss:$4 sm:$0xff] %v8520_v39  ;;  %v5254_v39 = vor.u32 %v5368_v63, %v5251_v55 }
 0x2b0   : > { %1889 = vst [vmem:[#allocation1 + $0x22] ss:$4 sm:$0xff] %v8521_v1  ;;  %v5346_v1 = vld [vmem:[#allocation5 + $0x178] sm:$0xf0] }
 0x2b1   : > { %1890 = vst [vmem:[#allocation1 + $0x23] ss:$4 sm:$0xff] %v8522_v32  ;;  %v5162_v32 = vor.u32 %v5346_v1, %v5161_v37  ;;  %3165 = vmatpush.bf16.msra.mxu2 %v5254_v39  ;;  %v5245_v37 = vld [vmem:[#allocation5 + $0x218] sm:$0xf]  ;;  %v5367_v1 = vld [vmem:[#allocation5 + $0x220] sm:$0xf0] }
 0x2b2   : > { %3070 = vmatmul.bf16.gmra.mxu0 %v7036_v33  ;;  %1976 = vst [vmem:[#allocation4 + $0x58] sm:$0xf] %v1958_v60  ;;  %v5365_v60 = vld [vmem:[#allocation5 + $0x214] sm:$0xf] }
 0x2b3   : > { %v7140_v31 = vld.sshfl [vmem:[#allocation1] sm:$0xff pattern:$0x73625140]  ;;  %3273 = vmatpush.bf16.msra.mxu0 %v5162_v32  ;;  %v5246_v32 = vor.u32 %v5367_v1, %v5245_v37  ;;  %v5233_v37 = vld [vmem:[#allocation5 + $0x200] sm:$0xf] }
 0x2b4   : > { %1893 = vst [vmem:[#allocation1] ss:$4 sm:$0xff] %v6954_v30  ;;  %v8528_v30 = vrot.slane %v6963_v58, 6 }
 0x2b5   : > { %2962 = vmatmul.bf16.gmra.mxu2 %v7113_v61  ;;  %1894 = vst [vmem:[#allocation1 + $0x1] ss:$4 sm:$0xff] %v8523_v38  ;;  %v5370_v38 = vld [vmem:[#allocation5 + $0x238] sm:$0xf0] }
 0x2b6   : > { %3119 = vmatmul.bf16.vlgmr.msrb.gmra.mxu1 %v7090_v12  ;;  %1895 = vst [vmem:[#allocation1 + $0x2] ss:$4 sm:$0xff] %v8524_v19  ;;  %v2039_v19 = vrot.slane %v1989_v25, 2 }
 0x2b7   : > { %1896 = vst [vmem:[#allocation1 + $0x3] ss:$4 sm:$0xff] %v8525_v23  ;;  %v2040_v23 = vrot.slane %v1989_v25, 4 }
 0x2b8   : > { %v7152_v40 = vld.sshfl [vmem:[#allocation1 + $0x20] sm:$0xff pattern:$0x73625140] }
 0x2b9   : > { %1897 = vst [vmem:[#allocation1 + $0x20] ss:$4 sm:$0xff] %v1754_v5  ;;  %v5258_v5 = vor.u32 %v5370_v38, %v5257_v17 }
 0x2ba   : > { %1898 = vst [vmem:[#allocation1 + $0x21] ss:$4 sm:$0xff] %v6963_v58 }
 0x2bb   : > { %1899 = vst [vmem:[#allocation1 + $0x22] ss:$4 sm:$0xff] %v8526_v13  ;;  %3327 = vmatpush.bf16.msra.mxu1 %v5258_v5  ;;  %v1994_v5 = vld [vmem:[#allocation3 + $0x60] sm:$0xff] }
 0x2bc   : > { %1900 = vst [vmem:[#allocation1 + $0x23] ss:$4 sm:$0xff] %v8527_v51  ;;  %v2041_v51 = vrot.slane %v1989_v25, 6 }
 0x2be   : > { %v7160_v41 = vld.sshfl [vmem:[#allocation1] sm:$0xff pattern:$0x73625140] }
 0x2bf   : > { %1903 = vst [vmem:[#allocation1] ss:$4 sm:$0xff] %v8528_v30  ;;  %v5281_v30 = vld [vmem:[#allocation4 + $0x4c] sm:$0xf]  ;;  %3328 = vmatpush.bf16.msra.mxu1 %v5246_v32 }
 0x2c0   : > { %1904 = vst [vmem:[#allocation1 + $0x1] ss:$4 sm:$0xff] %v6980_v52  ;;  %v1760_v52 = vld [vmem:[#allocation3 + $0xb8] sm:$0x3] }
 0x2c1   : > { %1905 = vst [vmem:[#allocation1 + $0x2] ss:$4 sm:$0xff] %v8529_v49  ;;  %v4903_v49 = vld [vmem:[#allocation4 + $0x54] sm:$0xf0] }
 0x2c2   : > { %3075 = vmatmul.bf16.gmra.mxu0 %v7062_v18  ;;  %1906 = vst [vmem:[#allocation1 + $0x3] ss:$4 sm:$0xff] %v8530_v35  ;;  %v1991_v35 = vld [vmem:[#allocation3 + $0x48] sm:$0xff] }
 0x2c3   : > { %v7170_v59 = vld.sshfl [vmem:[#allocation1 + $0x20] sm:$0xff pattern:$0x73625140] }
 0x2c4   : > { %1907 = vst [vmem:[#allocation1 + $0x20] ss:$4 sm:$0xff] %v8531_v11  ;;  %v1990_v11 = vld [vmem:[#allocation3 + $0x40] sm:$0x3] }
 0x2c5   : > { %2967 = vmatmul.bf16.gmra.mxu2 %v7142_v8  ;;  %1908 = vst [vmem:[#allocation1 + $0x21] ss:$4 sm:$0xff] %v1757_v28  ;;  %v7231_v28 = vor.u32 %v5281_v30, %v4903_v49  ;;  %v1995_v49 = vld [vmem:[#allocation3 + $0x68] sm:$0xff] }
 0x2c6   : > { %3124 = vmatmul.bf16.gmra.mxu1 %v7113_v61  ;;  %1909 = vst [vmem:[#allocation1 + $0x22] ss:$4 sm:$0xff] %v6994_v7  ;;  %v1830_v7 = vrot.slane %v7189_v14, 2  ;;  %v2053_v1 = vrot.slane %v1995_v49, 6 }
 0x2c7   : > { %1910 = vst [vmem:[#allocation1 + $0x23] ss:$4 sm:$0xff] %v1582_v42  ;;  %v8535_v42 = vrot.slane %v7010_v27, 4 }
 0x2c9   : > { %v7177_v58 = vld.sshfl [vmem:[#allocation1] sm:$0xff pattern:$0x73625140] }
 0x2ca   : > { %1913 = vst [vmem:[#allocation1] ss:$4 sm:$0xff] %v8532_v3  ;;  %v1992_v3 = vld [vmem:[#allocation3 + $0x50] sm:$0xff] }
 0x2cb   : > { %1914 = vst [vmem:[#allocation1 + $0x1] ss:$4 sm:$0xff] %v8533_v47  ;;  %v1959_v47 = vpack.c.bf16 %v7140_v31, %v7140_v31  ;;  %v5242_v31 = vor.u32 %v5365_v60, %v5239_v29  ;;  %v2046_v63 = vrot.slane %v1992_v3, 4  ;;  %v2047_v38 = vrot.slane %v1992_v3, 6  ;;  %v5316_v60 = vld [vmem:[#allocation5 + $0x88] sm:$0xf0] }
 0x2cc   : > { %1915 = vst [vmem:[#allocation1 + $0x2] ss:$4 sm:$0xff] %v7010_v27  ;;  %v1833_v27 = vrot.slane %v7199_v20, 2  ;;  %v5362_v29 = vld [vmem:[#allocation5 + $0x1fc] sm:$0xf] }
 0x2cd   : > { %1916 = vst [vmem:[#allocation1 + $0x3] ss:$4 sm:$0xff] %v8534_v48  ;;  %3166 = vmatpush.bf16.msra.mxu2 %v5242_v31  ;;  %v1961_v31 = vpack.c.bf16 %v7160_v41, %v7160_v41  ;;  %v5364_v41 = vld [vmem:[#allocation5 + $0x208] sm:$0xf0] }
 0x2ce   : > { %v7187_v57 = vld.sshfl [vmem:[#allocation1 + $0x20] sm:$0xff pattern:$0x73625140]  ;;  %1977 = vst [vmem:[#allocation4 + $0x64] sm:$0xf] %v1959_v47  ;;  %v2050_v47 = vrot.slane %v1994_v5, 6  ;;  %v5234_v32 = vor.u32 %v5364_v41, %v5233_v37 }
 0x2cf   : > { %1917 = vst [vmem:[#allocation1 + $0x20] ss:$4 sm:$0xff] %v8535_v42 }
 0x2d0   : > { %1918 = vst [vmem:[#allocation1 + $0x21] ss:$4 sm:$0xff] %v8536_v10  ;;  %v2043_v10 = vrot.slane %v1991_v35, 4  ;;  %3329 = vmatpush.bf16.msra.mxu1 %v5234_v32  ;;  %v1964_v32 = vpack.c.bf16 %v7187_v57, %v7187_v57 }
 0x2d1   : > { %1919 = vst [vmem:[#allocation1 + $0x22] ss:$4 sm:$0xff] %v1760_v52  ;;  %v2042_v52 = vrot.slane %v1991_v35, 2 }
 0x2d2   : > { %3080 = vmatmul.bf16.gmra.mxu0 %v7082_v0  ;;  %1920 = vst [vmem:[#allocation1 + $0x23] ss:$4 sm:$0xff] %v7189_v14 }
 0x2d3   : > { %1979 = vst [vmem:[#allocation4 + $0x7c] sm:$0xf] %v1961_v31 }
 0x2d4   : > { %v7202_v36 = vld.sshfl [vmem:[#allocation1] sm:$0xff pattern:$0x73625140]  ;;  %1982 = vst [vmem:[#allocation4 + $0xa0] sm:$0xf] %v1964_v32 }
 0x2d5   : > { %1923 = vst [vmem:[#allocation1] ss:$4 sm:$0xff] %v1830_v7  ;;  %2972 = vmatmul.bf16.gmra.mxu2 %v7231_v28  ;;  %v5310_v32 = vld [vmem:[#allocation5 + $0x58] sm:$0xf0] }
 0x2d6   : > { %3129 = vmatmul.bf16.gmra.mxu1 %v7142_v8  ;;  %1924 = vst [vmem:[#allocation1 + $0x1] ss:$4 sm:$0xff] %v1831_v45 }
 0x2d7   : > { %1925 = vst [vmem:[#allocation1 + $0x2] ss:$4 sm:$0xff] %v1832_v21 }
 0x2d8   : > { %1926 = vst [vmem:[#allocation1 + $0x3] ss:$4 sm:$0xff] %v7199_v20 }
 0x2d9   : > { %v7214_v16 = vld.sshfl [vmem:[#allocation1 + $0x20] sm:$0xff pattern:$0x73625140] }
 0x2da   : > { %1927 = vst [vmem:[#allocation1 + $0x20] ss:$4 sm:$0xff] %v1833_v27 }
 0x2db   : > { %1928 = vst [vmem:[#allocation1 + $0x21] ss:$4 sm:$0xff] %v1834_v62 }
 0x2dc   : > { %1929 = vst [vmem:[#allocation1 + $0x22] ss:$4 sm:$0xff] %v1835_v50 }
 0x2dd   : > { %1930 = vst [vmem:[#allocation1 + $0x23] ss:$4 sm:$0xff] %v1763_v22  ;;  %v2045_v22 = vrot.slane %v1992_v3, 2 }
 0x2df   : > { %v7226_v44 = vld.sshfl [vmem:[#allocation1] sm:$0xff pattern:$0x73625140] }
 0x2e0   : > { %2084 = vst [vmem:[#allocation1] ss:$4 sm:$0xff] %v1988_v2  ;;  %v2044_v2 = vrot.slane %v1991_v35, 6 }
 0x2e1   : > { %2086 = vst [vmem:[#allocation1 + $0x1] ss:$4 sm:$0xff] %v2036_v9  ;;  %v5319_v9 = vld [vmem:[#allocation5 + $0xa0] sm:$0xf0] }
 0x2e2   : > { %3085 = vmatmul.bf16.gmra.mxu0 %v7102_v26  ;;  %2088 = vst [vmem:[#allocation1 + $0x2] ss:$4 sm:$0xff] %v2037_v34  ;;  %v5054_v34 = vor.u32 %v5319_v9, %v5053_v56  ;;  %v5041_v9 = vld [vmem:[#allocation5 + $0x80] sm:$0xf] }
 0x2e3   : > { %2090 = vst [vmem:[#allocation1 + $0x3] ss:$4 sm:$0xff] %v2038_v54  ;;  %v1960_v54 = vpack.c.bf16 %v7152_v40, %v7152_v40 }
 0x2e4   : > { %v7229_v13 = vld.sshfl [vmem:[#allocation1 + $0x20] sm:$0xff pattern:$0x73625140]  ;;  %3220 = vmatpush.bf16.msra.mxu3 %v5054_v34 }
 0x2e5   : > { %2092 = vst [vmem:[#allocation1 + $0x20] ss:$4 sm:$0xff] %v1989_v25  ;;  %v5343_v25 = vld [vmem:[#allocation5 + $0x160] sm:$0xf0] }
 0x2e6   : > { %2094 = vst [vmem:[#allocation1 + $0x21] ss:$4 sm:$0xff] %v2039_v19  ;;  %3134 = vmatmul.bf16.gmra.mxu1 %v7231_v28  ;;  %v5150_v55 = vor.u32 %v5343_v25, %v5149_v46  ;;  %v1993_v19 = vld [vmem:[#allocation3 + $0x58] sm:$0x3]  ;;  %v5042_v46 = vor.u32 %v5316_v60, %v5041_v9  ;;  %v5227_v25 = vld [vmem:[#allocation5 + $0x204] sm:$0xf0] }
 0x2e7   : > { %2096 = vst [vmem:[#allocation1 + $0x22] ss:$4 sm:$0xff] %v2040_v23 }
 0x2e8   : > { %2098 = vst [vmem:[#allocation1 + $0x23] ss:$4 sm:$0xff] %v2041_v51  ;;  %3274 = vmatpush.bf16.msra.mxu0 %v5150_v55  ;;  %v7240_v17 = vpop.f32.mrf.mxu2  ;;  %v5230_v55 = vor.u32 %v5362_v29, %v5227_v25  ;;  %3221 = vmatpush.bf16.msra.mxu3 %v5042_v46 }
 0x2e9   : > { %1978 = vst [vmem:[#allocation4 + $0x70] sm:$0xf] %v1960_v54 }
 0x2ea   : > { %v2099_v48 = vld.sshfl [vmem:[#allocation1] sm:$0xff pattern:$0x73625140]  ;;  %3167 = vmatpush.bf16.msra.mxu2 %v5230_v55  ;;  %v5359_v55 = vld [vmem:[#allocation5 + $0x1e4] sm:$0xf] }
 0x2eb   : > { %v2199_v42 = vpack.c.bf16 %v2099_v48, %v2099_v48  ;;  %2101 = vst [vmem:[#allocation1] ss:$4 sm:$0xff] %v1990_v11  ;;  %v2049_v11 = vrot.slane %v1994_v5, 4 }
 0x2ec   : > { %2102 = vst [vmem:[#allocation1 + $0x1] ss:$4 sm:$0xff] %v1991_v35  ;;  %v2048_v35 = vrot.slane %v1994_v5, 2 }
 0x2ed   : > { %2217 = vst [vmem:[#allocation4 + $0x8] sm:$0xf] %v2199_v42 }
 0x2ee   : > { %2103 = vst [vmem:[#allocation1 + $0x2] ss:$4 sm:$0xff] %v2042_v52  ;;  %v2051_v52 = vrot.slane %v1995_v49, 2 }
 0x2ef   : > { %v2100_v15 = vld.sshfl [vmem:[#allocation1 + $0x20] sm:$0xff pattern:$0x73625140]  ;;  %2104 = vst [vmem:[#allocation1 + $0x3] ss:$4 sm:$0xff] %v2043_v10  ;;  %v2052_v10 = vrot.slane %v1995_v49, 4 }
 0x2f0   : > { %v2200_v39 = vpack.c.bf16 %v2100_v15, %v2100_v15  ;;  %2105 = vst [vmem:[#allocation1 + $0x20] ss:$4 sm:$0xff] %v2044_v2  ;;  %v7245_v56 = vpop.f32.mrf.mxu2  ;;  %v1962_v15 = vpack.c.bf16 %v7170_v59, %v7170_v59  ;;  %v1997_v59 = vld [vmem:[#allocation3 + $0x78] sm:$0xff] }
 0x2f1   : > { %2106 = vst [vmem:[#allocation1 + $0x21] ss:$4 sm:$0xff] %v1992_v3  ;;  %v5284_v3 = vld [vmem:[#allocation4 + $0x64] sm:$0xf] }
 0x2f2   : > { %3090 = vmatmul.bf16.gmra.mxu0 %v6989_v43  ;;  %2218 = vst [vmem:[#allocation4 + $0x14] sm:$0xf] %v2200_v39  ;;  %v5340_v39 = vld [vmem:[#allocation5 + $0x148] sm:$0xf0] }
 0x2f3   : > { %2107 = vst [vmem:[#allocation1 + $0x22] ss:$4 sm:$0xff] %v2045_v22  ;;  %v4915_v22 = vld [vmem:[#allocation4 + $0x6c] sm:$0xf0] }
 0x2f4   : > { %2108 = vst [vmem:[#allocation1 + $0x23] ss:$4 sm:$0xff] %v2046_v63  ;;  %v4873_v51 = vld [vmem:[#allocation4 + $0x8] sm:$0xf]  ;;  %v7247_v34 = vor.u32 %v5284_v3, %v4915_v22  ;;  %v5137_v63 = vld [vmem:[#allocation5 + $0x140] sm:$0xf]  ;;  %v1963_v22 = vpack.c.bf16 %v7177_v58, %v7177_v58 }
 0x2f5   : > { %v5138_v54 = vor.u32 %v5340_v39, %v5137_v63  ;;  %1980 = vst [vmem:[#allocation4 + $0x88] sm:$0xf] %v1962_v15  ;;  %v5029_v15 = vld [vmem:[#allocation5 + $0x68] sm:$0xf]  ;;  %v5313_v63 = vld [vmem:[#allocation5 + $0x70] sm:$0xf0] }
 0x2f6   : > { %v2109_v23 = vld.sshfl [vmem:[#allocation1] sm:$0xff pattern:$0x73625140]  ;;  %2977 = vmatmul.bf16.gmra.mxu2 %v7247_v34  ;;  %3139 = vmatmul.bf16.gmra.mxu1 %v7247_v34  ;;  %1981 = vst [vmem:[#allocation4 + $0x94] sm:$0xf] %v1963_v22 }
 0x2f7   : > { %v2201_v30 = vpack.c.bf16 %v2109_v23, %v2109_v23  ;;  %2111 = vst [vmem:[#allocation1] ss:$4 sm:$0xff] %v2047_v38  ;;  %3275 = vmatpush.bf16.msra.mxu0 %v5138_v54  ;;  %v1996_v23 = vld [vmem:[#allocation3 + $0x70] sm:$0x3]  ;;  %v5215_v39 = vld [vmem:[#allocation5 + $0x1ec] sm:$0xf0] }
 0x2f8   : > { %2112 = vst [vmem:[#allocation1 + $0x1] ss:$4 sm:$0xff] %v1993_v19  ;;  %v5218_v58 = vor.u32 %v5359_v55, %v5215_v39  ;;  %v2000_v54 = vld [vmem:[#allocation3 + $0x90] sm:$0xff] }
 0x2f9   : > { %v5274_v40 = vld [vmem:[#allocation4 + $0x10] sm:$0xf0]  ;;  %2219 = vst [vmem:[#allocation4 + $0x20] sm:$0xf] %v2201_v30  ;;  %v2054_v30 = vrot.slane %v1997_v59, 2  ;;  %v2060_v57 = vrot.slane %v2000_v54, 2 }
 0x2fa   : > { %v7242_v48 = vor.u32 %v5274_v40, %v4873_v51  ;;  %2113 = vst [vmem:[#allocation1 + $0x2] ss:$4 sm:$0xff] %v1994_v5  ;;  %v7256_v5 = vpop.f32.mrf.mxu1  ;;  %v7258_v51 = vpop.f32.mrf.mxu2  ;;  %3168 = vmatpush.bf16.msra.mxu2 %v5218_v58  ;;  %v4939_v55 = vld [vmem:[#allocation4 + $0x9c] sm:$0xf0] }
 0x2fb   : > { %v2110_v42 = vld.sshfl [vmem:[#allocation1 + $0x20] sm:$0xff pattern:$0x73625140]  ;;  %2114 = vst [vmem:[#allocation1 + $0x3] ss:$4 sm:$0xff] %v2048_v35 }
 0x2fc   : > { %3011 = vmatmul.bf16.vlgmr.msrb.gmra.mxu3 %v7242_v48  ;;  %v2202_v2 = vpack.c.bf16 %v2110_v42, %v2110_v42  ;;  %2115 = vst [vmem:[#allocation1 + $0x20] ss:$4 sm:$0xff] %v2049_v11  ;;  %v5287_v42 = vld [vmem:[#allocation4 + $0x7c] sm:$0xf] }
 0x2fd   : > { %2116 = vst [vmem:[#allocation1 + $0x21] ss:$4 sm:$0xff] %v2050_v47  ;;  %v2056_v47 = vrot.slane %v1997_v59, 6 }
 0x2fe   : > { %2220 = vst [vmem:[#allocation4 + $0x2c] sm:$0xf] %v2202_v2  ;;  %v1998_v2 = vld [vmem:[#allocation3 + $0x80] sm:$0xff] }
 0x2ff   : > { %2117 = vst [vmem:[#allocation1 + $0x22] ss:$4 sm:$0xff] %v1995_v49  ;;  %v2055_v49 = vrot.slane %v1997_v59, 4  ;;  %v2057_v60 = vrot.slane %v1998_v2, 2  ;;  %v2058_v29 = vrot.slane %v1998_v2, 4  ;;  %v2059_v31 = vrot.slane %v1998_v2, 6 }
 0x300   : > { %2118 = vst [vmem:[#allocation1 + $0x23] ss:$4 sm:$0xff] %v2051_v52  ;;  %v4885_v35 = vld [vmem:[#allocation4 + $0x20] sm:$0xf] }
 0x302   : > { %3095 = vmatmul.bf16.gmra.mxu0 %v7020_v24  ;;  %v2119_v38 = vld.sshfl [vmem:[#allocation1] sm:$0xff pattern:$0x73625140]  ;;  %v7267_v46 = vpop.f32.mrf.mxu1  ;;  %v7269_v25 = vpop.f32.mrf.mxu2 }
 0x303   : > { %v2203_v19 = vpack.c.bf16 %v2119_v38, %v2119_v38  ;;  %2121 = vst [vmem:[#allocation1] ss:$4 sm:$0xff] %v2052_v10  ;;  %v4927_v10 = vld [vmem:[#allocation4 + $0x84] sm:$0xf0]  ;;  %v5337_v38 = vld [vmem:[#allocation5 + $0x130] sm:$0xf0] }
 0x304   : > { %2122 = vst [vmem:[#allocation1 + $0x1] ss:$4 sm:$0xff] %v2053_v1  ;;  %v7264_v9 = vor.u32 %v5287_v42, %v4927_v10  ;;  %v5030_v1 = vor.u32 %v5313_v63, %v5029_v15  ;;  %v2061_v42 = vrot.slane %v2000_v54, 4  ;;  %v2062_v10 = vrot.slane %v2000_v54, 6  ;;  %v2001_v63 = vld [vmem:[#allocation3 + $0x98] sm:$0xff] }
 0x305   : > { %v5277_v11 = vld [vmem:[#allocation4 + $0x28] sm:$0xf0]  ;;  %2221 = vst [vmem:[#allocation4 + $0x38] sm:$0xf] %v2203_v19  ;;  %v1966_v15 = vpack.c.bf16 %v7214_v16, %v7214_v16 }
 0x306   : > { %2123 = vst [vmem:[#allocation1 + $0x2] ss:$4 sm:$0xff] %v1996_v23  ;;  %v7260_v3 = vor.u32 %v5277_v11, %v4885_v35  ;;  %2982 = vmatmul.bf16.gmra.mxu2 %v7264_v9  ;;  %3144 = vmatmul.bf16.gmra.mxu1 %v7264_v9  ;;  %v5221_v23 = vld [vmem:[#allocation5 + $0x1e8] sm:$0xf]  ;;  %v1999_v35 = vld [vmem:[#allocation3 + $0x88] sm:$0x3] }
 0x307   : > { %v2120_v40 = vld.sshfl [vmem:[#allocation1 + $0x20] sm:$0xff pattern:$0x73625140]  ;;  %2124 = vst [vmem:[#allocation1 + $0x3] ss:$4 sm:$0xff] %v1997_v59  ;;  %3222 = vmatpush.bf16.msra.mxu3 %v5030_v1  ;;  %v2063_v1 = vrot.slane %v2001_v63, 2 }
 0x308   : > { %v2204_v52 = vpack.c.bf16 %v2120_v40, %v2120_v40  ;;  %2125 = vst [vmem:[#allocation1 + $0x20] ss:$4 sm:$0xff] %v2054_v30  ;;  %v5125_v59 = vld [vmem:[#allocation5 + $0x128] sm:$0xf]  ;;  %v5361_v30 = vld [vmem:[#allocation5 + $0x1f0] sm:$0xf0] }
 0x309   : > { %2126 = vst [vmem:[#allocation1 + $0x21] ss:$4 sm:$0xff] %v2055_v49  ;;  %v5126_v19 = vor.u32 %v5337_v38, %v5125_v59  ;;  %v5222_v49 = vor.u32 %v5361_v30, %v5221_v23  ;;  %v5356_v59 = vld [vmem:[#allocation5 + $0x1cc] sm:$0xf]  ;;  %v5203_v38 = vld [vmem:[#allocation5 + $0x1d4] sm:$0xf0] }
 0x30a   : > { %2222 = vst [vmem:[#allocation4 + $0x44] sm:$0xf] %v2204_v52  ;;  %v7278_v52 = vpop.f32.mrf.mxu2  ;;  %v2064_v23 = vrot.slane %v2001_v63, 4  ;;  %v5206_v30 = vor.u32 %v5356_v59, %v5203_v38 }
 0x30b   : > { %2127 = vst [vmem:[#allocation1 + $0x22] ss:$4 sm:$0xff] %v2056_v47  ;;  %3276 = vmatpush.bf16.msra.mxu0 %v5126_v19  ;;  %3330 = vmatpush.bf16.msra.mxu1 %v5222_v49  ;;  %v7276_v47 = vpop.f32.mrf.mxu1  ;;  %v5113_v19 = vld [vmem:[#allocation5 + $0x110] sm:$0xf]  ;;  %v5334_v49 = vld [vmem:[#allocation5 + $0x118] sm:$0xf0] }
 0x30c   : > { %3016 = vmatmul.bf16.gmra.mxu3 %v7260_v3  ;;  %2128 = vst [vmem:[#allocation1 + $0x23] ss:$4 sm:$0xff] %v1998_v2  ;;  %v4897_v2 = vld [vmem:[#allocation4 + $0x38] sm:$0xf]  ;;  %3169 = vmatpush.bf16.msra.mxu2 %v5206_v30  ;;  %v5209_v30 = vld [vmem:[#allocation5 + $0x1d0] sm:$0xf] }
 0x30d   : > { %1984 = vst [vmem:[#allocation4 + $0xb8] sm:$0xf] %v1966_v15 }
 0x30e   : > { %v2129_v37 = vld.sshfl [vmem:[#allocation1] sm:$0xff pattern:$0x73625140] }
 0x30f   : > { %v2205_v41 = vpack.c.bf16 %v2129_v37, %v2129_v37  ;;  %2131 = vst [vmem:[#allocation1] ss:$4 sm:$0xff] %v2057_v60 }
 0x310   : > { %2132 = vst [vmem:[#allocation1 + $0x1] ss:$4 sm:$0xff] %v2058_v29  ;;  %v5290_v29 = vld [vmem:[#allocation4 + $0x94] sm:$0xf] }
 0x311   : > { %2223 = vst [vmem:[#allocation4 + $0x50] sm:$0xf] %v2205_v41  ;;  %v5280_v22 = vld [vmem:[#allocation4 + $0x40] sm:$0xf0]  ;;  %v7286_v39 = vor.u32 %v5290_v29, %v4939_v55 }
 0x312   : > { %3100 = vmatmul.bf16.gmra.mxu0 %v7048_v6  ;;  %2133 = vst [vmem:[#allocation1 + $0x2] ss:$4 sm:$0xff] %v2059_v31  ;;  %v7280_v60 = vor.u32 %v5280_v22, %v4897_v2  ;;  %v1965_v31 = vpack.c.bf16 %v7202_v36, %v7202_v36  ;;  %v7291_v41 = vpop.f32.mrf.mxu2  ;;  %v5017_v36 = vld [vmem:[#allocation5 + $0x50] sm:$0xf] }
 0x313   : > { %v2130_v11 = vld.sshfl [vmem:[#allocation1 + $0x20] sm:$0xff pattern:$0x73625140]  ;;  %2134 = vst [vmem:[#allocation1 + $0x3] ss:$4 sm:$0xff] %v1999_v35  ;;  %v5018_v16 = vor.u32 %v5310_v32, %v5017_v36  ;;  %v2065_v35 = vrot.slane %v2001_v63, 6  ;;  %v1967_v36 = vpack.c.bf16 %v7226_v44, %v7226_v44 }
 0x314   : > { %v2206_v40 = vpack.c.bf16 %v2130_v11, %v2130_v11  ;;  %2135 = vst [vmem:[#allocation1 + $0x20] ss:$4 sm:$0xff] %v2000_v54  ;;  %v7289_v54 = vpop.f32.mrf.mxu1  ;;  %v5114_v11 = vor.u32 %v5334_v49, %v5113_v19  ;;  %v2004_v32 = vld [vmem:[#allocation3 + $0xb0] sm:$0xff]  ;;  %v5358_v49 = vld [vmem:[#allocation5 + $0x1d8] sm:$0xf0] }
 0x315   : > { %2136 = vst [vmem:[#allocation1 + $0x21] ss:$4 sm:$0xff] %v2060_v57  ;;  %3223 = vmatpush.bf16.msra.mxu3 %v5018_v16  ;;  %v2003_v57 = vld [vmem:[#allocation3 + $0xa8] sm:$0xff]  ;;  %v1968_v16 = vpack.c.bf16 %v7229_v13, %v7229_v13  ;;  %v5210_v44 = vor.u32 %v5358_v49, %v5209_v30 }
 0x316   : > { %2224 = vst [vmem:[#allocation4 + $0x5c] sm:$0xf] %v2206_v40  ;;  %2987 = vmatmul.bf16.gmra.mxu2 %v7286_v39  ;;  %3149 = vmatmul.bf16.gmra.mxu1 %v7286_v39  ;;  %v2066_v2 = vrot.slane %v2003_v57, 2  ;;  %v2067_v22 = vrot.slane %v2003_v57, 4  ;;  %v2068_v55 = vrot.slane %v2003_v57, 6 }
 0x317   : > { %2137 = vst [vmem:[#allocation1 + $0x22] ss:$4 sm:$0xff] %v2061_v42  ;;  %3277 = vmatpush.bf16.msra.mxu0 %v5114_v11  ;;  %3331 = vmatpush.bf16.msra.mxu1 %v5210_v44 }
 0x318   : > { %2138 = vst [vmem:[#allocation1 + $0x23] ss:$4 sm:$0xff] %v2062_v10  ;;  %v2002_v10 = vld [vmem:[#allocation3 + $0xa0] sm:$0x3] }
 0x319   : > { %1983 = vst [vmem:[#allocation4 + $0xac] sm:$0xf] %v1965_v31  ;;  %v4909_v15 = vld [vmem:[#allocation4 + $0x50] sm:$0xf] }
 0x31a   : > { %v2139_v37 = vld.sshfl [vmem:[#allocation1] sm:$0xff pattern:$0x73625140]  ;;  %v7298_v31 = vpop.f32.mrf.mxu2  ;;  %1985 = vst [vmem:[#allocation4 + $0xc4] sm:$0xf] %v1967_v36 }
 0x31b   : > { %v2207_v58 = vpack.c.bf16 %v2139_v37, %v2139_v37  ;;  %2141 = vst [vmem:[#allocation1] ss:$4 sm:$0xff] %v2001_v63 }
 0x31c   : > { %3021 = vmatmul.bf16.gmra.mxu3 %v7280_v60  ;;  %2142 = vst [vmem:[#allocation1 + $0x1] ss:$4 sm:$0xff] %v2063_v1  ;;  %v7296_v29 = vpop.f32.mrf.mxu1 }
 0x31d   : > { %2225 = vst [vmem:[#allocation4 + $0x68] sm:$0xf] %v2207_v58  ;;  %v5283_v63 = vld [vmem:[#allocation4 + $0x58] sm:$0xf0]  ;;  %v4951_v58 = vld [vmem:[#allocation4 + $0xb4] sm:$0xf0] }
 0x31e   : > { %2143 = vst [vmem:[#allocation1 + $0x2] ss:$4 sm:$0xff] %v2064_v23  ;;  %v7300_v37 = vor.u32 %v5283_v63, %v4909_v15  ;;  %v2069_v23 = vrot.slane %v2004_v32, 2  ;;  %v5191_v15 = vld [vmem:[#allocation5 + $0x1bc] sm:$0xf0]  ;;  %v2071_v63 = vrot.slane %v2004_v32, 6 }
 0x31f   : > { %v2140_v40 = vld.sshfl [vmem:[#allocation1 + $0x20] sm:$0xff pattern:$0x73625140]  ;;  %2144 = vst [vmem:[#allocation1 + $0x3] ss:$4 sm:$0xff] %v2065_v35 }
 0x320   : > { %v2208_v42 = vpack.c.bf16 %v2140_v40, %v2140_v40  ;;  %2145 = vst [vmem:[#allocation1 + $0x20] ss:$4 sm:$0xff] %v2002_v10  ;;  %v5293_v1 = vld [vmem:[#allocation4 + $0xac] sm:$0xf]  ;;  %v5307_v40 = vld [vmem:[#allocation5 + $0x40] sm:$0xf0] }
 0x321   : > { %2146 = vst [vmem:[#allocation1 + $0x21] ss:$4 sm:$0xff] %v2003_v57  ;;  %v7306_v19 = vor.u32 %v5293_v1, %v4951_v58  ;;  %v5005_v57 = vld [vmem:[#allocation5 + $0x38] sm:$0xf]  ;;  %v5353_v10 = vld [vmem:[#allocation5 + $0x1b4] sm:$0xf] }
 0x322   : > { %3105 = vmatmul.bf16.gmra.mxu0 %v7072_v53  ;;  %2226 = vst [vmem:[#allocation4 + $0x74] sm:$0xf] %v2208_v42  ;;  %v7311_v11 = vpop.f32.mrf.mxu2  ;;  %v5006_v42 = vor.u32 %v5307_v40, %v5005_v57  ;;  %v2005_v1 = vld [vmem:[#allocation3 + $0xb8] sm:$0x3]  ;;  %v5350_v57 = vld [vmem:[#allocation5 + $0x19c] sm:$0xf] }
 0x323   : > { %2147 = vst [vmem:[#allocation1 + $0x22] ss:$4 sm:$0xff] %v2066_v2  ;;  %v2070_v2 = vrot.slane %v2004_v32, 4  ;;  %v5179_v40 = vld [vmem:[#allocation5 + $0x1a4] sm:$0xf0] }
 0x324   : > { %2148 = vst [vmem:[#allocation1 + $0x23] ss:$4 sm:$0xff] %v2067_v22  ;;  %v7309_v35 = vpop.f32.mrf.mxu1  ;;  %3224 = vmatpush.bf16.msra.mxu3 %v5006_v42  ;;  %v5331_v42 = vld [vmem:[#allocation5 + $0x100] sm:$0xf0] }
 0x325   : > { %1986 = vst [vmem:[#allocation4 + $0xd0] sm:$0xf] %v1968_v16 }
 0x326   : > { %v2149_v59 = vld.sshfl [vmem:[#allocation1] sm:$0xff pattern:$0x73625140]  ;;  %2992 = vmatmul.bf16.gmra.mxu2 %v7306_v19  ;;  %3154 = vmatmul.bf16.gmra.mxu1 %v7306_v19 }
 0x327   : > { %v2209_v38 = vpack.c.bf16 %v2149_v59, %v2149_v59  ;;  %2151 = vst [vmem:[#allocation1] ss:$4 sm:$0xff] %v2068_v55  ;;  %v5194_v55 = vor.u32 %v5353_v10, %v5191_v15  ;;  %v4921_v59 = vld [vmem:[#allocation4 + $0x68] sm:$0xf] }
 0x328   : > { %2152 = vst [vmem:[#allocation1 + $0x1] ss:$4 sm:$0xff] %v2004_v32 }
 0x329   : > { %2227 = vst [vmem:[#allocation4 + $0x80] sm:$0xf] %v2209_v38  ;;  %3170 = vmatpush.bf16.msra.mxu2 %v5194_v55  ;;  %v5286_v16 = vld [vmem:[#allocation4 + $0x70] sm:$0xf0]  ;;  %v5355_v55 = vld [vmem:[#allocation5 + $0x1c0] sm:$0xf0] }
 0x32a   : > { %2153 = vst [vmem:[#allocation1 + $0x2] ss:$4 sm:$0xff] %v2069_v23  ;;  %v2958_v36 = vpop.f32.mrf.mxu2  ;;  %v7323_v32 = vor.u32 %v5286_v16, %v4921_v59  ;;  %v5296_v23 = vld [vmem:[#allocation4 + $0xc4] sm:$0xf]  ;;  %v4993_v59 = vld [vmem:[#allocation5 + $0x20] sm:$0xf] }
 0x32b   : > { %v2150_v13 = vld.sshfl [vmem:[#allocation1 + $0x20] sm:$0xff pattern:$0x73625140]  ;;  %2154 = vst [vmem:[#allocation1 + $0x3] ss:$4 sm:$0xff] %v2070_v2  ;;  %v7318_v38 = vadd.f32 %v2958_v36, %v7256_v5  ;;  %v5182_v5 = vor.u32 %v5350_v57, %v5179_v40 }
 0x32c   : > { %3026 = vmatmul.bf16.gmra.mxu3 %v7300_v37  ;;  %v2210_v22 = vpack.c.bf16 %v2150_v13, %v2150_v13  ;;  %2155 = vst [vmem:[#allocation1 + $0x20] ss:$4 sm:$0xff] %v2071_v63  ;;  %v7315_v58 = vpop.f32.mrf.mxu1  ;;  %v4963_v30 = vld [vmem:[#allocation4 + $0xcc] sm:$0xf0]  ;;  %v5167_v36 = vld [vmem:[#allocation5 + $0x18c] sm:$0xf0] }
 0x32d   : > { %2156 = vst [vmem:[#allocation1 + $0x21] ss:$4 sm:$0xff] %v2005_v1  ;;  %v7327_v13 = vor.u32 %v5296_v23, %v4963_v30  ;;  %3171 = vmatpush.bf16.msra.mxu2 %v5182_v5  ;;  %v5347_v1 = vld [vmem:[#allocation5 + $0x184] sm:$0xf]  ;;  %v5304_v16 = vld [vmem:[#allocation5 + $0x28] sm:$0xf0] }
 0x32e   : > { %2228 = vst [vmem:[#allocation4 + $0x8c] sm:$0xf] %v2210_v22  ;;  %v4994_v23 = vor.u32 %v5304_v16, %v4993_v59  ;;  %v2008_v30 = vld [vmem:[#allocation3 + $0xd0] sm:$0x3]  ;;  %v5185_v16 = vld [vmem:[#allocation5 + $0x1a0] sm:$0xf] }
 0x32f   : > { %2157 = vst [vmem:[#allocation1 + $0x22] ss:$4 sm:$0xff] %v7189_v14 }
 0x330   : > { %2158 = vst [vmem:[#allocation1 + $0x23] ss:$4 sm:$0xff] %v1830_v7  ;;  %v5101_v7 = vld [vmem:[#allocation5 + $0xf8] sm:$0xf]  ;;  %3225 = vmatpush.bf16.msra.mxu3 %v4994_v23  ;;  %v4933_v40 = vld [vmem:[#allocation4 + $0x80] sm:$0xf] }
 0x331   : > { %v5102_v15 = vor.u32 %v5331_v42, %v5101_v7  ;;  %v5352_v23 = vld [vmem:[#allocation5 + $0x1a8] sm:$0xf0] }
 0x332   : > { %v2159_v49 = vld.sshfl [vmem:[#allocation1] sm:$0xff pattern:$0x73625140]  ;;  %v7334_v2 = vpop.f32.mrf.mxu2 }
 0x333   : > { %v2211_v44 = vpack.c.bf16 %v2159_v49, %v2159_v49  ;;  %2161 = vst [vmem:[#allocation1] ss:$4 sm:$0xff] %v1831_v45  ;;  %v5197_v45 = vld [vmem:[#allocation5 + $0x1b8] sm:$0xf]  ;;  %3278 = vmatpush.bf16.msra.mxu0 %v5102_v15  ;;  %v2009_v49 = vld [vmem:[#allocation3 + $0xd8] sm:$0xff] }
 0x334   : > { %2162 = vst [vmem:[#allocation1 + $0x1] ss:$4 sm:$0xff] %v1832_v21  ;;  %v7332_v10 = vpop.f32.mrf.mxu1  ;;  %v5198_v14 = vor.u32 %v5355_v55, %v5197_v45  ;;  %v5170_v21 = vor.u32 %v5347_v1, %v5167_v36  ;;  %v2078_v42 = vrot.slane %v2009_v49, 2  ;;  %v2010_v15 = vld [vmem:[#allocation3 + $0xe0] sm:$0xff]  ;;  %v2080_v45 = vrot.slane %v2009_v49, 6 }
 0x335   : > { %2229 = vst [vmem:[#allocation4 + $0x98] sm:$0xf] %v2211_v44  ;;  %v5289_v5 = vld [vmem:[#allocation4 + $0x88] sm:$0xf0]  ;;  %v2081_v55 = vrot.slane %v2010_v15, 2 }
 0x336   : > { %2997 = vmatmul.bf16.gmra.mxu2 %v7327_v13  ;;  %3159 = vmatmul.bf16.gmra.mxu1 %v7327_v13  ;;  %2163 = vst [vmem:[#allocation1 + $0x2] ss:$4 sm:$0xff] %v7199_v20  ;;  %v5089_v20 = vld [vmem:[#allocation5 + $0xe0] sm:$0xf] }
 0x337   : > { %v2160_v22 = vld.sshfl [vmem:[#allocation1 + $0x20] sm:$0xff pattern:$0x73625140]  ;;  %3332 = vmatpush.bf16.msra.mxu1 %v5198_v14  ;;  %3172 = vmatpush.bf16.msra.mxu2 %v5170_v21  ;;  %2164 = vst [vmem:[#allocation1 + $0x3] ss:$4 sm:$0xff] %v1833_v27  ;;  %v7350_v27 = vor.u32 %v5289_v5, %v4933_v40  ;;  %v2082_v21 = vrot.slane %v2010_v15, 4 }
 0x338   : > { %v2212_v63 = vpack.c.bf16 %v2160_v22, %v2160_v22  ;;  %2165 = vst [vmem:[#allocation1 + $0x20] ss:$4 sm:$0xff] %v1834_v62  ;;  %v2079_v22 = vrot.slane %v2009_v49, 4  ;;  %v2083_v40 = vrot.slane %v2010_v15, 6 }
 0x339   : > { %2166 = vst [vmem:[#allocation1 + $0x21] ss:$4 sm:$0xff] %v1835_v50  ;;  %v5328_v50 = vld [vmem:[#allocation5 + $0xe8] sm:$0xf0] }
 0x33a   : > { %2230 = vst [vmem:[#allocation4 + $0xa4] sm:$0xf] %v2212_v63  ;;  %v2963_v57 = vpop.f32.mrf.mxu2  ;;  %v5090_v14 = vor.u32 %v5328_v50, %v5089_v20 }
 0x33b   : > { %v7348_v7 = vadd.f32 %v2963_v57, %v7276_v47  ;;  %2167 = vst [vmem:[#allocation1 + $0x22] ss:$4 sm:$0xff] %v2008_v30  ;;  %v4981_v30 = vld [vmem:[#allocation5 + $0x8] sm:$0xf]  ;;  %v5301_v57 = vld [vmem:[#allocation5 + $0x10] sm:$0xf0] }
 0x33c   : > { %3031 = vmatmul.bf16.gmra.mxu3 %v7323_v32  ;;  %v7343_v44 = vpop.f32.mrf.mxu1  ;;  %2168 = vst [vmem:[#allocation1 + $0x23] ss:$4 sm:$0xff] %v2009_v49  ;;  %3279 = vmatpush.bf16.msra.mxu0 %v5090_v14  ;;  %v5186_v49 = vor.u32 %v5352_v23, %v5185_v16  ;;  %v4982_v5 = vor.u32 %v5301_v57, %v4981_v30 }
 0x33e   : > { %v2169_v62 = vld.sshfl [vmem:[#allocation1] sm:$0xff pattern:$0x73625140]  ;;  %3333 = vmatpush.bf16.msra.mxu1 %v5186_v49  ;;  %3226 = vmatpush.bf16.msra.mxu3 %v4982_v5 }
 0x33f   : > { %v2213_v63 = vpack.c.bf16 %v2169_v62, %v2169_v62  ;;  %2171 = vst [vmem:[#allocation1] ss:$4 sm:$0xff] %v2078_v42  ;;  %v2011_v42 = vld [vmem:[#allocation3 + $0xe8] sm:$0x3]  ;;  %v5325_v49 = vld [vmem:[#allocation5 + $0xd0] sm:$0xf0] }
 0x340   : > { %2172 = vst [vmem:[#allocation1 + $0x1] ss:$4 sm:$0xff] %v2079_v22  ;;  %v3066_v22 = vpop.f32.mrf.mxu0  ;;  %v5349_v5 = vld [vmem:[#allocation5 + $0x190] sm:$0xf0] }
 0x341   : > { %2231 = vst [vmem:[#allocation4 + $0xb0] sm:$0xf] %v2213_v63  ;;  %v4945_v63 = vld [vmem:[#allocation4 + $0x98] sm:$0xf]  ;;  %v5292_v20 = vld [vmem:[#allocation4 + $0xa0] sm:$0xf0] }
 0x342   : > { %v7355_v1 = vpop.f32.mrf.mxu2  ;;  %2173 = vst [vmem:[#allocation1 + $0x2] ss:$4 sm:$0xff] %v2080_v45 }
 0x343   : > { %v2170_v36 = vld.sshfl [vmem:[#allocation1 + $0x20] sm:$0xff pattern:$0x73625140]  ;;  %2174 = vst [vmem:[#allocation1 + $0x3] ss:$4 sm:$0xff] %v2010_v15 }
 0x344   : > { %v7353_v47 = vpop.f32.mrf.mxu1  ;;  %v2214_v59 = vpack.c.bf16 %v2170_v36, %v2170_v36  ;;  %2175 = vst [vmem:[#allocation1 + $0x20] ss:$4 sm:$0xff] %v2081_v55 }
 0x345   : > { %2176 = vst [vmem:[#allocation1 + $0x21] ss:$4 sm:$0xff] %v2082_v21 }
 0x346   : > { %3173 = vmatmul.bf16.vlgmr.msra.gmra.mxu2 %v7242_v48  ;;  %2232 = vst [vmem:[#allocation4 + $0xbc] sm:$0xf] %v2214_v59  ;;  %v7363_v59 = vor.u32 %v5292_v20, %v4945_v63 }
 0x347   : > { %2177 = vst [vmem:[#allocation1 + $0x22] ss:$4 sm:$0xff] %v2083_v40  ;;  %v5173_v40 = vld [vmem:[#allocation5 + $0x188] sm:$0xf] }
 0x348   : > { %2178 = vst [vmem:[#allocation1 + $0x23] ss:$4 sm:$0xff] %v2011_v42  ;;  %v3068_v16 = vpop.f32.mrf.mxu0 }
 0x34a   : > { %v2968_v45 = vpop.f32.mrf.mxu2  ;;  %v2179_v15 = vld.sshfl [vmem:[#allocation1] sm:$0xff pattern:$0x73625140] }
 0x34b   : > { %v7359_v50 = vadd.f32 %v2968_v45, %v7296_v29  ;;  %v2215_v14 = vpack.c.bf16 %v2179_v15, %v2179_v15  ;;  %v5077_v29 = vld [vmem:[#allocation5 + $0xc8] sm:$0xf]  ;;  %v4957_v45 = vld [vmem:[#allocation4 + $0xb0] sm:$0xf] }
 0x34c   : > { %3036 = vmatmul.bf16.gmra.mxu3 %v7350_v27  ;;  %v3120_v62 = vpop.f32.mrf.mxu1  ;;  %v5078_v57 = vor.u32 %v5325_v49, %v5077_v29 }
 0x34d   : > { %v7361_v36 = vadd.f32 %v3120_v62, %v3066_v22  ;;  %2233 = vst [vmem:[#allocation4 + $0xc8] sm:$0xf] %v2215_v14  ;;  %v5174_v22 = vor.u32 %v5349_v5, %v5173_v40  ;;  %v5295_v62 = vld [vmem:[#allocation4 + $0xb8] sm:$0xf0] }
 0x34e   : > { %3280 = vmatpush.bf16.msra.mxu0 %v5078_v57  ;;  %v7373_v15 = vor.u32 %v5295_v62, %v4957_v45 }
 0x34f   : > { %v2180_v55 = vld.sshfl [vmem:[#allocation1 + $0x20] sm:$0xff pattern:$0x73625140]  ;;  %3334 = vmatpush.bf16.msra.mxu1 %v5174_v22 }
 0x350   : > { %v2216_v21 = vpack.c.bf16 %v2180_v55, %v2180_v55  ;;  %v3071_v63 = vpop.f32.mrf.mxu0 }
 0x351   : > { %3281 = vmatmul.bf16.vlgmr.msra.gmra.mxu0 %v7090_v12 }
 0x352   : > { %2234 = vst [vmem:[#allocation4 + $0xd4] sm:$0xf] %v2216_v21  ;;  %v7369_v42 = vpop.f32.mrf.mxu2  ;;  %3335 = vmatmul.bf16.vlgmr.msra.gmra.mxu1 %v7242_v48 }
 0x354   : > { %v3122_v23 = vpop.f32.mrf.mxu1  ;;  %v4969_v49 = vld [vmem:[#allocation4 + $0xc8] sm:$0xf] }
 0x355   : > { %v7367_v30 = vadd.f32 %v3122_v23, %v3068_v16 }
 0x356   : > { %3178 = vmatmul.bf16.gmra.mxu2 %v7260_v3 }
 0x358   : > { %v3073_v16 = vpop.f32.mrf.mxu0 }
 0x359   : > { %v5298_v57 = vld [vmem:[#allocation4 + $0xd0] sm:$0xf0] }
 0x35a   : > { %v2973_v55 = vpop.f32.mrf.mxu2 }
 0x35b   : > { %v7379_v21 = vadd.f32 %v2973_v55, %v7315_v58  ;;  %v7389_v58 = vor.u32 %v5298_v57, %v4969_v49 }
 0x35c   : > { %3041 = vmatmul.bf16.gmra.mxu3 %v7363_v59  ;;  %v3125_v20 = vpop.f32.mrf.mxu1 }
 0x35d   : > { %v7375_v14 = vadd.f32 %v3125_v20, %v3071_v63 }
 0x360   : > { %v3076_v40 = vpop.f32.mrf.mxu0 }
 0x361   : > { %3286 = vmatmul.bf16.gmra.mxu0 %v7113_v61 }
 0x362   : > { %v2975_v12 = vpop.f32.mrf.mxu2  ;;  %3340 = vmatmul.bf16.gmra.mxu1 %v7260_v3  ;;  %v2961_v3 = vadd.f32 %v7334_v2, %v7267_v46 }
 0x363   : > { %v7385_v48 = vadd.f32 %v2975_v12, %v7332_v10 }
 0x364   : > { %v3127_v23 = vpop.f32.mrf.mxu1 }
 0x365   : > { %v7382_v29 = vadd.f32 %v3127_v23, %v3073_v16 }
 0x366   : > { %3183 = vmatmul.bf16.gmra.mxu2 %v7280_v60 }
 0x368   : > { %v3078_v62 = vpop.f32.mrf.mxu0 }
 0x36c   : > { %3046 = vmatmul.bf16.gmra.mxu3 %v7373_v15  ;;  %v3130_v5 = vpop.f32.mrf.mxu1 }
 0x36d   : > { %v7391_v22 = vadd.f32 %v3130_v5, %v3076_v40 }
 0x370   : > { %v3081_v23 = vpop.f32.mrf.mxu0 }
 0x371   : > { %3291 = vmatmul.bf16.gmra.mxu0 %v7142_v8 }
 0x372   : > { %3345 = vmatmul.bf16.gmra.mxu1 %v7280_v60 }
 0x374   : > { %v3132_v10 = vpop.f32.mrf.mxu1 }
 0x375   : > { %v7398_v20 = vadd.f32 %v3132_v10, %v3078_v62 }
 0x376   : > { %3188 = vmatmul.bf16.gmra.mxu2 %v7300_v37 }
 0x378   : > { %v3083_v46 = vpop.f32.mrf.mxu0 }
 0x379   : > { %v2978_v61 = vpop.f32.mrf.mxu2 }
 0x37a   : > { %v7401_v55 = vadd.f32 %v2978_v61, %v7343_v44 }
 0x37c   : > { %3051 = vmatmul.bf16.gmra.mxu3 %v7389_v58 }
 0x37f   : > { %v3012_v45 = vpop.f32.mrf.mxu3 }
 0x380   : > { %v7396_v63 = vadd.f32 %v3012_v45, %v7318_v38  ;;  %v3135_v38 = vpop.f32.mrf.mxu1  ;;  %v2966_v45 = vadd.f32 %v7355_v1, %v7289_v54  ;;  %v3086_v62 = vpop.f32.mrf.mxu0 }
 0x381   : > { %v7409_v49 = vadd.f32 %v3135_v38, %v3081_v23  ;;  %v2980_v57 = vpop.f32.mrf.mxu2  ;;  %3296 = vmatmul.bf16.gmra.mxu0 %v7231_v28  ;;  %v2971_v23 = vadd.f32 %v7369_v42, %v7309_v35 }
 0x382   : > { %v7412_v40 = vadd.f32 %v2980_v57, %v7353_v47  ;;  %3350 = vmatmul.bf16.gmra.mxu1 %v7300_v37 }
 0x386   : > { %3193 = vmatmul.bf16.gmra.mxu2 %v7323_v32 }
 0x387   : > { %v3014_v16 = vpop.f32.mrf.mxu3 }
 0x388   : > { %v7407_v12 = vadd.f32 %v3014_v16, %v2961_v3  ;;  %v3137_v2 = vpop.f32.mrf.mxu1  ;;  %v3088_v16 = vpop.f32.mrf.mxu0 }
 0x389   : > { %v7419_v60 = vadd.f32 %v3137_v2, %v3083_v46  ;;  %v2983_v5 = vpop.f32.mrf.mxu2 }
 0x38c   : > { %3227 = vmatmul.bf16.vlgmr.msra.gmra.mxu3 %v7004_v4 }
 0x38f   : > { %v3017_v44 = vpop.f32.mrf.mxu3 }
 0x390   : > { %v7417_v8 = vadd.f32 %v3017_v44, %v7348_v7  ;;  %v3140_v10 = vpop.f32.mrf.mxu1  ;;  %v3091_v57 = vpop.f32.mrf.mxu0 }
 0x391   : > { %v7427_v61 = vadd.f32 %v3140_v10, %v3086_v62  ;;  %v7429_v7 = vpop.f32.mrf.mxu2  ;;  %3301 = vmatmul.bf16.gmra.mxu0 %v7247_v34 }
 0x392   : > { %3355 = vmatmul.bf16.gmra.mxu1 %v7323_v32 }
 0x396   : > { %3198 = vmatmul.bf16.gmra.mxu2 %v7350_v27 }
 0x397   : > { %v3019_v47 = vpop.f32.mrf.mxu3 }
 0x398   : > { %v7425_v4 = vadd.f32 %v3019_v47, %v2966_v45  ;;  %v3142_v28 = vpop.f32.mrf.mxu1  ;;  %v3093_v45 = vpop.f32.mrf.mxu0 }
 0x399   : > { %v7436_v1 = vadd.f32 %v3142_v28, %v3088_v16  ;;  %v7438_v37 = vpop.f32.mrf.mxu2 }
 0x39c   : > { %3232 = vmatmul.bf16.gmra.mxu3 %v7036_v33 }
 0x39f   : > { %v3022_v3 = vpop.f32.mrf.mxu3 }
 0x3a0   : > { %v7434_v54 = vadd.f32 %v3022_v3, %v7359_v50  ;;  %v3145_v44 = vpop.f32.mrf.mxu1  ;;  %v3096_v62 = vpop.f32.mrf.mxu0 }
 0x3a1   : > { %v7446_v46 = vadd.f32 %v3145_v44, %v3091_v57  ;;  %v7448_v50 = vpop.f32.mrf.mxu2  ;;  %3306 = vmatmul.bf16.gmra.mxu0 %v7264_v9 }
 0x3a2   : > { %3360 = vmatmul.bf16.gmra.mxu1 %v7350_v27 }
 0x3a6   : > { %3203 = vmatmul.bf16.gmra.mxu2 %v7363_v59 }
 0x3a7   : > { %v3024_v38 = vpop.f32.mrf.mxu3 }
 0x3a8   : > { %v7444_v33 = vadd.f32 %v3024_v38, %v2971_v23  ;;  %v3147_v34 = vpop.f32.mrf.mxu1  ;;  %v3098_v28 = vpop.f32.mrf.mxu0 }
 0x3a9   : > { %v7455_v42 = vadd.f32 %v3147_v34, %v3093_v45  ;;  %v7457_v32 = vpop.f32.mrf.mxu2 }
 0x3ac   : > { %3237 = vmatmul.bf16.gmra.mxu3 %v7062_v18 }
 0x3af   : > { %v3027_v2 = vpop.f32.mrf.mxu3 }
 0x3b0   : > { %v7453_v35 = vadd.f32 %v3027_v2, %v7379_v21  ;;  %v3150_v10 = vpop.f32.mrf.mxu1  ;;  %v3101_v57 = vpop.f32.mrf.mxu0 }
 0x3b1   : > { %v7464_v3 = vadd.f32 %v3150_v10, %v3096_v62  ;;  %v7466_v16 = vpop.f32.mrf.mxu2  ;;  %3311 = vmatmul.bf16.gmra.mxu0 %v7286_v39 }
 0x3b2   : > { %3365 = vmatmul.bf16.gmra.mxu1 %v7363_v59 }
 0x3b3   : > { %8537 = vst [vmem:[#allocation8_spill] sm:$0xff] %v7464_v3 }
 0x3b6   : > { %3208 = vmatmul.bf16.gmra.mxu2 %v7373_v15 }
 0x3b7   : > { %v3029_v47 = vpop.f32.mrf.mxu3 }
 0x3b8   : > { %v7462_v18 = vadd.f32 %v3029_v47, %v7385_v48  ;;  %v3152_v23 = vpop.f32.mrf.mxu1  ;;  %v3103_v39 = vpop.f32.mrf.mxu0 }
 0x3b9   : > { %v7473_v38 = vadd.f32 %v3152_v23, %v3098_v28  ;;  %v7475_v27 = vpop.f32.mrf.mxu2 }
 0x3bb   : > { %8538 = vst [vmem:[#allocation9_spill] sm:$0xff] %v7473_v38 }
 0x3bc   : > { %3242 = vmatmul.bf16.gmra.mxu3 %v7082_v0 }
 0x3bf   : > { %v3032_v21 = vpop.f32.mrf.mxu3 }
 0x3c0   : > { %v7471_v9 = vadd.f32 %v3032_v21, %v7401_v55  ;;  %v3155_v44 = vpop.f32.mrf.mxu1  ;;  %v2984_v55 = vadd.f32 %v2983_v5, %v7240_v17 }
 0x3c1   : > { %v7482_v2 = vadd.f32 %v3155_v44, %v3101_v57  ;;  %v7484_v45 = vpop.f32.mrf.mxu2  ;;  %3316 = vmatmul.bf16.gmra.mxu0 %v7306_v19 }
 0x3c2   : > { %3370 = vmatmul.bf16.gmra.mxu1 %v7373_v15 }
 0x3c3   : > { %8539 = vst [vmem:[#allocation10_spill] sm:$0xff] %v7482_v2 }
 0x3c6   : > { %3213 = vmatmul.bf16.gmra.mxu2 %v7389_v58 }
 0x3c7   : > { %v3034_v48 = vpop.f32.mrf.mxu3 }
 0x3c8   : > { %v7480_v0 = vadd.f32 %v3034_v48, %v7412_v40  ;;  %v3157_v62 = vpop.f32.mrf.mxu1 }
 0x3c9   : > { %v7491_v59 = vadd.f32 %v3157_v62, %v3103_v39  ;;  %v3174_v40 = vpop.f32.mrf.mxu2 }
 0x3ca   : > { %v3175_v10 = vadd.f32 %v3174_v40, %v7361_v36 }
 0x3cb   : > { %8540 = vst [vmem:[#allocation11_spill] sm:$0xff] %v7491_v59 }
 0x3cc   : > { %3247 = vmatmul.bf16.gmra.mxu3 %v7102_v26  ;;  %v3435_v21 = vrot.slane %v3175_v10, 6  ;;  %v2986_v26 = vadd.f32 %v7429_v7, %v7245_v56  ;;  %v3106_v56 = vpop.f32.mrf.mxu0 }
 0x3ce   : > { %v7499_v5 = vsel %vm1306_vm6, %v7396_v63, %v3435_v21  ;;  %v7503_v28 = vsel %vm3474_vm13, %v7396_v63, %v3435_v21  ;;  %v7507_v36 = vsel %vm3479_vm14, %v7396_v63, %v3435_v21  ;;  %v7511_v23 = vsel %vm581_vm1, %v3435_v21, %v7396_v63 }
 0x3cf   : > { %v3037_v34 = vpop.f32.mrf.mxu3 }
 0x3d0   : > { %v7489_v47 = vadd.f32 %v3037_v34, %v2984_v55  ;;  %v3160_v7 = vpop.f32.mrf.mxu1  ;;  %v2989_v34 = vadd.f32 %v7438_v37, %v7258_v51 }
 0x3d1   : > { %v7516_v48 = vadd.f32 %v3160_v7, %v3106_v56  ;;  %v3176_v57 = vpop.f32.mrf.mxu2  ;;  %3321 = vmatmul.bf16.gmra.mxu0 %v7327_v13 }
 0x3d2   : > { %v3177_v44 = vadd.f32 %v3176_v57, %v7367_v30  ;;  %3375 = vmatmul.bf16.gmra.mxu1 %v7389_v58 }
 0x3d3   : > { %8542 = vst [vmem:[#allocation13_spill] sm:$0xff] %v7516_v48 }
 0x3d4   : > { %v3437_v55 = vrot.slane %v3177_v44, 6  ;;  %v3108_v30 = vpop.f32.mrf.mxu0 }
 0x3d6   : > { %v7524_v63 = vsel %vm1306_vm6, %v7407_v12, %v3437_v55  ;;  %v7528_v15 = vsel %vm3474_vm13, %v7407_v12, %v3437_v55  ;;  %v7532_v62 = vsel %vm3479_vm14, %v7407_v12, %v3437_v55 }
 0x3d7   : > { %v3039_v17 = vpop.f32.mrf.mxu3 }
 0x3d8   : > { %v7514_v19 = vadd.f32 %v3039_v17, %v2986_v26  ;;  %v3162_v51 = vpop.f32.mrf.mxu1  ;;  %v2991_v17 = vadd.f32 %v7448_v50, %v7269_v25 }
 0x3d9   : > { %v7540_v37 = vadd.f32 %v3162_v51, %v3108_v30  ;;  %v3179_v10 = vpop.f32.mrf.mxu2  ;;  %v2996_v51 = vadd.f32 %v7466_v16, %v7291_v41 }
 0x3da   : > { %8541 = vst [vmem:[#allocation12_spill] sm:$0xff] %v7514_v19  ;;  %v3180_v21 = vadd.f32 %v3179_v10, %v7375_v14 }
 0x3db   : > { %8544 = vst [vmem:[#allocation15_spill] sm:$0xff] %v7540_v37 }
 0x3dc   : > { %3252 = vmatmul.bf16.gmra.mxu3 %v6989_v43  ;;  %v7536_v43 = vsel %vm581_vm1, %v3437_v55, %v7407_v12  ;;  %v3439_v26 = vrot.slane %v3180_v21, 6  ;;  %v2994_v55 = vadd.f32 %v7457_v32, %v7278_v52 }
 0x3de   : > { %v7548_v12 = vsel %vm1306_vm6, %v7417_v8, %v3439_v26  ;;  %v7552_v7 = vsel %vm3474_vm13, %v7417_v8, %v3439_v26  ;;  %v7556_v57 = vsel %vm3479_vm14, %v7417_v8, %v3439_v26  ;;  %v7560_v14 = vsel %vm581_vm1, %v3439_v26, %v7417_v8 }
 0x3df   : > { %v3042_v39 = vpop.f32.mrf.mxu3 }
 0x3e0   : > { %v7538_v40 = vadd.f32 %v3042_v39, %v2989_v34 }
 0x3e1   : > { %v3181_v13 = vpop.f32.mrf.mxu2 }
 0x3e2   : > { %8543 = vst [vmem:[#allocation14_spill] sm:$0xff] %v7538_v40  ;;  %v3182_v50 = vadd.f32 %v3181_v13, %v7382_v29  ;;  %v2999_v13 = vadd.f32 %v7475_v27, %v7298_v31 }
 0x3e4   : > { %v3441_v44 = vrot.slane %v3182_v50, 6 }
 0x3e6   : > { %v7571_v39 = vsel %vm1306_vm6, %v7425_v4, %v3441_v44  ;;  %v7575_v8 = vsel %vm3474_vm13, %v7425_v4, %v3441_v44  ;;  %v7579_v58 = vsel %vm3479_vm14, %v7425_v4, %v3441_v44 }
 0x3e7   : > { %v3044_v56 = vpop.f32.mrf.mxu3 }
 0x3e8   : > { %v7563_v25 = vadd.f32 %v3044_v56, %v2991_v17 }
 0x3e9   : > { %v3184_v52 = vpop.f32.mrf.mxu2 }
 0x3ea   : > { %8545 = vst [vmem:[#allocation16_spill] sm:$0xff] %v7563_v25  ;;  %v3185_v32 = vadd.f32 %v3184_v52, %v7391_v22  ;;  %v3001_v52 = vadd.f32 %v7484_v45, %v7311_v11  ;;  %v3282_v45 = vpop.f32.mrf.mxu0 }
 0x3ec   : > { %3257 = vmatmul.bf16.gmra.mxu3 %v7020_v24  ;;  %v7583_v24 = vsel %vm581_vm1, %v3441_v44, %v7425_v4  ;;  %v3443_v30 = vrot.slane %v3185_v32, 6 }
 0x3ee   : > { %v7592_v21 = vsel %vm1306_vm6, %v7434_v54, %v3443_v30  ;;  %v7596_v26 = vsel %vm3474_vm13, %v7434_v54, %v3443_v30  ;;  %v7600_v4 = vsel %vm3479_vm14, %v7434_v54, %v3443_v30  ;;  %v7604_v22 = vsel %vm581_vm1, %v3443_v30, %v7434_v54 }
 0x3ef   : > { %v3047_v34 = vpop.f32.mrf.mxu3 }
 0x3f0   : > { %v7585_v29 = vadd.f32 %v3047_v34, %v2994_v55 }
 0x3f1   : > { %v3186_v41 = vpop.f32.mrf.mxu2 }
 0x3f2   : > { %8546 = vst [vmem:[#allocation17_spill] sm:$0xff] %v7585_v29  ;;  %v3187_v16 = vadd.f32 %v3186_v41, %v7398_v20 }
 0x3f4   : > { %v3445_v56 = vrot.slane %v3187_v16, 6  ;;  %v3336_v16 = vpop.f32.mrf.mxu1 }
 0x3f6   : > { %v7614_v44 = vsel %vm1306_vm6, %v7444_v33, %v3445_v56  ;;  %v7618_v54 = vsel %vm3474_vm13, %v7444_v33, %v3445_v56  ;;  %v7622_v55 = vsel %vm3479_vm14, %v7444_v33, %v3445_v56 }
 0x3f7   : > { %v3049_v10 = vpop.f32.mrf.mxu3 }
 0x3f8   : > { %v7606_v17 = vadd.f32 %v3049_v10, %v2996_v51 }
 0x3f9   : > { %v3189_v31 = vpop.f32.mrf.mxu2 }
 0x3fa   : > { %8547 = vst [vmem:[#allocation18_spill] sm:$0xff] %v7606_v17  ;;  %v3190_v27 = vadd.f32 %v3189_v31, %v7409_v49 }
 0x3fc   : > { %3262 = vmatmul.bf16.gmra.mxu3 %v7048_v6  ;;  %v7626_v6 = vsel %vm581_vm1, %v3445_v56, %v7444_v33  ;;  %v3447_v34 = vrot.slane %v3190_v27, 6  ;;  %v7672_v27 = vld [vmem:[%s8489_s5] ss:$0 sm:$0xff]  ;;  %v3338_v48 = vpop.f32.mrf.mxu1 }
 0x3fe   : > { %v7635_v30 = vsel %vm1306_vm6, %v7453_v35, %v3447_v34  ;;  %v7639_v51 = vsel %vm3474_vm13, %v7453_v35, %v3447_v34  ;;  %v7643_v33 = vsel %vm3479_vm14, %v7453_v35, %v3447_v34  ;;  %v7647_v49 = vsel %vm581_vm1, %v3447_v34, %v7453_v35 }
 0x3ff   : > { %v3052_v50 = vpop.f32.mrf.mxu3  ;;  %8549 = vst [vmem:[#allocation20_spill] sm:$0xff] %v7635_v30 }
 0x400   : > { %v7628_v20 = vadd.f32 %v3052_v50, %v2999_v13  ;;  %8550 = vst [vmem:[#allocation21_spill] sm:$0xff] %v7639_v51 }
 0x401   : > { %8551 = vst [vmem:[#allocation22_spill] sm:$0xff] %v7643_v33  ;;  %v3191_v11 = vpop.f32.mrf.mxu2 }
 0x402   : > { %8548 = vst [vmem:[#allocation19_spill] sm:$0xff] %v7628_v20  ;;  %v3192_v41 = vadd.f32 %v3191_v11, %v7419_v60 }
 0x403   : > { %8552 = vst [vmem:[#allocation23_spill] sm:$0xff] %v7647_v49 }
 0x404   : > { %v3449_v56 = vrot.slane %v3192_v41, 6  ;;  %v7685_v41 = vrot.slane %v7672_v27, 2 }
 0x406   : > { %v7655_v50 = vsel %vm1306_vm6, %v7462_v18, %v3449_v56  ;;  %v7659_v35 = vsel %vm3474_vm13, %v7462_v18, %v3449_v56  ;;  %v7663_v31 = vsel %vm3479_vm14, %v7462_v18, %v3449_v56 }
 0x407   : > { %v3054_v32 = vpop.f32.mrf.mxu3  ;;  %8554 = vst [vmem:[#allocation25_spill] sm:$0xff] %v7655_v50 }
 0x408   : > { %v7649_v10 = vadd.f32 %v3054_v32, %v3001_v52  ;;  %8555 = vst [vmem:[#allocation26_spill] sm:$0xff] %v7659_v35  ;;  %v7677_v52 = vld [vmem:[%s8490_s6] ss:$0 sm:$0xff] }
 0x409   : > { %8556 = vst [vmem:[#allocation27_spill] sm:$0xff] %v7663_v31  ;;  %v3194_v32 = vpop.f32.mrf.mxu2  ;;  %v7701_v37 = vrot.slane %v7677_v52, 2 }
 0x40a   : > { %8553 = vst [vmem:[#allocation24_spill] sm:$0xff] %v7649_v10 }
 0x40c   : > { %3267 = vmatmul.bf16.gmra.mxu3 %v7072_v53  ;;  %v7667_v53 = vsel %vm581_vm1, %v3449_v56, %v7462_v18  ;;  %v3195_v18 = vadd.f32 %v3194_v32, %v7427_v61  ;;  %v3284_v56 = vpop.f32.mrf.mxu0 }
 0x40d   : > { %8557 = vst [vmem:[#allocation28_spill] sm:$0xff] %v7667_v53 }
 0x40f   : > { %v3228_v13 = vpop.f32.mrf.mxu3 }
 0x410   : > { %v3283_v60 = vadd.f32 %v3282_v45, %v3228_v13 }
 0x411   : > { %v3196_v51 = vpop.f32.mrf.mxu2 }
 0x412   : > { %v3337_v34 = vadd.f32 %v3336_v16, %v3283_v60  ;;  %v7688_v16 = vrot.slane %v7672_v27, 4 }
 0x414   : > { %v3436_v11 = vrot.slane %v3337_v34, 4 }
 0x416   : > { %v3473_v13 = vsel %vm3472_vm4, %v7499_v5, %v3436_v11  ;;  %v3477_v60 = vsel %vm3476_vm5, %v7503_v28, %v3436_v11  ;;  %v3481_v61 = vsel %vm3472_vm4, %v3436_v11, %v7507_v36  ;;  %v3484_v34 = vsel %vm3476_vm5, %v3436_v11, %v7511_v23 }
 0x417   : > { %v3478_v32 = vrot.slane %v3477_v60, 2  ;;  %v3482_v10 = vrot.slane %v3481_v61, 4  ;;  %v7698_v20 = vrot.slane %v3484_v34, 6  ;;  %v3230_v17 = vpop.f32.mrf.mxu3  ;;  %v7710_v28 = vrot.slane %v7677_v52, 4 }
 0x418   : > { %v3285_v36 = vadd.f32 %v3284_v56, %v3230_v17  ;;  %v7713_v23 = vrot.slane %v7672_v27, 6  ;;  %v3451_v11 = vrot.slane %v3195_v18, 6  ;;  %v5259_v60 = vrot.slane %v3473_v13, 9 }
 0x419   : > { %v3746_v61 = vrot.slane %v3478_v32, 7  ;;  %v3749_v34 = vrot.slane %v3482_v10, 7  ;;  %v3752_v29 = vrot.slane %v7698_v20, 7  ;;  %v4136_v59 = vrot.slane %v3478_v32, 4 }
 0x41a   : > { %v4137_v2 = vrot.slane %v3482_v10, 4  ;;  %v3339_v45 = vadd.f32 %v3338_v48, %v3285_v36  ;;  %v7718_v53 = vsel %vm1306_vm6, %v7471_v9, %v3451_v11  ;;  %v4138_v35 = vrot.slane %v7698_v20, 4 }
 0x41b   : > { %8562 = vst [vmem:[#allocation29_spill] sm:$0xff] %v7718_v53  ;;  %v3747_v31 = vsel %vm7705_vm9, %v5259_v60, %v3746_v61  ;;  %v3748_v17 = vrot.slane %v3746_v61, 2  ;;  %v3751_v56 = vrot.slane %v3749_v34, 2  ;;  %v7725_v25 = vsel %vm3474_vm13, %v7471_v9, %v3451_v11 }
 0x41c   : > { %v3944_v18 = vrot.slane %v3747_v31, 2  ;;  %v3438_v50 = vrot.slane %v3339_v45, 4  ;;  %8563 = vst [vmem:[#allocation30_spill] sm:$0xff] %v7725_v25  ;;  %v7729_v48 = vsel %vm3479_vm14, %v7471_v9, %v3451_v11  ;;  %v3754_v61 = vrot.slane %v3752_v29, 2 }
 0x41d   : > { %8564 = vst [vmem:[#allocation31_spill] sm:$0xff] %v7729_v48  ;;  %v3750_v36 = vsel %vm7705_vm9, %v3748_v17, %v3749_v34  ;;  %v3753_v60 = vsel %vm7705_vm9, %v3751_v56, %v3752_v29  ;;  %v7737_v53 = vsel %vm581_vm1, %v3451_v11, %v7471_v9  ;;  %v3287_v56 = vpop.f32.mrf.mxu0 }
 0x41e   : > { %8565 = vst [vmem:[#allocation32_spill] sm:$0xff] %v7737_v53  ;;  %v3945_v31 = vrot.slane %v3750_v36, 2  ;;  %v3946_v45 = vrot.slane %v3753_v60, 2  ;;  %v4072_v49 = vadd.f32 %v3944_v18, %v3473_v13  ;;  %v3487_v25 = vsel %vm3472_vm4, %v7524_v63, %v3438_v50  ;;  %v3341_v53 = vpop.f32.mrf.mxu1 }
 0x41f   : > { %v3489_v48 = vsel %vm3476_vm5, %v7528_v15, %v3438_v50  ;;  %v3492_v34 = vsel %vm3472_vm4, %v3438_v50, %v7532_v62  ;;  %v3495_v17 = vsel %vm3476_vm5, %v3438_v50, %v7536_v43  ;;  %v3755_v29 = vrot.slane %v3487_v25, 7  ;;  %v3233_v33 = vpop.f32.mrf.mxu3 }
 0x420   : > { %v4073_v9 = vadd.f32 %v3945_v31, %v3478_v32  ;;  %v4074_v11 = vadd.f32 %v3946_v45, %v3482_v10  ;;  %v4264_v36 = vadd.f32 %v4136_v59, %v4072_v49  ;;  %v3490_v60 = vrot.slane %v3489_v48, 2 }
 0x421   : > { %v3493_v13 = vrot.slane %v3492_v34, 4  ;;  %v7747_v18 = vrot.slane %v3495_v17, 6  ;;  %v3756_v63 = vsel %vm7705_vm9, %v3754_v61, %v3755_v29  ;;  %v3757_v15 = vrot.slane %v3755_v29, 2 }
 0x422   : > { %v4265_v62 = vadd.f32 %v4137_v2, %v4073_v9  ;;  %v4266_v30 = vadd.f32 %v4138_v35, %v4074_v11  ;;  %v4338_v43 = vmul.f32 %v7672_v27, %v4264_v36  ;;  %v3758_v50 = vrot.slane %v3490_v60, 7 }
 0x423   : > { %v3761_v40 = vrot.slane %v3493_v13, 7  ;;  %v3764_v32 = vrot.slane %v7747_v18, 7  ;;  %v3947_v10 = vrot.slane %v3756_v63, 2  ;;  %v7754_v59 = vrot.slane %v7677_v52, 6 }
 0x424   : > { %v4339_v49 = vmul.f32 %v7685_v41, %v4265_v62  ;;  %v4340_v48 = vmul.f32 %v7688_v16, %v4266_v30  ;;  %v4412_v61 = vadd.f32 %v7677_v52, %v4338_v43  ;;  %v3759_v2 = vsel %vm7705_vm9, %v3757_v15, %v3758_v50 }
 0x425   : > { %v3760_v35 = vrot.slane %v3758_v50, 2  ;;  %v3763_v31 = vrot.slane %v3761_v40, 2  ;;  %v3948_v45 = vrot.slane %v3759_v2, 2  ;;  %v4139_v34 = vrot.slane %v3487_v25, 4 }
 0x426   : > { %v4413_v17 = vadd.f32 %v7701_v37, %v4339_v49  ;;  %v4414_v29 = vadd.f32 %v7710_v28, %v4340_v48  ;;  %v4476_v9 = vmax.f32 %v4412_v61, 0.0  ;;  %v4075_v11 = vadd.f32 %v3947_v10, %v7698_v20  ;;  %v3289_v20 = vpop.f32.mrf.mxu0 }
 0x427   : > { %v3762_v36 = vsel %vm7705_vm9, %v3760_v35, %v3761_v40  ;;  %v3765_v30 = vsel %vm7705_vm9, %v3763_v31, %v3764_v32  ;;  %v4076_v63 = vadd.f32 %v3948_v45, %v3487_v25  ;;  %v4140_v62 = vrot.slane %v3490_v60, 4  ;;  %v3235_v15 = vpop.f32.mrf.mxu3 }
 0x428   : > { %v4477_v43 = vmax.f32 %v4413_v17, 0.0  ;;  %v4478_v50 = vmax.f32 %v4414_v29, 0.0  ;;  %4604 = vst [vmem:[#allocation1] ss:$4 sm:$0xff] %v4476_v9  ;;  %v3949_v2 = vrot.slane %v3762_v36, 2  ;;  %v3950_v38 = vrot.slane %v3765_v30, 2  ;;  %v3343_v17 = vpop.f32.mrf.mxu1  ;;  %v3199_v9 = vpop.f32.mrf.mxu2 }
 0x429   : > { %v4141_v49 = vrot.slane %v3493_v13, 4  ;;  %v4142_v48 = vrot.slane %v7747_v18, 4  ;;  %v4267_v61 = vadd.f32 %v4139_v34, %v4075_v11  ;;  %v4268_v3 = vadd.f32 %v4140_v62, %v4076_v63 }
 0x42a   : > { %4606 = vst [vmem:[#allocation1 + $0x1] ss:$4 sm:$0xff] %v4477_v43  ;;  %v4077_v10 = vadd.f32 %v3949_v2, %v3490_v60  ;;  %v4078_v40 = vadd.f32 %v3950_v38, %v3493_v13  ;;  %v3288_v35 = vadd.f32 %v3287_v56, %v3233_v33  ;;  %v3290_v19 = vadd.f32 %v3289_v20, %v3235_v15 }
 0x42b   : > { %4608 = vst [vmem:[#allocation1 + $0x2] ss:$4 sm:$0xff] %v4478_v50  ;;  %v3766_v25 = vrot.slane %v3764_v32, 2  ;;  %v4341_v31 = vmul.f32 %v7713_v23, %v4267_v61  ;;  %v4342_v45 = vmul.f32 %v7672_v27, %v4268_v3  ;;  %v3197_v29 = vadd.f32 %v3196_v51, %v7436_v1 }
 0x42c   : > { %v4269_v36 = vadd.f32 %v4141_v49, %v4077_v10  ;;  %v4270_v30 = vadd.f32 %v4142_v48, %v4078_v40  ;;  %v3342_v34 = vadd.f32 %v3341_v53, %v3288_v35  ;;  %v3344_v11 = vadd.f32 %v3343_v17, %v3290_v19 }
 0x42d   : > { %v4415_v63 = vadd.f32 %v7754_v59, %v4341_v31  ;;  %v4416_v38 = vadd.f32 %v7677_v52, %v4342_v45  ;;  %v7774_v33 = vrot.slane %v3197_v29, 6  ;;  %v7777_v56 = vadd.f32 %v3199_v9, %v7446_v46 }
 0x42e   : > { %v4343_v60 = vmul.f32 %v7685_v41, %v4269_v36  ;;  %v4344_v3 = vmul.f32 %v7688_v16, %v4270_v30  ;;  %v3440_v1 = vrot.slane %v3342_v34, 4  ;;  %v3442_v51 = vrot.slane %v3344_v11, 4 }
 0x42f   : > { %v4479_v13 = vmax.f32 %v4415_v63, 0.0  ;;  %v4480_v32 = vmax.f32 %v4416_v38, 0.0  ;;  %v7784_v19 = vsel %vm1306_vm6, %v7480_v0, %v7774_v33  ;;  %v7789_v53 = vsel %vm3474_vm13, %v7480_v0, %v7774_v33 }
 0x430   : > { %v4417_v46 = vadd.f32 %v7701_v37, %v4343_v60  ;;  %v4418_v62 = vadd.f32 %v7710_v28, %v4344_v3  ;;  %v3498_v15 = vsel %vm3472_vm4, %v7548_v12, %v3440_v1  ;;  %v3500_v43 = vsel %vm3476_vm5, %v7552_v7, %v3440_v1 }
 0x431   : > { %4610 = vst [vmem:[#allocation1 + $0x3] ss:$4 sm:$0xff] %v4479_v13  ;;  %v3501_v50 = vrot.slane %v3500_v43, 2  ;;  %v3503_v2 = vsel %vm3472_vm4, %v3440_v1, %v7556_v57  ;;  %v3506_v49 = vsel %vm3476_vm5, %v3440_v1, %v7560_v14  ;;  %v3767_v48 = vrot.slane %v3498_v15, 7 }
 0x432   : > { %v4481_v61 = vmax.f32 %v4417_v46, 0.0  ;;  %v4482_v20 = vmax.f32 %v4418_v62, 0.0  ;;  %4612 = vst [vmem:[#allocation1 + $0x20] ss:$4 sm:$0xff] %v4480_v32  ;;  %v3504_v10 = vrot.slane %v3503_v2, 4  ;;  %v3507_v40 = vrot.slane %v3506_v49, 6 }
 0x433   : > { %v3768_v12 = vsel %vm7705_vm9, %v3766_v25, %v3767_v48  ;;  %v5260_v35 = vrot.slane %v3501_v50, 9  ;;  %v4143_v31 = vrot.slane %v3498_v15, 4  ;;  %v7805_v7 = vsel %vm3472_vm4, %v7571_v39, %v3442_v51  ;;  %v3292_v15 = vpop.f32.mrf.mxu0 }
 0x434   : > { %4614 = vst [vmem:[#allocation1 + $0x21] ss:$4 sm:$0xff] %v4481_v61  ;;  %v3771_v57 = vrot.slane %v3504_v10, 7  ;;  %v3774_v45 = vrot.slane %v3507_v40, 7  ;;  %v3951_v17 = vrot.slane %v3768_v12, 2  ;;  %v4144_v14 = vrot.slane %v3504_v10, 4 }
 0x435   : > { %4616 = vst [vmem:[#allocation1 + $0x22] ss:$4 sm:$0xff] %v4482_v20  ;;  %v4145_v29 = vrot.slane %v3507_v40, 4  ;;  %v3511_v9 = vsel %vm3476_vm5, %v7575_v8, %v3442_v51  ;;  %v3514_v36 = vsel %vm3472_vm4, %v3442_v51, %v7579_v58  ;;  %v3517_v25 = vsel %vm3476_vm5, %v3442_v51, %v7583_v24  ;;  %v3238_v8 = vpop.f32.mrf.mxu3 }
 0x436   : > { %v3772_v39 = vsel %vm7705_vm9, %v5260_v35, %v3771_v57  ;;  %v3773_v30 = vrot.slane %v3771_v57, 2  ;;  %v3776_v34 = vrot.slane %v3774_v45, 2  ;;  %v4079_v11 = vadd.f32 %v3951_v17, %v7747_v18 }
 0x437   : > { %v3952_v63 = vrot.slane %v3772_v39, 2  ;;  %v3512_v38 = vrot.slane %v3511_v9, 2  ;;  %v3515_v60 = vrot.slane %v3514_v36, 4  ;;  %v7816_v3 = vrot.slane %v3517_v25, 6 }
 0x438   : > { %v4619_v1 = vld.sshfl [vmem:[#allocation1] sm:$0xff pattern:$0x73625140]  ;;  %v3775_v58 = vsel %vm7705_vm9, %v3773_v30, %v3774_v45  ;;  %v4271_v13 = vadd.f32 %v4143_v31, %v4079_v11  ;;  %v3777_v24 = vrot.slane %v7805_v7, 7  ;;  %v4146_v51 = vrot.slane %v7805_v7, 4 }
 0x439   : > { %4708 = vst.msk [vmem:[%s6086_s14] sm:$0xff] %vm4707_vm10, %v4619_v1  ;;  %v3953_v32 = vrot.slane %v3775_v58, 2  ;;  %v4080_v46 = vadd.f32 %v3952_v63, %v3501_v50  ;;  %v3780_v18 = vrot.slane %v3512_v38, 7  ;;  %v3783_v62 = vrot.slane %v3515_v60, 7 }
 0x43a   : > { %v4345_v43 = vmul.f32 %v7713_v23, %v4271_v13  ;;  %v3778_v2 = vsel %vm7705_vm9, %v3776_v34, %v3777_v24  ;;  %v3779_v49 = vrot.slane %v3777_v24, 2  ;;  %v3786_v48 = vrot.slane %v7816_v3, 7 }
 0x43b   : > { %v4081_v61 = vadd.f32 %v3953_v32, %v3504_v10  ;;  %v4272_v20 = vadd.f32 %v4144_v14, %v4080_v46  ;;  %v3782_v12 = vrot.slane %v3780_v18, 2  ;;  %v3785_v35 = vrot.slane %v3783_v62, 2  ;;  %v3346_v14 = vpop.f32.mrf.mxu1 }
 0x43c   : > { %v4419_v31 = vadd.f32 %v7754_v59, %v4345_v43  ;;  %v3781_v50 = vsel %vm7705_vm9, %v3779_v49, %v3780_v18  ;;  %v7831_v57 = vrot.slane %v3786_v48, 2  ;;  %v3954_v45 = vrot.slane %v3778_v2, 2 }
 0x43d   : > { %v4273_v17 = vadd.f32 %v4145_v29, %v4081_v61  ;;  %v4346_v9 = vmul.f32 %v7672_v27, %v4272_v20  ;;  %v3784_v36 = vsel %vm7705_vm9, %v3782_v12, %v3783_v62  ;;  %v3787_v10 = vsel %vm7705_vm9, %v3785_v35, %v3786_v48  ;;  %v3240_v2 = vpop.f32.mrf.mxu3  ;;  %v3294_v12 = vpop.f32.mrf.mxu0 }
 0x43e   : > { %v4483_v25 = vmax.f32 %v4419_v31, 0.0  ;;  %v3955_v39 = vrot.slane %v3781_v50, 2  ;;  %v3956_v30 = vrot.slane %v3784_v36, 2  ;;  %v3957_v34 = vrot.slane %v3787_v10, 2 }
 0x43f   : > { %v4347_v11 = vmul.f32 %v7685_v41, %v4273_v17  ;;  %v4420_v63 = vadd.f32 %v7677_v52, %v4346_v9  ;;  %v4082_v1 = vadd.f32 %v3954_v45, %v3507_v40  ;;  %v4147_v58 = vrot.slane %v3512_v38, 4 }
 0x440   : > { %4618 = vst [vmem:[#allocation1 + $0x23] ss:$4 sm:$0xff] %v4483_v25  ;;  %v4083_v29 = vadd.f32 %v3955_v39, %v7805_v7  ;;  %v4084_v13 = vadd.f32 %v3956_v30, %v3512_v38  ;;  %v4085_v24 = vadd.f32 %v3957_v34, %v3515_v60  ;;  %v4148_v32 = vrot.slane %v3515_v60, 4  ;;  %v3201_v38 = vpop.f32.mrf.mxu2 }
 0x441   : > { %v4421_v46 = vadd.f32 %v7701_v37, %v4347_v11  ;;  %v4484_v18 = vmax.f32 %v4420_v63, 0.0  ;;  %v4149_v62 = vrot.slane %v7816_v3, 4  ;;  %v4274_v43 = vadd.f32 %v4146_v51, %v4082_v1 }
 0x442   : > { %v4275_v49 = vadd.f32 %v4147_v58, %v4083_v29  ;;  %v4276_v48 = vadd.f32 %v4148_v32, %v4084_v13  ;;  %v7846_v40 = vsel %vm3479_vm14, %v7480_v0, %v7774_v33  ;;  %v7851_v7 = vsel %vm581_vm1, %v7774_v33, %v7480_v0 }
 0x443   : > { %v4485_v60 = vmax.f32 %v4421_v46, 0.0  ;;  %4621 = vst [vmem:[#allocation1] ss:$4 sm:$0xff] %v4484_v18  ;;  %v4277_v61 = vadd.f32 %v4149_v62, %v4085_v24  ;;  %v4348_v20 = vmul.f32 %v7688_v16, %v4274_v43  ;;  %v3293_v51 = vadd.f32 %v3292_v15, %v3238_v8 }
 0x444   : > { %v4349_v35 = vmul.f32 %v7713_v23, %v4275_v49  ;;  %v4350_v31 = vmul.f32 %v7672_v27, %v4276_v48  ;;  %v3455_v50 = vrot.slane %v7777_v56, 6  ;;  %v3295_v45 = vadd.f32 %v3294_v12, %v3240_v2 }
 0x445   : > { %4622 = vst [vmem:[#allocation1 + $0x1] ss:$4 sm:$0xff] %v4485_v60  ;;  %v4351_v0 = vmul.f32 %v7685_v41, %v4277_v61  ;;  %v4422_v33 = vadd.f32 %v7710_v28, %v4348_v20  ;;  %v3347_v17 = vadd.f32 %v3346_v14, %v3293_v51  ;;  %v3202_v9 = vadd.f32 %v3201_v38, %v7455_v42  ;;  %v3348_v14 = vpop.f32.mrf.mxu1 }
 0x446   : > { %v4423_v36 = vadd.f32 %v7754_v59, %v4349_v35  ;;  %v4424_v8 = vadd.f32 %v7677_v52, %v4350_v31  ;;  %v7864_v15 = vsel %vm1306_vm6, %v7489_v47, %v3455_v50  ;;  %v7868_v56 = vsel %vm3474_vm13, %v7489_v47, %v3455_v50 }
 0x447   : > { %v4620_v10 = vld.sshfl [vmem:[#allocation1 + $0x20] sm:$0xff pattern:$0x73625140]  ;;  %v4425_v25 = vadd.f32 %v7701_v37, %v4351_v0  ;;  %v4486_v39 = vmax.f32 %v4422_v33, 0.0  ;;  %v3444_v30 = vrot.slane %v3347_v17, 4  ;;  %v7873_v42 = vsel %vm3479_vm14, %v7489_v47, %v3455_v50  ;;  %v7905_v0 = vpop.f32.mrf.mxu3 }
 0x448   : > { %4709 = vst.msk [vmem:[%s6086_s14 + $0x8] sm:$0xff] %vm4707_vm10, %v4620_v10  ;;  %v4487_v34 = vmax.f32 %v4423_v36, 0.0  ;;  %v4488_v11 = vmax.f32 %v4424_v8, 0.0  ;;  %v7879_v63 = vsel %vm581_vm1, %v3455_v50, %v7489_v47  ;;  %v3349_v1 = vadd.f32 %v3348_v14, %v3295_v45 }
 0x449   : > { %v4489_v58 = vmax.f32 %v4425_v25, 0.0  ;;  %4623 = vst [vmem:[#allocation1 + $0x2] ss:$4 sm:$0xff] %v4486_v39  ;;  %v3520_v29 = vsel %vm3472_vm4, %v7592_v21, %v3444_v30  ;;  %v3522_v13 = vsel %vm3476_vm5, %v7596_v26, %v3444_v30  ;;  %v3525_v24 = vsel %vm3472_vm4, %v3444_v30, %v7600_v4  ;;  %v3204_v39 = vpop.f32.mrf.mxu2 }
 0x44a   : > { %4624 = vst [vmem:[#allocation1 + $0x3] ss:$4 sm:$0xff] %v4487_v34  ;;  %v3523_v32 = vrot.slane %v3522_v13, 2  ;;  %v3526_v46 = vrot.slane %v3525_v24, 4  ;;  %v3528_v18 = vsel %vm3476_vm5, %v3444_v30, %v7604_v22  ;;  %v3789_v47 = vrot.slane %v3520_v29, 7 }
 0x44b   : > { %4625 = vst [vmem:[#allocation1 + $0x20] ss:$4 sm:$0xff] %v4488_v11  ;;  %v3529_v62 = vrot.slane %v3528_v18, 6  ;;  %v4150_v43 = vrot.slane %v3520_v29, 4  ;;  %v3446_v2 = vrot.slane %v3349_v1, 4  ;;  %v7889_v49 = vrot.slane %v3202_v9, 6 }
 0x44c   : > { %4626 = vst [vmem:[#allocation1 + $0x21] ss:$4 sm:$0xff] %v4489_v58  ;;  %v3790_v21 = vsel %vm7705_vm9, %v7831_v57, %v3789_v47  ;;  %v3791_v26 = vrot.slane %v3789_v47, 2  ;;  %v3792_v4 = vrot.slane %v3523_v32, 7  ;;  %v5261_v48 = vrot.slane %v3526_v46, 9 }
 0x44d   : > { %v3796_v38 = vrot.slane %v3529_v62, 7  ;;  %v3958_v60 = vrot.slane %v3790_v21, 2  ;;  %v4151_v61 = vrot.slane %v3523_v32, 4  ;;  %v4152_v20 = vrot.slane %v3529_v62, 4 }
 0x44e   : > { %v3793_v22 = vsel %vm7705_vm9, %v3791_v26, %v3792_v4  ;;  %v3531_v51 = vsel %vm3472_vm4, %v7614_v44, %v3446_v2  ;;  %v3533_v12 = vsel %vm3476_vm5, %v7618_v54, %v3446_v2  ;;  %v3536_v35 = vsel %vm3472_vm4, %v3446_v2, %v7622_v55  ;;  %v3297_v54 = vpop.f32.mrf.mxu0 }
 0x44f   : > { %v3797_v57 = vsel %vm7705_vm9, %v5261_v48, %v3796_v38  ;;  %v3798_v31 = vrot.slane %v3796_v38, 2  ;;  %v3959_v50 = vrot.slane %v3793_v22, 2  ;;  %v4086_v45 = vadd.f32 %v3958_v60, %v7816_v3 }
 0x450   : > { %v3960_v33 = vrot.slane %v3797_v57, 2  ;;  %v3534_v17 = vrot.slane %v3533_v12, 2  ;;  %v3537_v9 = vrot.slane %v3536_v35, 4  ;;  %v3539_v44 = vsel %vm3476_vm5, %v3446_v2, %v7626_v6  ;;  %v3351_v2 = vpop.f32.mrf.mxu1 }
 0x451   : > { %v4629_v36 = vld.sshfl [vmem:[#allocation1] sm:$0xff pattern:$0x73625140]  ;;  %v4087_v8 = vadd.f32 %v3959_v50, %v3520_v29  ;;  %v4278_v55 = vadd.f32 %v4150_v43, %v4086_v45  ;;  %v7909_v10 = vrot.slane %v3539_v44, 6  ;;  %v3799_v25 = vrot.slane %v3531_v51, 7  ;;  %v3245_v44 = vpop.f32.mrf.mxu3 }
 0x452   : > { %4710 = vst.msk [vmem:[%s6086_s14 + $0x10] sm:$0xff] %vm4707_vm10, %v4629_v36  ;;  %v4088_v30 = vadd.f32 %v3960_v33, %v3526_v46  ;;  %v3802_v3 = vrot.slane %v3534_v17, 7  ;;  %v3805_v14 = vrot.slane %v3537_v9, 7  ;;  %v4153_v34 = vrot.slane %v3531_v51, 4 }
 0x453   : > { %v4279_v11 = vadd.f32 %v4151_v61, %v4087_v8  ;;  %v4352_v1 = vmul.f32 %v7688_v16, %v4278_v55  ;;  %v3800_v6 = vsel %vm7705_vm9, %v3798_v31, %v3799_v25  ;;  %v3801_v58 = vrot.slane %v3799_v25, 2 }
 0x454   : > { %v4280_v13 = vadd.f32 %v4152_v20, %v4088_v30  ;;  %v3804_v29 = vrot.slane %v3802_v3, 2  ;;  %v3807_v24 = vrot.slane %v3805_v14, 2  ;;  %v3808_v32 = vrot.slane %v7909_v10, 7 }
 0x455   : > { %v4353_v18 = vmul.f32 %v7713_v23, %v4279_v11  ;;  %v4426_v47 = vadd.f32 %v7710_v28, %v4352_v1  ;;  %v3803_v46 = vsel %vm7705_vm9, %v3801_v58, %v3802_v3  ;;  %v3961_v43 = vrot.slane %v3800_v6, 2  ;;  %v8566_v11 = vld [vmem:[#allocation12_spill] sm:$0xff] }
 0x456   : > { %v4354_v21 = vmul.f32 %v7672_v27, %v4280_v13  ;;  %v3806_v26 = vsel %vm7705_vm9, %v3804_v29, %v3805_v14  ;;  %v3809_v4 = vsel %vm7705_vm9, %v3807_v24, %v3808_v32  ;;  %v7926_v48 = vrot.slane %v3808_v32, 2  ;;  %v3299_v30 = vpop.f32.mrf.mxu0  ;;  %v8567_v24 = vld [vmem:[#allocation8_spill] sm:$0xff] }
 0x457   : > { %v4427_v38 = vadd.f32 %v7754_v59, %v4353_v18  ;;  %v4490_v60 = vmax.f32 %v4426_v47, 0.0  ;;  %v3962_v61 = vrot.slane %v3803_v46, 2  ;;  %v3963_v20 = vrot.slane %v3806_v26, 2 }
 0x458   : > { %v4428_v22 = vadd.f32 %v7677_v52, %v4354_v21  ;;  %v3964_v12 = vrot.slane %v3809_v4, 2  ;;  %v4089_v35 = vadd.f32 %v3961_v43, %v3529_v62  ;;  %v4154_v57 = vrot.slane %v3534_v17, 4  ;;  %v8568_v43 = vld [vmem:[#allocation9_spill] sm:$0xff] }
 0x459   : > { %v4491_v31 = vmax.f32 %v4427_v38, 0.0  ;;  %4627 = vst [vmem:[#allocation1 + $0x22] ss:$4 sm:$0xff] %v4490_v60  ;;  %v4090_v50 = vadd.f32 %v3962_v61, %v3531_v51  ;;  %v4091_v45 = vadd.f32 %v3963_v20, %v3534_v17  ;;  %v4155_v33 = vrot.slane %v3537_v9, 4  ;;  %v3206_v17 = vpop.f32.mrf.mxu2  ;;  %v3353_v38 = vpop.f32.mrf.mxu1 }
 0x45a   : > { %v4492_v36 = vmax.f32 %v4428_v22, 0.0  ;;  %v4092_v8 = vadd.f32 %v3964_v12, %v3537_v9  ;;  %v4156_v55 = vrot.slane %v7909_v10, 4  ;;  %v4281_v25 = vadd.f32 %v4153_v34, %v4089_v35  ;;  %v8569_v35 = vld [vmem:[#allocation14_spill] sm:$0xff] }
 0x45b   : > { %4628 = vst [vmem:[#allocation1 + $0x23] ss:$4 sm:$0xff] %v4491_v31  ;;  %v4282_v3 = vadd.f32 %v4154_v57, %v4090_v50  ;;  %v4283_v14 = vadd.f32 %v4155_v33, %v4091_v45  ;;  %v7934_v62 = vsel %vm1306_vm6, %v8566_v11, %v7889_v49  ;;  %v7939_v51 = vsel %vm3474_vm13, %v8566_v11, %v7889_v49 }
 0x45c   : > { %4631 = vst [vmem:[#allocation1] ss:$4 sm:$0xff] %v4492_v36  ;;  %v4284_v9 = vadd.f32 %v4156_v55, %v4092_v8  ;;  %v4355_v1 = vmul.f32 %v7685_v41, %v4281_v25  ;;  %v7945_v34 = vsel %vm3479_vm14, %v8566_v11, %v7889_v49  ;;  %v7950_v6 = vsel %vm581_vm1, %v7889_v49, %v8566_v11  ;;  %v8571_v8 = vld [vmem:[#allocation21_spill] sm:$0xff]  ;;  %v8572_v25 = vld [vmem:[#allocation22_spill] sm:$0xff]  ;;  %v7992_v11 = vpop.f32.mrf.mxu3 }
 0x45d   : > { %v4356_v58 = vmul.f32 %v7688_v16, %v4282_v3  ;;  %v4357_v13 = vmul.f32 %v7713_v23, %v4283_v14  ;;  %v3298_v29 = vadd.f32 %v3297_v54, %v7905_v0  ;;  %v3205_v32 = vadd.f32 %v3204_v39, %v8567_v24  ;;  %v8573_v3 = vld [vmem:[#allocation23_spill] sm:$0xff] }
 0x45e   : > { %v4358_v18 = vmul.f32 %v7672_v27, %v4284_v9  ;;  %v4429_v47 = vadd.f32 %v7701_v37, %v4355_v1  ;;  %v3300_v46 = vadd.f32 %v3299_v30, %v3245_v44  ;;  %v3207_v21 = vadd.f32 %v3206_v17, %v8568_v43  ;;  %v8570_v44 = vld [vmem:[#allocation20_spill] sm:$0xff] }
 0x45f   : > { %v4430_v26 = vadd.f32 %v7710_v28, %v4356_v58  ;;  %v4431_v49 = vadd.f32 %v7754_v59, %v4357_v13  ;;  %v3352_v4 = vadd.f32 %v3351_v2, %v3298_v29  ;;  %v3459_v60 = vrot.slane %v3205_v32, 6  ;;  %v7995_v13 = vpop.f32.mrf.mxu0  ;;  %v8574_v32 = vld [vmem:[#allocation16_spill] sm:$0xff] }
 0x460   : > { %v4432_v61 = vadd.f32 %v7677_v52, %v4358_v18  ;;  %v4493_v0 = vmax.f32 %v4429_v47, 0.0  ;;  %v3354_v54 = vadd.f32 %v3353_v38, %v3300_v46  ;;  %v7962_v39 = vrot.slane %v3207_v21, 6 }
 0x461   : > { %v4494_v20 = vmax.f32 %v4430_v26, 0.0  ;;  %v4495_v22 = vmax.f32 %v4431_v49, 0.0  ;;  %v3448_v12 = vrot.slane %v3352_v4, 4  ;;  %v7966_v57 = vsel %vm1306_vm6, %v8569_v35, %v3459_v60 }
 0x462   : > { %v4630_v31 = vld.sshfl [vmem:[#allocation1 + $0x20] sm:$0xff pattern:$0x73625140]  ;;  %v4496_v50 = vmax.f32 %v4432_v61, 0.0  ;;  %4632 = vst [vmem:[#allocation1 + $0x1] ss:$4 sm:$0xff] %v4493_v0  ;;  %v7970_v2 = vsel %vm3474_vm13, %v8569_v35, %v3459_v60  ;;  %v7974_v45 = vsel %vm3479_vm14, %v8569_v35, %v3459_v60  ;;  %v7978_v33 = vsel %vm581_vm1, %v3459_v60, %v8569_v35 }
 0x463   : > { %4711 = vst.msk [vmem:[%s6086_s14 + $0x18] sm:$0xff] %vm4707_vm10, %v4630_v31  ;;  %v3542_v36 = vsel %vm3472_vm4, %v8570_v44, %v3448_v12  ;;  %v3544_v55 = vsel %vm3476_vm5, %v8571_v8, %v3448_v12  ;;  %v3547_v30 = vsel %vm3472_vm4, %v3448_v12, %v8572_v25  ;;  %v7990_v14 = vsel %vm3476_vm5, %v3448_v12, %v8573_v3  ;;  %v8579_v25 = vld [vmem:[#allocation28_spill] sm:$0xff] }
 0x464   : > { %4633 = vst [vmem:[#allocation1 + $0x2] ss:$4 sm:$0xff] %v4494_v20  ;;  %v3545_v17 = vrot.slane %v3544_v55, 2  ;;  %v3548_v9 = vrot.slane %v3547_v30, 4  ;;  %v3551_v1 = vrot.slane %v7990_v14, 6  ;;  %v3811_v58 = vrot.slane %v3542_v36, 7  ;;  %v3209_v14 = vpop.f32.mrf.mxu2 }
 0x465   : > { %4634 = vst [vmem:[#allocation1 + $0x3] ss:$4 sm:$0xff] %v4495_v22  ;;  %v4157_v29 = vrot.slane %v3542_v36, 4  ;;  %v3450_v24 = vrot.slane %v3354_v54, 4  ;;  %v8000_v18 = vsel %vm1306_vm6, %v8574_v32, %v7962_v39  ;;  %v8005_v47 = vsel %vm3474_vm13, %v8574_v32, %v7962_v39  ;;  %v8576_v54 = vld [vmem:[#allocation25_spill] sm:$0xff]  ;;  %v8577_v22 = vld [vmem:[#allocation26_spill] sm:$0xff] }
 0x466   : > { %8575 = vst [vmem:[#allocation12_spill] sm:$0xff] %v8005_v47  ;;  %v3812_v46 = vsel %vm7705_vm9, %v7926_v48, %v3811_v58  ;;  %v3813_v43 = vrot.slane %v3811_v58, 2  ;;  %v3814_v21 = vrot.slane %v3545_v17, 7  ;;  %v3817_v26 = vrot.slane %v3548_v9, 7 }
 0x467   : > { %4635 = vst [vmem:[#allocation1 + $0x20] ss:$4 sm:$0xff] %v4496_v50  ;;  %v5262_v49 = vrot.slane %v3551_v1, 9  ;;  %v3965_v4 = vrot.slane %v3812_v46, 2  ;;  %v4158_v38 = vrot.slane %v3545_v17, 4  ;;  %v4159_v60 = vrot.slane %v3548_v9, 4 }
 0x468   : > { %v3815_v61 = vsel %vm7705_vm9, %v3813_v43, %v3814_v21  ;;  %v3816_v0 = vrot.slane %v3814_v21, 2  ;;  %v3553_v20 = vsel %vm3472_vm4, %v8576_v54, %v3450_v24  ;;  %v3555_v12 = vsel %vm3476_vm5, %v8577_v22, %v3450_v24  ;;  %v8578_v50 = vld [vmem:[#allocation27_spill] sm:$0xff] }
 0x469   : > { %v3966_v35 = vrot.slane %v3815_v61, 2  ;;  %v4093_v48 = vadd.f32 %v3965_v4, %v7909_v10  ;;  %v3556_v31 = vrot.slane %v3555_v12, 2  ;;  %v3558_v44 = vsel %vm3472_vm4, %v3450_v24, %v8578_v50  ;;  %v3250_v12 = vpop.f32.mrf.mxu3  ;;  %v3356_v50 = vpop.f32.mrf.mxu1 }
 0x46a   : > { %v3818_v8 = vsel %vm7705_vm9, %v3816_v0, %v3817_v26  ;;  %v3559_v55 = vrot.slane %v3558_v44, 4  ;;  %v3561_v30 = vsel %vm3476_vm5, %v3450_v24, %v8579_v25  ;;  %v3821_v3 = vrot.slane %v3553_v20, 7 }
 0x46b   : > { %v3967_v9 = vrot.slane %v3818_v8, 2  ;;  %v4094_v58 = vadd.f32 %v3966_v35, %v3542_v36  ;;  %v4285_v46 = vadd.f32 %v4157_v29, %v4093_v48  ;;  %v8023_v43 = vrot.slane %v3561_v30, 6 }
 0x46c   : > { %v4639_v10 = vld.sshfl [vmem:[#allocation1] sm:$0xff pattern:$0x73625140]  ;;  %v3822_v21 = vsel %vm7705_vm9, %v5262_v49, %v3821_v3  ;;  %v3823_v4 = vrot.slane %v3821_v3, 2  ;;  %v3824_v61 = vrot.slane %v3556_v31, 7  ;;  %v3827_v54 = vrot.slane %v3559_v55, 7  ;;  %v3304_v49 = vpop.f32.mrf.mxu0 }
 0x46d   : > { %4712 = vst.msk [vmem:[%s6086_s14 + $0x20] sm:$0xff] %vm4707_vm10, %v4639_v10  ;;  %v4095_v26 = vadd.f32 %v3967_v9, %v3545_v17  ;;  %v4286_v0 = vadd.f32 %v4158_v38, %v4094_v58  ;;  %v4359_v24 = vmul.f32 %v7685_v41, %v4285_v46  ;;  %v3830_v22 = vrot.slane %v8023_v43, 7 }
 0x46e   : > { %v3825_v36 = vsel %vm7705_vm9, %v3823_v4, %v3824_v61  ;;  %v3826_v29 = vrot.slane %v3824_v61, 2  ;;  %v3829_v35 = vrot.slane %v3827_v54, 2  ;;  %v3968_v48 = vrot.slane %v3822_v21, 2 }
 0x46f   : > { %v4287_v44 = vadd.f32 %v4159_v60, %v4095_v26  ;;  %v4360_v8 = vmul.f32 %v7688_v16, %v4286_v0  ;;  %v4433_v25 = vadd.f32 %v7701_v37, %v4359_v24  ;;  %v8035_v17 = vrot.slane %v3830_v22, 2 }
 0x470   : > { %v3828_v38 = vsel %vm7705_vm9, %v3826_v29, %v3827_v54  ;;  %v3831_v30 = vsel %vm7705_vm9, %v3829_v35, %v3830_v22  ;;  %v3969_v3 = vrot.slane %v3825_v36, 2  ;;  %v4096_v9 = vadd.f32 %v3968_v48, %v3551_v1  ;;  %v3211_v35 = vpop.f32.mrf.mxu2 }
 0x471   : > { %v4361_v58 = vmul.f32 %v7713_v23, %v4287_v44  ;;  %v4434_v46 = vadd.f32 %v7710_v28, %v4360_v8  ;;  %v4497_v10 = vmax.f32 %v4433_v25, 0.0  ;;  %v3970_v60 = vrot.slane %v3828_v38, 2 }
 0x472   : > { %v3971_v21 = vrot.slane %v3831_v30, 2  ;;  %v4097_v4 = vadd.f32 %v3969_v3, %v3553_v20  ;;  %v4160_v61 = vrot.slane %v3553_v20, 4  ;;  %v4161_v26 = vrot.slane %v3556_v31, 4  ;;  %v8580_v3 = vld [vmem:[#allocation10_spill] sm:$0xff] }
 0x473   : > { %v4435_v0 = vadd.f32 %v7754_v59, %v4361_v58  ;;  %v4498_v24 = vmax.f32 %v4434_v46, 0.0  ;;  %4636 = vst [vmem:[#allocation1 + $0x21] ss:$4 sm:$0xff] %v4497_v10  ;;  %v4098_v54 = vadd.f32 %v3970_v60, %v3556_v31  ;;  %v4162_v29 = vrot.slane %v3559_v55, 4  ;;  %v8581_v46 = vld [vmem:[#allocation11_spill] sm:$0xff]  ;;  %v8062_v60 = vpop.f32.mrf.mxu3 }
 0x474   : > { %v4099_v47 = vadd.f32 %v3971_v21, %v3559_v55  ;;  %v4163_v22 = vrot.slane %v8023_v43, 4  ;;  %v4288_v1 = vadd.f32 %v4160_v61, %v4096_v9  ;;  %v4289_v36 = vadd.f32 %v4161_v26, %v4097_v4  ;;  %v3358_v21 = vpop.f32.mrf.mxu1  ;;  %v8067_v4 = vpop.f32.mrf.mxu0 }
 0x475   : > { %v4499_v48 = vmax.f32 %v4435_v0, 0.0  ;;  %4637 = vst [vmem:[#allocation1 + $0x22] ss:$4 sm:$0xff] %v4498_v24  ;;  %v4290_v44 = vadd.f32 %v4162_v29, %v4098_v54  ;;  %v8048_v20 = vsel %vm3479_vm14, %v8574_v32, %v7962_v39  ;;  %v8053_v8 = vsel %vm581_vm1, %v7962_v39, %v8574_v32  ;;  %v8582_v54 = vld [vmem:[#allocation17_spill] sm:$0xff] }
 0x476   : > { %v4291_v31 = vadd.f32 %v4163_v22, %v4099_v47  ;;  %v4362_v55 = vmul.f32 %v7672_v27, %v4288_v1  ;;  %v4363_v25 = vmul.f32 %v7685_v41, %v4289_v36  ;;  %v3303_v38 = vadd.f32 %v7995_v13, %v7992_v11  ;;  %v8583_v1 = vld [vmem:[#allocation29_spill] sm:$0xff] }
 0x477   : > { %4638 = vst [vmem:[#allocation1 + $0x23] ss:$4 sm:$0xff] %v4499_v48  ;;  %v4364_v30 = vmul.f32 %v7688_v16, %v4290_v44  ;;  %v3210_v9 = vadd.f32 %v3209_v14, %v8580_v3  ;;  %v3305_v58 = vadd.f32 %v3304_v49, %v3250_v12  ;;  %v3212_v10 = vadd.f32 %v3211_v35, %v8581_v46  ;;  %v8584_v35 = vld [vmem:[#allocation30_spill] sm:$0xff]  ;;  %v8585_v44 = vld [vmem:[#allocation31_spill] sm:$0xff] }
 0x478   : > { %v4365_v39 = vmul.f32 %v7713_v23, %v4291_v31  ;;  %v4436_v32 = vadd.f32 %v7677_v52, %v4362_v55  ;;  %v4437_v27 = vadd.f32 %v7701_v37, %v4363_v25  ;;  %v3357_v47 = vadd.f32 %v3356_v50, %v3303_v38  ;;  %v8586_v38 = vld [vmem:[#allocation32_spill] sm:$0xff] }
 0x479   : > { %v4438_v11 = vadd.f32 %v7710_v28, %v4364_v30  ;;  %v3463_v13 = vrot.slane %v3210_v9, 6  ;;  %v3359_v61 = vadd.f32 %v3358_v21, %v3305_v58  ;;  %v3465_v14 = vrot.slane %v3212_v10, 6  ;;  %v8587_v10 = vld [vmem:[#allocation18_spill] sm:$0xff] }
 0x47a   : > { %v4439_v12 = vadd.f32 %v7754_v59, %v4365_v39  ;;  %v4500_v49 = vmax.f32 %v4436_v32, 0.0  ;;  %v4501_v26 = vmax.f32 %v4437_v27, 0.0  ;;  %v3452_v0 = vrot.slane %v3357_v47, 4 }
 0x47b   : > { %v4502_v24 = vmax.f32 %v4438_v11, 0.0  ;;  %v8073_v52 = vsel %vm1306_vm6, %v8582_v54, %v3463_v13  ;;  %v8077_v50 = vsel %vm3474_vm13, %v8582_v54, %v3463_v13  ;;  %v8081_v29 = vsel %vm3479_vm14, %v8582_v54, %v3463_v13 }
 0x47c   : > { %v4503_v22 = vmax.f32 %v4439_v12, 0.0  ;;  %4641 = vst [vmem:[#allocation1] ss:$4 sm:$0xff] %v4500_v49  ;;  %v3564_v36 = vsel %vm3472_vm4, %v8583_v1, %v3452_v0  ;;  %v3566_v48 = vsel %vm3476_vm5, %v8584_v35, %v3452_v0  ;;  %v3569_v31 = vsel %vm3472_vm4, %v3452_v0, %v8585_v44  ;;  %v8110_v35 = vpop.f32.mrf.mxu3 }
 0x47d   : > { %4642 = vst [vmem:[#allocation1 + $0x1] ss:$4 sm:$0xff] %v4501_v26  ;;  %v3567_v55 = vrot.slane %v3566_v48, 2  ;;  %v3570_v25 = vrot.slane %v3569_v31, 4  ;;  %v3572_v30 = vsel %vm3476_vm5, %v3452_v0, %v8586_v38  ;;  %v3833_v3 = vrot.slane %v3564_v36, 7  ;;  %v8113_v38 = vpop.f32.mrf.mxu0 }
 0x47e   : > { %v4640_v9 = vld.sshfl [vmem:[#allocation1 + $0x20] sm:$0xff pattern:$0x73625140]  ;;  %4643 = vst [vmem:[#allocation1 + $0x2] ss:$4 sm:$0xff] %v4502_v24  ;;  %v3573_v58 = vrot.slane %v3572_v30, 6  ;;  %v8093_v46 = vsel %vm581_vm1, %v3463_v13, %v8582_v54  ;;  %v8097_v39 = vsel %vm1306_vm6, %v8587_v10, %v3465_v14  ;;  %v8101_v32 = vsel %vm3474_vm13, %v8587_v10, %v3465_v14 }
 0x47f   : > { %8588 = vst [vmem:[#allocation8_spill] sm:$0xff] %v8097_v39  ;;  %v3834_v27 = vsel %vm7705_vm9, %v8035_v17, %v3833_v3  ;;  %v3835_v47 = vrot.slane %v3833_v3, 2  ;;  %v3836_v21 = vrot.slane %v3567_v55, 7  ;;  %v3839_v11 = vrot.slane %v3570_v25, 7 }
 0x480   : > { %8589 = vst [vmem:[#allocation9_spill] sm:$0xff] %v8101_v32  ;;  %v3842_v13 = vrot.slane %v3573_v58, 7  ;;  %v3972_v12 = vrot.slane %v3834_v27, 2  ;;  %v4164_v49 = vrot.slane %v3564_v36, 4  ;;  %v4165_v26 = vrot.slane %v3567_v55, 4  ;;  %v3214_v27 = vpop.f32.mrf.mxu2 }
 0x481   : > { %4713 = vst.msk [vmem:[%s6086_s14 + $0x28] sm:$0xff] %vm4707_vm10, %v4640_v9  ;;  %v3837_v0 = vsel %vm7705_vm9, %v3835_v47, %v3836_v21  ;;  %v3838_v24 = vrot.slane %v3836_v21, 2  ;;  %v3841_v54 = vrot.slane %v3839_v11, 2  ;;  %v4166_v1 = vrot.slane %v3570_v25, 4 }
 0x482   : > { %4644 = vst [vmem:[#allocation1 + $0x3] ss:$4 sm:$0xff] %v4503_v22  ;;  %v3973_v48 = vrot.slane %v3837_v0, 2  ;;  %v4100_v44 = vadd.f32 %v3972_v12, %v8023_v43  ;;  %v4167_v17 = vrot.slane %v3573_v58, 4  ;;  %v3454_v31 = vrot.slane %v3359_v61, 4 }
 0x483   : > { %v3840_v22 = vsel %vm7705_vm9, %v3838_v24, %v3839_v11  ;;  %v3843_v30 = vsel %vm7705_vm9, %v3841_v54, %v3842_v13  ;;  %v8121_v3 = vsel %vm3479_vm14, %v8587_v10, %v3465_v14  ;;  %v8125_v9 = vsel %vm581_vm1, %v3465_v14, %v8587_v10  ;;  %v3361_v14 = vpop.f32.mrf.mxu1 }
 0x484   : > { %8590 = vst [vmem:[#allocation14_spill] sm:$0xff] %v8121_v3  ;;  %v3974_v43 = vrot.slane %v3840_v22, 2  ;;  %v3975_v58 = vrot.slane %v3843_v30, 2  ;;  %v4101_v61 = vadd.f32 %v3973_v48, %v3564_v36  ;;  %v4292_v47 = vadd.f32 %v4164_v49, %v4100_v44  ;;  %v8138_v36 = vld [vmem:[%s8489_s5] ss:$0 sm:$0xff] }
 0x485   : > { %8591 = vst [vmem:[#allocation20_spill] sm:$0xff] %v8125_v9  ;;  %v3575_v21 = vsel %vm3472_vm4, %v7784_v19, %v3454_v31  ;;  %v3577_v11 = vsel %vm3476_vm5, %v7789_v53, %v3454_v31  ;;  %v3580_v13 = vsel %vm3472_vm4, %v3454_v31, %v7846_v40  ;;  %v3583_v12 = vsel %vm3476_vm5, %v3454_v31, %v7851_v7 }
 0x486   : > { %v4102_v10 = vadd.f32 %v3974_v43, %v3567_v55  ;;  %v4103_v0 = vadd.f32 %v3975_v58, %v3570_v25  ;;  %v4293_v24 = vadd.f32 %v4165_v26, %v4101_v61  ;;  %v4366_v19 = vmul.f32 %v8138_v36, %v4292_v47  ;;  %v8151_v26 = vld [vmem:[%s8490_s6] ss:$0 sm:$0xff] }
 0x487   : > { %v3578_v54 = vrot.slane %v3577_v11, 2  ;;  %v3581_v53 = vrot.slane %v3580_v13, 4  ;;  %v8141_v48 = vrot.slane %v3583_v12, 6  ;;  %v3308_v40 = vadd.f32 %v8067_v4, %v8062_v60  ;;  %v3258_v13 = vpop.f32.mrf.mxu3 }
 0x488   : > { %v4294_v7 = vadd.f32 %v4166_v1, %v4102_v10  ;;  %v4295_v55 = vadd.f32 %v4167_v17, %v4103_v0  ;;  %v4367_v25 = vmul.f32 %v7685_v41, %v4293_v24  ;;  %v4440_v44 = vadd.f32 %v8151_v26, %v4366_v19  ;;  %v3312_v19 = vpop.f32.mrf.mxu0 }
 0x489   : > { %v4649_v49 = vld.sshfl [vmem:[#allocation1] sm:$0xff pattern:$0x73625140]  ;;  %v5263_v31 = vrot.slane %v3575_v21, 9  ;;  %v3846_v22 = vrot.slane %v3578_v54, 7  ;;  %v3849_v30 = vrot.slane %v3581_v53, 7 }
 0x48a   : > { %4714 = vst.msk [vmem:[%s6086_s14 + $0x30] sm:$0xff] %vm4707_vm10, %v4649_v49  ;;  %v3852_v43 = vrot.slane %v8141_v48, 7  ;;  %v4368_v60 = vmul.f32 %v7688_v16, %v4294_v7  ;;  %v4369_v4 = vmul.f32 %v7713_v23, %v4295_v55  ;;  %v4441_v1 = vadd.f32 %v7701_v37, %v4367_v25 }
 0x48b   : > { %v4504_v17 = vmax.f32 %v4440_v44, 0.0  ;;  %v3847_v58 = vsel %vm7705_vm9, %v5263_v31, %v3846_v22  ;;  %v3848_v61 = vrot.slane %v3846_v22, 2  ;;  %v3851_v47 = vrot.slane %v3849_v30, 2  ;;  %v3216_v44 = vpop.f32.mrf.mxu2 }
 0x48c   : > { %v3854_v11 = vrot.slane %v3852_v43, 2  ;;  %v4442_v12 = vadd.f32 %v7710_v28, %v4368_v60  ;;  %v4443_v10 = vadd.f32 %v7754_v59, %v4369_v4  ;;  %v4505_v0 = vmax.f32 %v4441_v1, 0.0 }
 0x48d   : > { %4645 = vst [vmem:[#allocation1 + $0x20] ss:$4 sm:$0xff] %v4504_v17  ;;  %v3976_v24 = vrot.slane %v3847_v58, 2  ;;  %v3850_v49 = vsel %vm7705_vm9, %v3848_v61, %v3849_v30  ;;  %v3853_v7 = vsel %vm7705_vm9, %v3851_v47, %v3852_v43  ;;  %v4168_v55 = vrot.slane %v3578_v54, 4  ;;  %v3363_v17 = vpop.f32.mrf.mxu1  ;;  %v8592_v58 = vld [vmem:[#allocation13_spill] sm:$0xff]  ;;  %v8593_v47 = vld [vmem:[#allocation15_spill] sm:$0xff] }
 0x48e   : > { %v4169_v25 = vrot.slane %v3581_v53, 4  ;;  %v4506_v31 = vmax.f32 %v4442_v12, 0.0  ;;  %v4507_v22 = vmax.f32 %v4443_v10, 0.0  ;;  %4646 = vst [vmem:[#allocation1 + $0x21] ss:$4 sm:$0xff] %v4505_v0  ;;  %v3977_v9 = vrot.slane %v3850_v49, 2 }
 0x48f   : > { %v3978_v60 = vrot.slane %v3853_v7, 2  ;;  %v4104_v3 = vadd.f32 %v3976_v24, %v3575_v21  ;;  %v4170_v4 = vrot.slane %v8141_v48, 4  ;;  %v3362_v1 = vadd.f32 %v3361_v14, %v3308_v40 }
 0x490   : > { %v3215_v32 = vadd.f32 %v3214_v27, %v8592_v58  ;;  %4647 = vst [vmem:[#allocation1 + $0x22] ss:$4 sm:$0xff] %v4506_v31  ;;  %v4105_v30 = vadd.f32 %v3977_v9, %v3578_v54  ;;  %v3310_v43 = vadd.f32 %v8113_v38, %v8110_v35  ;;  %v3217_v39 = vadd.f32 %v3216_v44, %v8593_v47  ;;  %v8193_v44 = vpop.f32.mrf.mxu0 }
 0x491   : > { %v4106_v61 = vadd.f32 %v3978_v60, %v3581_v53  ;;  %4648 = vst [vmem:[#allocation1 + $0x23] ss:$4 sm:$0xff] %v4507_v22  ;;  %v4296_v12 = vadd.f32 %v4168_v55, %v4104_v3  ;;  %v3456_v10 = vrot.slane %v3362_v1, 4  ;;  %v8171_v49 = vadd.f32 %v3312_v19, %v3258_v13 }
 0x492   : > { %v3467_v0 = vrot.slane %v3215_v32, 6  ;;  %v4297_v21 = vadd.f32 %v4169_v25, %v4105_v30  ;;  %v3364_v14 = vadd.f32 %v3363_v17, %v3310_v43  ;;  %v8173_v40 = vrot.slane %v3217_v39, 6  ;;  %v8594_v30 = vld [vmem:[#allocation19_spill] sm:$0xff] }
 0x493   : > { %v4298_v24 = vadd.f32 %v4170_v4, %v4106_v61  ;;  %v4370_v27 = vmul.f32 %v8138_v36, %v4296_v12  ;;  %v3586_v9 = vsel %vm3472_vm4, %v7864_v15, %v3456_v10  ;;  %v3588_v35 = vsel %vm3476_vm5, %v7868_v56, %v3456_v10  ;;  %v8187_v15 = vpop.f32.mrf.mxu3 }
 0x494   : > { %v3591_v38 = vsel %vm3472_vm4, %v3456_v10, %v7873_v42  ;;  %v4371_v32 = vmul.f32 %v7685_v41, %v4297_v21  ;;  %v3589_v54 = vrot.slane %v3588_v35, 2  ;;  %v3594_v13 = vsel %vm3476_vm5, %v3456_v10, %v7879_v63 }
 0x495   : > { %v4372_v3 = vmul.f32 %v7688_v16, %v4298_v24  ;;  %v3592_v53 = vrot.slane %v3591_v38, 4  ;;  %v4444_v39 = vadd.f32 %v8151_v26, %v4370_v27  ;;  %v3855_v19 = vrot.slane %v3586_v9, 7 }
 0x496   : > { %v4171_v7 = vrot.slane %v3586_v9, 4  ;;  %v4445_v56 = vadd.f32 %v7701_v37, %v4371_v32  ;;  %v8191_v55 = vrot.slane %v3594_v13, 6  ;;  %v3858_v25 = vrot.slane %v3589_v54, 7 }
 0x497   : > { %v4446_v42 = vadd.f32 %v7710_v28, %v4372_v3  ;;  %v4508_v31 = vmax.f32 %v4444_v39, 0.0  ;;  %v3856_v22 = vsel %vm7705_vm9, %v3854_v11, %v3855_v19  ;;  %v3857_v60 = vrot.slane %v3855_v19, 2  ;;  %v8206_v11 = vpop.f32.mrf.mxu1 }
 0x498   : > { %v3861_v63 = vrot.slane %v3592_v53, 7  ;;  %v4650_v4 = vld.sshfl [vmem:[#allocation1 + $0x20] sm:$0xff pattern:$0x73625140]  ;;  %v4509_v1 = vmax.f32 %v4445_v56, 0.0  ;;  %v3860_v58 = vrot.slane %v3858_v25, 2  ;;  %v8199_v61 = vsel %vm1306_vm6, %v8594_v30, %v3467_v0 }
 0x499   : > { %v4510_v17 = vmax.f32 %v4446_v42, 0.0  ;;  %4715 = vst.msk [vmem:[%s6086_s14 + $0x38] sm:$0xff] %vm4707_vm10, %v4650_v4  ;;  %v3859_v43 = vsel %vm7705_vm9, %v3857_v60, %v3858_v25  ;;  %v3864_v12 = vrot.slane %v8191_v55, 7  ;;  %v3979_v10 = vrot.slane %v3856_v22, 2 }
 0x49a   : > { %v3863_v47 = vrot.slane %v3861_v63, 2  ;;  %4651 = vst [vmem:[#allocation1] ss:$4 sm:$0xff] %v4508_v31  ;;  %v3862_v21 = vsel %vm7705_vm9, %v3860_v58, %v3861_v63  ;;  %v3980_v24 = vrot.slane %v3859_v43, 2  ;;  %v4172_v27 = vrot.slane %v3589_v54, 4 }
 0x49b   : > { %v4173_v35 = vrot.slane %v3592_v53, 4  ;;  %4652 = vst [vmem:[#allocation1 + $0x1] ss:$4 sm:$0xff] %v4509_v1  ;;  %v3866_v32 = vrot.slane %v3864_v12, 2  ;;  %v3981_v3 = vrot.slane %v3862_v21, 2  ;;  %v4107_v39 = vadd.f32 %v3979_v10, %v8141_v48 }
 0x49c   : > { %v3865_v38 = vsel %vm7705_vm9, %v3863_v47, %v3864_v12  ;;  %4653 = vst [vmem:[#allocation1 + $0x2] ss:$4 sm:$0xff] %v4510_v17  ;;  %v4108_v19 = vadd.f32 %v3980_v24, %v3586_v9  ;;  %v4174_v56 = vrot.slane %v8191_v55, 4  ;;  %v8216_v42 = vsel %vm3474_vm13, %v8594_v30, %v3467_v0  ;;  %v8595_v9 = vld [vmem:[#allocation24_spill] sm:$0xff]  ;;  %v3317_v47 = vpop.f32.mrf.mxu0 }
 0x49d   : > { %v3982_v13 = vrot.slane %v3865_v38, 2  ;;  %v4109_v25 = vadd.f32 %v3981_v3, %v3589_v54  ;;  %v4299_v31 = vadd.f32 %v4171_v7, %v4107_v39  ;;  %v8220_v22 = vsel %vm3479_vm14, %v8594_v30, %v3467_v0 }
 0x49e   : > { %v8224_v60 = vsel %vm581_vm1, %v3467_v0, %v8594_v30  ;;  %v4300_v63 = vadd.f32 %v4172_v27, %v4108_v19  ;;  %v3458_v4 = vrot.slane %v3364_v14, 4  ;;  %v8229_v1 = vsel %vm1306_vm6, %v8595_v9, %v8173_v40 }
 0x49f   : > { %v4110_v48 = vadd.f32 %v3982_v13, %v3592_v53  ;;  %v4301_v17 = vadd.f32 %v4173_v35, %v4109_v25  ;;  %v4373_v54 = vmul.f32 %v7713_v23, %v4299_v31  ;;  %v8235_v7 = vsel %vm3474_vm13, %v8595_v9, %v8173_v40  ;;  %v3263_v53 = vpop.f32.mrf.mxu3  ;;  %v3368_v19 = vpop.f32.mrf.mxu1 }
 0x4a0   : > { %v8240_v0 = vsel %vm3479_vm14, %v8595_v9, %v8173_v40  ;;  %v4374_v58 = vmul.f32 %v8138_v36, %v4300_v63  ;;  %v3597_v30 = vsel %vm3472_vm4, %v7934_v62, %v3458_v4  ;;  %v3599_v43 = vsel %vm3476_vm5, %v7939_v51, %v3458_v4 }
 0x4a1   : > { %v4302_v14 = vadd.f32 %v4174_v56, %v4110_v48  ;;  %v4375_v12 = vmul.f32 %v7685_v41, %v4301_v17  ;;  %v4447_v10 = vadd.f32 %v7754_v59, %v4373_v54  ;;  %v3600_v21 = vrot.slane %v3599_v43, 2 }
 0x4a2   : > { %v3602_v24 = vsel %vm3472_vm4, %v3458_v4, %v7945_v34  ;;  %v4448_v35 = vadd.f32 %v8151_v26, %v4374_v58  ;;  %v3605_v62 = vsel %vm3476_vm5, %v3458_v4, %v7950_v6  ;;  %v3867_v13 = vrot.slane %v3597_v30, 7 }
 0x4a3   : > { %v4376_v27 = vmul.f32 %v7688_v16, %v4302_v14  ;;  %v3603_v38 = vrot.slane %v3602_v24, 4  ;;  %v4449_v3 = vadd.f32 %v7701_v37, %v4375_v12  ;;  %v4511_v51 = vmax.f32 %v4447_v10, 0.0 }
 0x4a4   : > { %v8256_v39 = vrot.slane %v3605_v62, 6  ;;  %v4512_v25 = vmax.f32 %v4448_v35, 0.0  ;;  %v5264_v31 = vrot.slane %v3600_v21, 9  ;;  %v3868_v63 = vsel %vm7705_vm9, %v3866_v32, %v3867_v13 }
 0x4a5   : > { %v4450_v56 = vadd.f32 %v7710_v28, %v4376_v27  ;;  %v3871_v34 = vrot.slane %v3603_v38, 7  ;;  %v4513_v48 = vmax.f32 %v4449_v3, 0.0  ;;  %4654 = vst [vmem:[#allocation1 + $0x3] ss:$4 sm:$0xff] %v4511_v51  ;;  %v3983_v14 = vrot.slane %v3868_v63, 2 }
 0x4a6   : > { %v3874_v17 = vrot.slane %v8256_v39, 7  ;;  %4655 = vst [vmem:[#allocation1 + $0x20] ss:$4 sm:$0xff] %v4512_v25  ;;  %v4175_v12 = vrot.slane %v3597_v30, 4  ;;  %v8270_v32 = vsel %vm581_vm1, %v8173_v40, %v8595_v9  ;;  %v3367_v27 = vadd.f32 %v8206_v11, %v8171_v49 }
 0x4a7   : > { %v4514_v6 = vmax.f32 %v4450_v56, 0.0  ;;  %v3872_v4 = vsel %vm7705_vm9, %v5264_v31, %v3871_v34  ;;  %v3873_v54 = vrot.slane %v3871_v34, 2  ;;  %4656 = vst [vmem:[#allocation1 + $0x21] ss:$4 sm:$0xff] %v4513_v48  ;;  %v4111_v24 = vadd.f32 %v3983_v14, %v8191_v55  ;;  %v3265_v51 = vpop.f32.mrf.mxu3  ;;  %v3319_v31 = vpop.f32.mrf.mxu0 }
 0x4a8   : > { %v3876_v58 = vrot.slane %v3874_v17, 2  ;;  %v3984_v43 = vrot.slane %v3872_v4, 2  ;;  %v4176_v3 = vrot.slane %v3603_v38, 4  ;;  %v3315_v30 = vadd.f32 %v8193_v44, %v8187_v15  ;;  %v3371_v63 = vpop.f32.mrf.mxu1 }
 0x4a9   : > { %4657 = vst [vmem:[#allocation1 + $0x22] ss:$4 sm:$0xff] %v4514_v6  ;;  %v3875_v10 = vsel %vm7705_vm9, %v3873_v54, %v3874_v17  ;;  %v4177_v13 = vrot.slane %v8256_v39, 4  ;;  %v4303_v56 = vadd.f32 %v4175_v12, %v4111_v24  ;;  %v3460_v55 = vrot.slane %v3367_v27, 4 }
 0x4aa   : > { %v3985_v35 = vrot.slane %v3875_v10, 2  ;;  %v4112_v62 = vadd.f32 %v3984_v43, %v3600_v21  ;;  %v3318_v25 = vadd.f32 %v3317_v47, %v3263_v53  ;;  %v3369_v9 = vadd.f32 %v3368_v19, %v3315_v30 }
 0x4ab   : > { %v8277_v48 = vadd.f32 %v3319_v31, %v3265_v51  ;;  %v4377_v11 = vmul.f32 %v7713_v23, %v4303_v56  ;;  %v3608_v21 = vsel %vm3472_vm4, %v7966_v57, %v3460_v55  ;;  %v3610_v15 = vsel %vm3476_vm5, %v7970_v2, %v3460_v55 }
 0x4ac   : > { %v4113_v34 = vadd.f32 %v3985_v35, %v3603_v38  ;;  %v4304_v40 = vadd.f32 %v4176_v3, %v4112_v62  ;;  %v4659_v49 = vld.sshfl [vmem:[#allocation1] sm:$0xff pattern:$0x73625140]  ;;  %v3613_v44 = vsel %vm3472_vm4, %v3460_v55, %v7974_v45  ;;  %v3611_v38 = vrot.slane %v3610_v15, 2 }
 0x4ad   : > { %4716 = vst.msk [vmem:[%s6086_s14 + $0x40] sm:$0xff] %vm4707_vm10, %v4659_v49  ;;  %v3614_v19 = vrot.slane %v3613_v44, 4  ;;  %v4451_v17 = vadd.f32 %v7754_v59, %v4377_v11  ;;  %v3616_v6 = vsel %vm3476_vm5, %v3460_v55, %v7978_v33  ;;  %v3877_v57 = vrot.slane %v3608_v21, 7 }
 0x4ae   : > { %v4305_v53 = vadd.f32 %v4177_v13, %v4113_v34  ;;  %v4378_v47 = vmul.f32 %v8138_v36, %v4304_v40  ;;  %v3372_v4 = vadd.f32 %v3371_v63, %v3318_v25  ;;  %v8294_v45 = vrot.slane %v3616_v6, 6 }
 0x4af   : > { %v3880_v14 = vrot.slane %v3611_v38, 7  ;;  %v4515_v43 = vmax.f32 %v4451_v17, 0.0  ;;  %v3878_v12 = vsel %vm7705_vm9, %v3876_v58, %v3877_v57  ;;  %v3879_v10 = vrot.slane %v3877_v57, 2 }
 0x4b0   : > { %v4379_v2 = vmul.f32 %v7685_v41, %v4305_v53  ;;  %v4452_v54 = vadd.f32 %v8151_v26, %v4378_v47  ;;  %v3883_v24 = vrot.slane %v3614_v19, 7  ;;  %v3886_v33 = vrot.slane %v8294_v45, 7 }
 0x4b1   : > { %v3882_v62 = vrot.slane %v3880_v14, 2  ;;  %4658 = vst [vmem:[#allocation1 + $0x23] ss:$4 sm:$0xff] %v4515_v43  ;;  %v3881_v3 = vsel %vm7705_vm9, %v3879_v10, %v3880_v14  ;;  %v3986_v51 = vrot.slane %v3878_v12, 2  ;;  %v4178_v13 = vrot.slane %v3608_v21, 4  ;;  %v8596_v14 = vld [vmem:[#allocation12_spill] sm:$0xff] }
 0x4b2   : > { %v4453_v27 = vadd.f32 %v7701_v37, %v4379_v2  ;;  %v4516_v35 = vmax.f32 %v4452_v54, 0.0  ;;  %v3885_v30 = vrot.slane %v3883_v24, 2  ;;  %v3987_v55 = vrot.slane %v3881_v3, 2 }
 0x4b3   : > { %v3884_v58 = vsel %vm7705_vm9, %v3882_v62, %v3883_v24  ;;  %v4179_v25 = vrot.slane %v3611_v38, 4  ;;  %v3888_v34 = vrot.slane %v3886_v33, 2  ;;  %v4114_v49 = vadd.f32 %v3986_v51, %v8256_v39 }
 0x4b4   : > { %v4517_v56 = vmax.f32 %v4453_v27, 0.0  ;;  %4661 = vst [vmem:[#allocation1] ss:$4 sm:$0xff] %v4516_v35  ;;  %v3887_v31 = vsel %vm7705_vm9, %v3885_v30, %v3886_v33  ;;  %v3988_v40 = vrot.slane %v3884_v58, 2  ;;  %v4115_v15 = vadd.f32 %v3987_v55, %v3608_v21 }
 0x4b5   : > { %v3989_v11 = vrot.slane %v3887_v31, 2  ;;  %v4180_v44 = vrot.slane %v3614_v19, 4  ;;  %v3462_v53 = vrot.slane %v3369_v9, 4  ;;  %v4181_v63 = vrot.slane %v8294_v45, 4 }
 0x4b6   : > { %4662 = vst [vmem:[#allocation1 + $0x1] ss:$4 sm:$0xff] %v4517_v56  ;;  %v4116_v47 = vadd.f32 %v3988_v40, %v3611_v38  ;;  %v4306_v17 = vadd.f32 %v4178_v13, %v4114_v49  ;;  %v3464_v6 = vrot.slane %v3372_v4, 4  ;;  %v4307_v2 = vadd.f32 %v4179_v25, %v4115_v15  ;;  %v3373_v40 = vpop.f32.mrf.mxu1 }
 0x4b7   : > { %v4117_v57 = vadd.f32 %v3989_v11, %v3614_v19  ;;  %v3619_v54 = vsel %vm3472_vm4, %v8000_v18, %v3462_v53  ;;  %v3621_v43 = vsel %vm3476_vm5, %v8596_v14, %v3462_v53  ;;  %v3624_v9 = vsel %vm3472_vm4, %v3462_v53, %v8048_v20 }
 0x4b8   : > { %v4308_v39 = vadd.f32 %v4180_v44, %v4116_v47  ;;  %v4380_v12 = vmul.f32 %v7688_v16, %v4306_v17  ;;  %v3622_v21 = vrot.slane %v3621_v43, 2  ;;  %v4660_v38 = vld.sshfl [vmem:[#allocation1 + $0x20] sm:$0xff pattern:$0x73625140]  ;;  %v4381_v24 = vmul.f32 %v7713_v23, %v4307_v2 }
 0x4b9   : > { %v4309_v10 = vadd.f32 %v4181_v63, %v4117_v57  ;;  %v3625_v4 = vrot.slane %v3624_v9, 4  ;;  %v3627_v19 = vsel %vm3476_vm5, %v3462_v53, %v8053_v8  ;;  %4717 = vst.msk [vmem:[%s6086_s14 + $0x48] sm:$0xff] %vm4707_vm10, %v4660_v38  ;;  %v3889_v62 = vrot.slane %v3619_v54, 7 }
 0x4ba   : > { %v4382_v18 = vmul.f32 %v8138_v36, %v4308_v39  ;;  %v4454_v27 = vadd.f32 %v7710_v28, %v4380_v12  ;;  %v8322_v35 = vrot.slane %v3627_v19, 6  ;;  %v4455_v20 = vadd.f32 %v7754_v59, %v4381_v24 }
 0x4bb   : > { %v4383_v33 = vmul.f32 %v7685_v41, %v4309_v10  ;;  %v3892_v3 = vrot.slane %v3622_v21, 7  ;;  %v5265_v30 = vrot.slane %v3625_v4, 9  ;;  %v3890_v8 = vsel %vm7705_vm9, %v3888_v34, %v3889_v62 }
 0x4bc   : > { %v4456_v51 = vadd.f32 %v8151_v26, %v4382_v18  ;;  %v4518_v13 = vmax.f32 %v4454_v27, 0.0  ;;  %v3891_v56 = vrot.slane %v3889_v62, 2  ;;  %v4519_v55 = vmax.f32 %v4455_v20, 0.0  ;;  %v3268_v62 = vpop.f32.mrf.mxu3 }
 0x4bd   : > { %v4457_v58 = vadd.f32 %v7701_v37, %v4383_v33  ;;  %v3896_v25 = vrot.slane %v8322_v35, 7  ;;  %v3990_v31 = vrot.slane %v3890_v8, 2  ;;  %v4182_v15 = vrot.slane %v3619_v54, 4 }
 0x4be   : > { %v4520_v49 = vmax.f32 %v4456_v51, 0.0  ;;  %4663 = vst [vmem:[#allocation1 + $0x2] ss:$4 sm:$0xff] %v4518_v13  ;;  %v3893_v11 = vsel %vm7705_vm9, %v3891_v56, %v3892_v3  ;;  %v8334_v44 = vadd.f32 %v3373_v40, %v8277_v48  ;;  %v4183_v63 = vrot.slane %v3622_v21, 4  ;;  %v3322_v13 = vpop.f32.mrf.mxu0 }
 0x4bf   : > { %v4521_v53 = vmax.f32 %v4457_v58, 0.0  ;;  %4664 = vst [vmem:[#allocation1 + $0x3] ss:$4 sm:$0xff] %v4519_v55  ;;  %v3897_v34 = vsel %vm7705_vm9, %v5265_v30, %v3896_v25  ;;  %v3991_v47 = vrot.slane %v3893_v11, 2  ;;  %v4118_v57 = vadd.f32 %v3990_v31, %v8294_v45 }
 0x4c0   : > { %4665 = vst [vmem:[#allocation1 + $0x20] ss:$4 sm:$0xff] %v4520_v49  ;;  %v3992_v17 = vrot.slane %v3897_v34, 2  ;;  %v4184_v2 = vrot.slane %v8322_v35, 4  ;;  %v3630_v14 = vsel %vm3472_vm4, %v8073_v52, %v3464_v6  ;;  %v3632_v48 = vsel %vm3476_vm5, %v8077_v50, %v3464_v6 }
 0x4c1   : > { %4666 = vst [vmem:[#allocation1 + $0x21] ss:$4 sm:$0xff] %v4521_v53  ;;  %v4119_v43 = vadd.f32 %v3991_v47, %v3619_v54  ;;  %v3635_v39 = vsel %vm3472_vm4, %v3464_v6, %v8081_v29  ;;  %v3638_v12 = vsel %vm3476_vm5, %v3464_v6, %v8093_v46  ;;  %v4310_v9 = vadd.f32 %v4182_v15, %v4118_v57 }
 0x4c2   : > { %v4120_v21 = vadd.f32 %v3992_v17, %v3625_v4  ;;  %v3633_v38 = vrot.slane %v3632_v48, 2  ;;  %v3636_v45 = vrot.slane %v3635_v39, 4  ;;  %v3898_v10 = vrot.slane %v3896_v25, 2 }
 0x4c3   : > { %v4311_v24 = vadd.f32 %v4183_v63, %v4119_v43  ;;  %v8348_v19 = vrot.slane %v3638_v12, 6  ;;  %v3899_v52 = vrot.slane %v3630_v14, 7  ;;  %v4384_v18 = vmul.f32 %v7688_v16, %v4310_v9  ;;  %v3376_v12 = vpop.f32.mrf.mxu1 }
 0x4c4   : > { %v4312_v54 = vadd.f32 %v4184_v2, %v4120_v21  ;;  %v3902_v50 = vrot.slane %v3633_v38, 7  ;;  %v3905_v27 = vrot.slane %v3636_v45, 7  ;;  %v4185_v55 = vrot.slane %v3630_v14, 4 }
 0x4c5   : > { %v4385_v29 = vmul.f32 %v7713_v23, %v4311_v24  ;;  %v3900_v46 = vsel %vm7705_vm9, %v3898_v10, %v3899_v52  ;;  %v3901_v6 = vrot.slane %v3899_v52, 2  ;;  %v3908_v4 = vrot.slane %v8348_v19, 7 }
 0x4c6   : > { %v4669_v33 = vld.sshfl [vmem:[#allocation1] sm:$0xff pattern:$0x73625140]  ;;  %v4386_v20 = vmul.f32 %v8138_v36, %v4312_v54  ;;  %v4458_v3 = vadd.f32 %v7710_v28, %v4384_v18  ;;  %v3904_v30 = vrot.slane %v3902_v50, 2  ;;  %v3907_v51 = vrot.slane %v3905_v27, 2 }
 0x4c7   : > { %4718 = vst.msk [vmem:[%s6086_s14 + $0x50] sm:$0xff] %vm4707_vm10, %v4669_v33  ;;  %v4459_v8 = vadd.f32 %v7754_v59, %v4385_v29  ;;  %v3903_v56 = vsel %vm7705_vm9, %v3901_v6, %v3902_v50  ;;  %v3993_v58 = vrot.slane %v3900_v46, 2  ;;  %v4186_v17 = vrot.slane %v3633_v38, 4  ;;  %v8597_v50 = vld [vmem:[#allocation8_spill] sm:$0xff]  ;;  %v3270_v46 = vpop.f32.mrf.mxu3 }
 0x4c8   : > { %v4460_v25 = vadd.f32 %v8151_v26, %v4386_v20  ;;  %v4522_v31 = vmax.f32 %v4458_v3, 0.0  ;;  %v3906_v40 = vsel %vm7705_vm9, %v3904_v30, %v3905_v27  ;;  %v3909_v49 = vsel %vm7705_vm9, %v3907_v51, %v3908_v4  ;;  %v8600_v3 = vld [vmem:[#allocation20_spill] sm:$0xff] }
 0x4c9   : > { %v4523_v11 = vmax.f32 %v4459_v8, 0.0  ;;  %v3994_v15 = vrot.slane %v3903_v56, 2  ;;  %v3995_v53 = vrot.slane %v3906_v40, 2  ;;  %v3996_v34 = vrot.slane %v3909_v49, 2 }
 0x4ca   : > { %v4524_v47 = vmax.f32 %v4460_v25, 0.0  ;;  %4667 = vst [vmem:[#allocation1 + $0x22] ss:$4 sm:$0xff] %v4522_v31  ;;  %v4121_v63 = vadd.f32 %v3993_v58, %v8322_v35  ;;  %v4187_v57 = vrot.slane %v3636_v45, 4  ;;  %v4188_v39 = vrot.slane %v8348_v19, 4 }
 0x4cb   : > { %4668 = vst [vmem:[#allocation1 + $0x23] ss:$4 sm:$0xff] %v4523_v11  ;;  %v4122_v2 = vadd.f32 %v3994_v15, %v3630_v14  ;;  %v4123_v43 = vadd.f32 %v3995_v53, %v3633_v38  ;;  %v4124_v48 = vadd.f32 %v3996_v34, %v3636_v45  ;;  %v3910_v21 = vrot.slane %v3908_v4, 2  ;;  %v8598_v14 = vld [vmem:[#allocation9_spill] sm:$0xff]  ;;  %v8599_v45 = vld [vmem:[#allocation14_spill] sm:$0xff] }
 0x4cc   : > { %4671 = vst [vmem:[#allocation1] ss:$4 sm:$0xff] %v4524_v47  ;;  %v4313_v9 = vadd.f32 %v4185_v55, %v4121_v63  ;;  %v3466_v10 = vrot.slane %v8334_v44, 4  ;;  %v3323_v18 = vadd.f32 %v3322_v13, %v3268_v62  ;;  %v3324_v13 = vpop.f32.mrf.mxu0 }
 0x4cd   : > { %v4314_v24 = vadd.f32 %v4186_v17, %v4122_v2  ;;  %v4315_v52 = vadd.f32 %v4187_v57, %v4123_v43  ;;  %v4316_v54 = vadd.f32 %v4188_v39, %v4124_v48  ;;  %v3325_v55 = vadd.f32 %v3324_v13, %v3270_v46  ;;  %v3378_v39 = vpop.f32.mrf.mxu1 }
 0x4ce   : > { %v4387_v35 = vmul.f32 %v7685_v41, %v4313_v9  ;;  %v3641_v27 = vsel %vm3472_vm4, %v8597_v50, %v3466_v10  ;;  %v3643_v38 = vsel %vm3476_vm5, %v8598_v14, %v3466_v10  ;;  %v3646_v29 = vsel %vm3472_vm4, %v3466_v10, %v8599_v45 }
 0x4cf   : > { %v4388_v6 = vmul.f32 %v7688_v16, %v4314_v24  ;;  %v4389_v44 = vmul.f32 %v7713_v23, %v4315_v52  ;;  %v4390_v4 = vmul.f32 %v8138_v36, %v4316_v54  ;;  %v3644_v62 = vrot.slane %v3643_v38, 2 }
 0x4d0   : > { %v4461_v33 = vadd.f32 %v7701_v37, %v4387_v35  ;;  %v3647_v20 = vrot.slane %v3646_v29, 4  ;;  %v8383_v30 = vsel %vm3476_vm5, %v3466_v10, %v8600_v3  ;;  %v3911_v51 = vrot.slane %v3641_v27, 7 }
 0x4d1   : > { %v4462_v8 = vadd.f32 %v7710_v28, %v4388_v6  ;;  %v4463_v56 = vadd.f32 %v7754_v59, %v4389_v44  ;;  %v4464_v58 = vadd.f32 %v8151_v26, %v4390_v4  ;;  %v3914_v11 = vrot.slane %v3644_v62, 7 }
 0x4d2   : > { %v4670_v25 = vld.sshfl [vmem:[#allocation1 + $0x20] sm:$0xff pattern:$0x73625140]  ;;  %v4525_v31 = vmax.f32 %v4461_v33, 0.0  ;;  %v3912_v40 = vsel %vm7705_vm9, %v3910_v21, %v3911_v51  ;;  %v3913_v49 = vrot.slane %v3911_v51, 2  ;;  %v3650_v47 = vrot.slane %v8383_v30, 6 }
 0x4d3   : > { %4719 = vst.msk [vmem:[%s6086_s14 + $0x58] sm:$0xff] %vm4707_vm10, %v4670_v25  ;;  %v4526_v15 = vmax.f32 %v4462_v8, 0.0  ;;  %v4527_v53 = vmax.f32 %v4463_v56, 0.0  ;;  %v4528_v34 = vmax.f32 %v4464_v58, 0.0  ;;  %v3916_v17 = vrot.slane %v3914_v11, 2 }
 0x4d4   : > { %4672 = vst [vmem:[#allocation1 + $0x1] ss:$4 sm:$0xff] %v4525_v31  ;;  %v3915_v63 = vsel %vm7705_vm9, %v3913_v49, %v3914_v11  ;;  %v3917_v57 = vrot.slane %v3647_v20, 7  ;;  %v3997_v2 = vrot.slane %v3912_v40, 2  ;;  %v4189_v48 = vrot.slane %v3641_v27, 4 }
 0x4d5   : > { %4673 = vst [vmem:[#allocation1 + $0x2] ss:$4 sm:$0xff] %v4526_v15  ;;  %v3998_v43 = vrot.slane %v3915_v63, 2  ;;  %v3377_v10 = vadd.f32 %v3376_v12, %v3323_v18  ;;  %v3379_v24 = vadd.f32 %v3378_v39, %v3325_v55  ;;  %v4190_v35 = vrot.slane %v3644_v62, 4 }
 0x4d6   : > { %4674 = vst [vmem:[#allocation1 + $0x3] ss:$4 sm:$0xff] %v4527_v53  ;;  %v3918_v21 = vsel %vm7705_vm9, %v3916_v17, %v3917_v57  ;;  %v4125_v9 = vadd.f32 %v3997_v2, %v8348_v19  ;;  %v5266_v50 = vrot.slane %v3650_v47, 9  ;;  %v4191_v29 = vrot.slane %v3647_v20, 4 }
 0x4d7   : > { %4675 = vst [vmem:[#allocation1 + $0x20] ss:$4 sm:$0xff] %v4528_v34  ;;  %v3999_v52 = vrot.slane %v3918_v21, 2  ;;  %v4126_v54 = vadd.f32 %v3998_v43, %v3641_v27  ;;  %v3468_v38 = vrot.slane %v3377_v10, 4  ;;  %v3470_v6 = vrot.slane %v3379_v24, 4 }
 0x4d8   : > { %v4317_v14 = vadd.f32 %v4189_v48, %v4125_v9 }
 0x4d9   : > { %v4127_v45 = vadd.f32 %v3999_v52, %v3644_v62  ;;  %v4318_v46 = vadd.f32 %v4190_v35, %v4126_v54  ;;  %v3652_v19 = vsel %vm3472_vm4, %v8199_v61, %v3468_v38  ;;  %v3654_v12 = vsel %vm3476_vm5, %v8216_v42, %v3468_v38 }
 0x4da   : > { %v4391_v44 = vmul.f32 %v7685_v41, %v4317_v14  ;;  %v3657_v18 = vsel %vm3472_vm4, %v3468_v38, %v8220_v22  ;;  %v3655_v33 = vrot.slane %v3654_v12, 2  ;;  %v3660_v3 = vsel %vm3476_vm5, %v3468_v38, %v8224_v60 }
 0x4db   : > { %v4319_v27 = vadd.f32 %v4191_v29, %v4127_v45  ;;  %v4392_v4 = vmul.f32 %v7688_v16, %v4318_v46  ;;  %v3658_v62 = vrot.slane %v3657_v18, 4  ;;  %v3921_v51 = vrot.slane %v3652_v19, 7 }
 0x4dc   : > { %v4465_v20 = vadd.f32 %v7701_v37, %v4391_v44  ;;  %v4192_v13 = vrot.slane %v3652_v19, 4  ;;  %v8413_v56 = vrot.slane %v3660_v3, 6  ;;  %v3924_v22 = vrot.slane %v3655_v33, 7 }
 0x4dd   : > { %v4679_v61 = vld.sshfl [vmem:[#allocation1] sm:$0xff pattern:$0x73625140]  ;;  %v4393_v8 = vmul.f32 %v7713_v23, %v4319_v27  ;;  %v4466_v42 = vadd.f32 %v7710_v28, %v4392_v4  ;;  %v3922_v55 = vsel %vm7705_vm9, %v5266_v50, %v3921_v51  ;;  %v3923_v25 = vrot.slane %v3921_v51, 2 }
 0x4de   : > { %4720 = vst.msk [vmem:[%s6086_s14 + $0x60] sm:$0xff] %vm4707_vm10, %v4679_v61  ;;  %v4529_v58 = vmax.f32 %v4465_v20, 0.0  ;;  %v3927_v31 = vrot.slane %v3658_v62, 7  ;;  %v3926_v49 = vrot.slane %v3924_v22, 2  ;;  %v3930_v11 = vrot.slane %v8413_v56, 7 }
 0x4df   : > { %v4467_v60 = vadd.f32 %v7754_v59, %v4393_v8  ;;  %v4530_v40 = vmax.f32 %v4466_v42, 0.0  ;;  %v3925_v15 = vsel %vm7705_vm9, %v3923_v25, %v3924_v22  ;;  %v4000_v34 = vrot.slane %v3922_v55, 2 }
 0x4e0   : > { %4676 = vst [vmem:[#allocation1 + $0x21] ss:$4 sm:$0xff] %v4529_v58  ;;  %v3929_v53 = vrot.slane %v3927_v31, 2  ;;  %v4193_v63 = vrot.slane %v3655_v33, 4  ;;  %v3928_v57 = vsel %vm7705_vm9, %v3926_v49, %v3927_v31  ;;  %v3932_v2 = vrot.slane %v3930_v11, 2 }
 0x4e1   : > { %v4531_v17 = vmax.f32 %v4467_v60, 0.0  ;;  %4677 = vst [vmem:[#allocation1 + $0x22] ss:$4 sm:$0xff] %v4530_v40  ;;  %v4001_v43 = vrot.slane %v3925_v15, 2  ;;  %v4002_v39 = vrot.slane %v3928_v57, 2  ;;  %v4128_v21 = vadd.f32 %v4000_v34, %v3650_v47 }
 0x4e2   : > { %v3931_v48 = vsel %vm7705_vm9, %v3929_v53, %v3930_v11  ;;  %v4194_v9 = vrot.slane %v3658_v62, 4  ;;  %v4195_v52 = vrot.slane %v8413_v56, 4  ;;  %v3663_v54 = vsel %vm3472_vm4, %v8229_v1, %v3470_v6 }
 0x4e3   : > { %4678 = vst [vmem:[#allocation1 + $0x23] ss:$4 sm:$0xff] %v4531_v17  ;;  %v4003_v10 = vrot.slane %v3931_v48, 2  ;;  %v4129_v24 = vadd.f32 %v4001_v43, %v3652_v19  ;;  %v4130_v35 = vadd.f32 %v4002_v39, %v3655_v33  ;;  %v4320_v50 = vadd.f32 %v4192_v13, %v4128_v21 }
 0x4e4   : > { %v3665_v14 = vsel %vm3476_vm5, %v8235_v7, %v3470_v6  ;;  %v3668_v38 = vsel %vm3472_vm4, %v3470_v6, %v8240_v0  ;;  %v3671_v19 = vsel %vm3476_vm5, %v3470_v6, %v8270_v32  ;;  %v3933_v12 = vrot.slane %v3663_v54, 7 }
 0x4e5   : > { %v4131_v45 = vadd.f32 %v4003_v10, %v3658_v62  ;;  %v4321_v30 = vadd.f32 %v4193_v63, %v4129_v24  ;;  %v3666_v47 = vrot.slane %v3665_v14, 2  ;;  %v3669_v29 = vrot.slane %v3668_v38, 4 }
 0x4e6   : > { %v4322_v46 = vadd.f32 %v4194_v9, %v4130_v35  ;;  %v4394_v44 = vmul.f32 %v8138_v36, %v4320_v50  ;;  %v3672_v27 = vrot.slane %v3671_v19, 6  ;;  %v3934_v33 = vsel %vm7705_vm9, %v3932_v2, %v3933_v12 }
 0x4e7   : > { %v4323_v1 = vadd.f32 %v4195_v52, %v4131_v45  ;;  %v4395_v18 = vmul.f32 %v7685_v41, %v4321_v30  ;;  %v3936_v7 = vrot.slane %v3666_v47, 7  ;;  %v3935_v62 = vrot.slane %v3933_v12, 2 }
 0x4e8   : > { %v4396_v4 = vmul.f32 %v7688_v16, %v4322_v46  ;;  %v4468_v0 = vadd.f32 %v8151_v26, %v4394_v44  ;;  %v3939_v6 = vrot.slane %v3669_v29, 7  ;;  %v3942_v42 = vrot.slane %v3672_v27, 7 }
 0x4e9   : > { %v4397_v20 = vmul.f32 %v7713_v23, %v4323_v1  ;;  %v4469_v3 = vadd.f32 %v7701_v37, %v4395_v18  ;;  %v3938_v32 = vrot.slane %v3936_v7, 2  ;;  %v3937_v8 = vsel %vm7705_vm9, %v3935_v62, %v3936_v7 }
 0x4ea   : > { %v4680_v51 = vld.sshfl [vmem:[#allocation1 + $0x20] sm:$0xff pattern:$0x73625140]  ;;  %v4470_v13 = vadd.f32 %v7710_v28, %v4396_v4  ;;  %v4532_v61 = vmax.f32 %v4468_v0, 0.0  ;;  %v3941_v25 = vrot.slane %v3939_v6, 2  ;;  %v4004_v60 = vrot.slane %v3934_v33, 2 }
 0x4eb   : > { %4721 = vst.msk [vmem:[%s6086_s14 + $0x68] sm:$0xff] %vm4707_vm10, %v4680_v51  ;;  %v4471_v22 = vadd.f32 %v7754_v59, %v4397_v20  ;;  %v4533_v58 = vmax.f32 %v4469_v3, 0.0  ;;  %v3940_v55 = vsel %vm7705_vm9, %v3938_v32, %v3939_v6  ;;  %v4005_v40 = vrot.slane %v3937_v8, 2 }
 0x4ec   : > { %v4534_v31 = vmax.f32 %v4470_v13, 0.0  ;;  %4681 = vst [vmem:[#allocation1] ss:$4 sm:$0xff] %v4532_v61  ;;  %v4006_v49 = vrot.slane %v3940_v55, 2  ;;  %v3943_v15 = vsel %vm7705_vm9, %v3941_v25, %v3942_v42  ;;  %v4196_v53 = vrot.slane %v3663_v54, 4 }
 0x4ed   : > { %v4535_v11 = vmax.f32 %v4471_v22, 0.0  ;;  %4682 = vst [vmem:[#allocation1 + $0x1] ss:$4 sm:$0xff] %v4533_v58  ;;  %v4197_v34 = vrot.slane %v3666_v47, 4  ;;  %v4007_v63 = vrot.slane %v3943_v15, 2  ;;  %v4132_v17 = vadd.f32 %v4004_v60, %v8413_v56 }
 0x4ee   : > { %4683 = vst [vmem:[#allocation1 + $0x2] ss:$4 sm:$0xff] %v4534_v31  ;;  %v4133_v57 = vadd.f32 %v4005_v40, %v3663_v54  ;;  %v4134_v2 = vadd.f32 %v4006_v49, %v3666_v47  ;;  %v4198_v43 = vrot.slane %v3669_v29, 4  ;;  %v4199_v39 = vrot.slane %v3672_v27, 4 }
 0x4ef   : > { %4684 = vst [vmem:[#allocation1 + $0x3] ss:$4 sm:$0xff] %v4535_v11  ;;  %v4135_v48 = vadd.f32 %v4007_v63, %v3669_v29  ;;  %v4324_v21 = vadd.f32 %v4196_v53, %v4132_v17 }
 0x4f0   : > { %v4325_v9 = vadd.f32 %v4197_v34, %v4133_v57  ;;  %v4326_v10 = vadd.f32 %v4198_v43, %v4134_v2 }
 0x4f1   : > { %v4327_v24 = vadd.f32 %v4199_v39, %v4135_v48  ;;  %v4398_v5 = vmul.f32 %v8138_v36, %v4324_v21 }
 0x4f2   : > { %v4399_v52 = vmul.f32 %v7685_v41, %v4325_v9  ;;  %v4400_v35 = vmul.f32 %v7688_v16, %v4326_v10 }
 0x4f3   : > { %v4401_v50 = vmul.f32 %v7713_v23, %v4327_v24  ;;  %v4472_v56 = vadd.f32 %v8151_v26, %v4398_v5 }
 0x4f4   : > { %v4473_v54 = vadd.f32 %v7701_v37, %v4399_v52  ;;  %v4474_v14 = vadd.f32 %v7710_v28, %v4400_v35 }
 0x4f5   : > { %v4475_v45 = vadd.f32 %v7754_v59, %v4401_v50  ;;  %v4536_v30 = vmax.f32 %v4472_v56, 0.0 }
 0x4f6   : > { %v4689_v38 = vld.sshfl [vmem:[#allocation1] sm:$0xff pattern:$0x73625140]  ;;  %v4537_v47 = vmax.f32 %v4473_v54, 0.0  ;;  %v4538_v36 = vmax.f32 %v4474_v14, 0.0 }
 0x4f7   : > { %4722 = vst.msk [vmem:[%s6086_s14 + $0x70] sm:$0xff] %vm4707_vm10, %v4689_v38  ;;  %v4539_v41 = vmax.f32 %v4475_v45, 0.0 }
 0x4f8   : > { %4685 = vst [vmem:[#allocation1 + $0x20] ss:$4 sm:$0xff] %v4536_v30 }
 0x4f9   : > { %4686 = vst [vmem:[#allocation1 + $0x21] ss:$4 sm:$0xff] %v4537_v47 }
 0x4fa   : > { %4687 = vst [vmem:[#allocation1 + $0x22] ss:$4 sm:$0xff] %v4538_v36 }
 0x4fb   : > { %4688 = vst [vmem:[#allocation1 + $0x23] ss:$4 sm:$0xff] %v4539_v41 }
 0x502   : > { %v4690_v16 = vld.sshfl [vmem:[#allocation1 + $0x20] sm:$0xff pattern:$0x73625140] }
 0x503   : > { %4723 = vst.msk [vmem:[%s6086_s14 + $0x78] sm:$0xff] %vm4707_vm10, %v4690_v16 }
 0x504 PF: > { %s18_s28 = sadd.s32 1, %s5954_s28   ;;  %s8601_s24 = smov %s5946_s26 }
 0x505   : > { %p15_p12 = scmp.ge.s32.totalorder %s18_s28, 6   ;;  %s8602_s25 = smov %s5950_s27 }
 0x506   : > { %s8603_s26 = smov %s8606_s30  ;;  %s8604_s27 = smov %s8610_s8 }
 0x507   :  { %17 = sbr.rel (!%p15_p12) target bundleno = 3 (0x3), region = 123 }
 0x50c   :  { %4756 = vsyncpa [#allocation6], 1 }
 0x50d   :  { %4758 = vsyncpa [#allocation6 + $0x1], 1 }

</bundles_post_ra>
